<compile_context>
chip_gen: v6e
topology: v6e:2x2x1
jax: 0.10.0
libtpu: 0.0.40
codegen_flags: <defaults>
</compile_context>

<pallas_src>
import math
import numpy as np
import jax
import jax.numpy as jnp
from jax.experimental import pallas as pl
from jax.experimental.pallas import tpu as pltpu


# ----------------------------------------------------------------------------
# Fused kernel
# ----------------------------------------------------------------------------
def _conv_relu_pool_block(pad_ref, x_val, wb_ref, bp_ref, ph_ref, pw_ref):
    """conv(k, same-pad, stride1) + bias + ReLU + 2x2 maxpool on one image.

    x_val  : (Hin, Win*Cin)                    packed, lane-dense activations
    wb_ref : (KH, Win*Cin, Win*Cout)           width-banded weights (W-pad folded)
    bp_ref : (1, Win*Cout)                     bias tiled over width
    ph_ref : (2, Hin//2, Hin)                  even/odd row selectors (H-pool)
    pw_ref : (2, Win*Cout, (Win//2)*Cout)      even/odd col-block selectors (W-pool)
    pad_ref: VMEM scratch (Hin+KH-1, Win*Cin)  zero H-padding
    returns (Hin//2, (Win//2)*Cout)
    """
    KH = wb_ref.shape[0]
    ph = KH // 2
    Hin = x_val.shape[0]
    N = wb_ref.shape[2]

    # In-kernel H-padding (cheap VMEM memset + interior store; no wrapper pad).
    pad_ref[...] = jnp.zeros_like(pad_ref)
    pad_ref[pl.ds(ph, Hin), :] = x_val

    # Conv: KH matmuls with K = Win*Cin (=128 here), lane-dense N = Win*Cout.
    acc = jnp.zeros((Hin, N), jnp.float32)
    for kh in range(KH):
        acc = acc + jnp.dot(pad_ref[pl.ds(kh, Hin), :], wb_ref[kh],
                            preferred_element_type=jnp.float32)
    y = jnp.maximum(acc + bp_ref[...], 0.0)

    # 2x2 max-pool via selection matmuls (no relayouts, single dense results).
    r = jnp.maximum(
        jnp.dot(ph_ref[0], y, preferred_element_type=jnp.float32),
        jnp.dot(ph_ref[1], y, preferred_element_type=jnp.float32))
    t = jnp.maximum(
        jnp.dot(r, pw_ref[0], preferred_element_type=jnp.float32),
        jnp.dot(r, pw_ref[1], preferred_element_type=jnp.float32))
    return t


def _fused_cnn_kernel(x_ref,
                      wb1, bp1, ph1, pw1,
                      wb2, bp2, ph2, pw2,
                      wb3, bp3, ph3, pw3,
                      fw1, fb1, fw2, fb2, fw3, fb3, fw4, fb4,
                      o_ref,
                      pad1, pad2, pad3):
    t1 = _conv_relu_pool_block(pad1, x_ref[...], wb1, bp1, ph1, pw1)
    t2 = _conv_relu_pool_block(pad2, t1, wb2, bp2, ph2, pw2)
    t3 = _conv_relu_pool_block(pad3, t2, wb3, bp3, ph3, pw3)

    # fc1: contract over (h, w, c) as Ho small dots.  The torch NCHW-flatten
    # permutation is already folded into fw1 at init, so no reshape/transpose
    # (and no lane relayout) is needed here.
    Ho = fw1.shape[0]
    acc = jnp.zeros((1, fw1.shape[2]), jnp.float32)
    for i in range(Ho):
        acc = acc + jnp.dot(t3[i:i + 1, :], fw1[i],
                            preferred_element_type=jnp.float32)
    h = jnp.maximum(acc + fb1[...], 0.0)
    h = jnp.maximum(jnp.dot(h, fw2[...], preferred_element_type=jnp.float32) + fb2[...], 0.0)
    h = jnp.maximum(jnp.dot(h, fw3[...], preferred_element_type=jnp.float32) + fb3[...], 0.0)
    h = jnp.maximum(jnp.dot(h, fw4[...], preferred_element_type=jnp.float32) + fb4[...], 0.0)
    o_ref[...] = h.astype(o_ref.dtype)


def cnn_discrete_forward(state, kparams):
    """state: (B, H, W, C) NHWC float32; kparams: tuple from pack_kernel_params."""
    B, H, W, C = state.shape
    assert H % 8 == 0 and W % 8 == 0, "three 2x2 pools require H, W % 8 == 0"
    x = state.reshape(B, H, W * C)            # free reshape: pack (W, C) on lanes

    wb1, wb2, wb3 = kparams[0], kparams[4], kparams[8]
    out_dim = kparams[-2].shape[-1]
    KH1, KH2, KH3 = wb1.shape[0], wb2.shape[0], wb3.shape[0]

    def full_spec(a):
        nd = a.ndim
        return pl.BlockSpec(a.shape, lambda b, _nd=nd: (0,) * _nd)

    in_specs = [pl.BlockSpec((None, H, W * C), lambda b: (b, 0, 0))]
    in_specs += [full_spec(a) for a in kparams]

    out = pl.pallas_call(
        _fused_cnn_kernel,
        out_shape=jax.ShapeDtypeStruct((B, 1, out_dim), jnp.float32),
        grid=(B,),
        in_specs=in_specs,
        out_specs=pl.BlockSpec((None, 1, out_dim), lambda b: (b, 0, 0)),
        scratch_shapes=[
            pltpu.VMEM((H + KH1 - 1, wb1.shape[1]), jnp.float32),
            pltpu.VMEM((H // 2 + KH2 - 1, wb2.shape[1]), jnp.float32),
            pltpu.VMEM((H // 4 + KH3 - 1, wb3.shape[1]), jnp.float32),
        ],
        compiler_params=pltpu.CompilerParams(
            dimension_semantics=("parallel",)),
    )(x, *kparams)
    return out.reshape(B, out_dim)


# ----------------------------------------------------------------------------
# Parameter init (mimics torch orthogonal_ init) in "standard" form.
# ----------------------------------------------------------------------------
def torch_orthogonal(key, shape):
    rows = shape[0]
    cols = math.prod(shape[1:])
    flat = (max(rows, cols), min(rows, cols))
    a = jax.random.normal(key, flat, jnp.float32)
    q, r = jnp.linalg.qr(a)
    d = jnp.sign(jnp.diagonal(r))
    d = jnp.where(d == 0, 1.0, d)
    q = q * d
    if rows < cols:
        q = q.T
    return q.reshape(shape)


def init_std_params(key, input_shape, output_dim):
    h, w, r = input_shape
    keys = jax.random.split(key, 16)

    def conv_w(k, cout, cin, ksz):
        wt = torch_orthogonal(k, (cout, cin, ksz, ksz))   # torch OIHW
        return jnp.transpose(wt, (2, 3, 1, 0))            # -> HWIO

    def bias(k, fan_in, n):
        bound = 1.0 / math.sqrt(fan_in)
        return jax.random.uniform(k, (1, n), jnp.float32, -bound, bound)

    conv_dim = lambda x, f, p, s: math.floor((x - f + 2 * p) / s) + 1
    wo, ho = w, h
    for f, p, s in [(5, 2, 1), (2, 0, 2), (7, 3, 1), (2, 0, 2), (5, 2, 1), (2, 0, 2)]:
        wo = conv_dim(wo, f, p, s)
        ho = conv_dim(ho, f, p, s)
    conv_out_dim = int(16 * wo * ho)
    dims = [conv_out_dim, conv_out_dim // 5, conv_out_dim // 50, 60, output_dim]

    params = {
        "conv1_w": conv_w(keys[0], 8, r, 5),   "conv1_b": bias(keys[1], r * 25, 8),
        "conv2_w": conv_w(keys[2], 16, 8, 5),  "conv2_b": bias(keys[3], 8 * 25, 16),
        "conv3_w": conv_w(keys[4], 16, 16, 7), "conv3_b": bias(keys[5], 16 * 49, 16),
        "pool_out_hw": (ho, wo),
    }
    fc = []
    for i in range(4):
        wt = torch_orthogonal(keys[6 + 2 * i], (dims[i + 1], dims[i]))   # (out, in)
        fc.append((jnp.transpose(wt), bias(keys[7 + 2 * i], dims[i], dims[i + 1])))
    params["fc"] = tuple(fc)
    return params


# ----------------------------------------------------------------------------
# Pack standard params into the kernel's lane-dense / banded form (init-time).
# ----------------------------------------------------------------------------
def _banded_conv_weight(w_hwio, w_in):
    """(KH, KW, Cin, Cout) HWIO -> (KH, W*Cin, W*Cout) width-banded matrices."""
    KH, KW, Cin, Cout = w_hwio.shape
    pw = KW // 2
    w_np = np.asarray(w_hwio, np.float32)
    wb = np.zeros((KH, w_in * Cin, w_in * Cout), np.float32)
    for kh in range(KH):
        for wo in range(w_in):
            for kw in range(KW):
                wi = wo + kw - pw
                if 0 <= wi < w_in:     # out-of-range taps hit zero padding
                    wb[kh, wi * Cin:(wi + 1) * Cin,
                       wo * Cout:(wo + 1) * Cout] = w_np[kh, kw]
    return jnp.asarray(wb)


def _pool_h_selectors(h_in):
    p = np.zeros((2, h_in // 2, h_in), np.float32)
    idx = np.arange(h_in // 2)
    p[0, idx, 2 * idx] = 1.0
    p[1, idx, 2 * idx + 1] = 1.0
    return jnp.asarray(p)


def _pool_w_selectors(w_in, c):
    p = np.zeros((2, w_in * c, (w_in // 2) * c), np.float32)
    for j in range(w_in // 2):
        for ch in range(c):
            p[0, (2 * j) * c + ch, j * c + ch] = 1.0
            p[1, (2 * j + 1) * c + ch, j * c + ch] = 1.0
    return jnp.asarray(p)


def pack_kernel_params(std, input_shape):
    h, w, r = input_shape
    geo = [(h, w, r), (h // 2, w // 2, 8), (h // 4, w // 4, 16)]
    packed = []
    for (Hl, Wl, _), name in zip(geo, ["conv1", "conv2", "conv3"]):
        w_hwio = std[name + "_w"]
        b = std[name + "_b"]
        cout = w_hwio.shape[-1]
        packed += [
            _banded_conv_weight(w_hwio, Wl),
            jnp.tile(b.reshape(1, cout), (1, Wl)),     # (1, Wl*Cout)
            _pool_h_selectors(Hl),
            _pool_w_selectors(Wl, cout),
        ]
    (w1, b1), (w2, b2), (w3, b3), (w4, b4) = std["fc"]
    ho, wo = std["pool_out_hw"]
    cout3 = std["conv3_w"].shape[-1]
    d1 = w1.shape[1]
    # torch flatten order is (c, h, w); kernel consumes rows of (h, w*c).
    fw1 = (jnp.asarray(w1).reshape(cout3, ho, wo, d1)
           .transpose(1, 2, 0, 3).reshape(ho, wo * cout3, d1))
    packed += [fw1, b1, w2, b2, w3, b3, w4, b4]
    return tuple(packed)


# ----------------------------------------------------------------------------
# Pure-JAX reference (standard conv / pool / flatten) for the correctness check.
# ----------------------------------------------------------------------------
def ref_forward(state, std):
    def crp(x, w, b):
        kh, kw = w.shape[0], w.shape[1]
        y = jax.lax.conv_general_dilated(
            x, w, window_strides=(1, 1),
            padding=[(kh // 2, kh // 2), (kw // 2, kw // 2)],
            dimension_numbers=("NHWC", "HWIO", "NHWC"))
        y = jnp.maximum(y + b.reshape(1, 1, 1, -1), 0.0)
        return jax.lax.reduce_window(y, -jnp.inf, jax.lax.max,
                                     (1, 2, 2, 1), (1, 2, 2, 1), "VALID")
    x = crp(state, std["conv1_w"], std["conv1_b"])
    x = crp(x, std["conv2_w"], std["conv2_b"])
    x = crp(x, std["conv3_w"], std["conv3_b"])
    x = jnp.transpose(x, (0, 3, 1, 2)).reshape(x.shape[0], -1)   # NCHW flatten
    for w, b in std["fc"]:
        x = jnp.maximum(x @ w + b, 0.0)
    return x


if __name__ == "__main__":
    key = jax.random.PRNGKey(0)
    input_shape = (32, 32, 4)   # (h, w, channels) as the torch module expects
    output_dim = 6
    B = 2

    kp, kx = jax.random.split(key)
    std = init_std_params(kp, input_shape, output_dim)
    kparams = pack_kernel_params(std, input_shape)
    x = jax.random.normal(kx, (B, *input_shape), jnp.float32)

    fwd = jax.jit(cnn_discrete_forward)
    out = jax.block_until_ready(fwd(x, kparams))
    ref = jax.block_until_ready(ref_forward(x, std))

    assert out.shape == (B, output_dim), out.shape
    assert jnp.allclose(out, ref, rtol=1e-3, atol=1e-3), (out, ref)
    print("KERNEL_OK")
</pallas_src>

<mosaic_0001>
module attributes {stable_mosaic.version = 11 : i64} {
  func.func @_fused_cnn_kernel(%arg0: i32, %arg1: memref<1x32x128xf32, #tpu.memory_space<vmem>>, %arg2: memref<5x128x256xf32, #tpu.memory_space<vmem>>, %arg3: memref<1x256xf32, #tpu.memory_space<vmem>>, %arg4: memref<2x16x32xf32, #tpu.memory_space<vmem>>, %arg5: memref<2x256x128xf32, #tpu.memory_space<vmem>>, %arg6: memref<5x128x256xf32, #tpu.memory_space<vmem>>, %arg7: memref<1x256xf32, #tpu.memory_space<vmem>>, %arg8: memref<2x8x16xf32, #tpu.memory_space<vmem>>, %arg9: memref<2x256x128xf32, #tpu.memory_space<vmem>>, %arg10: memref<7x128x128xf32, #tpu.memory_space<vmem>>, %arg11: memref<1x128xf32, #tpu.memory_space<vmem>>, %arg12: memref<2x4x8xf32, #tpu.memory_space<vmem>>, %arg13: memref<2x128x64xf32, #tpu.memory_space<vmem>>, %arg14: memref<4x64x51xf32, #tpu.memory_space<vmem>>, %arg15: memref<1x51xf32, #tpu.memory_space<vmem>>, %arg16: memref<51x5xf32, #tpu.memory_space<vmem>>, %arg17: memref<1x5xf32, #tpu.memory_space<vmem>>, %arg18: memref<5x60xf32, #tpu.memory_space<vmem>>, %arg19: memref<1x60xf32, #tpu.memory_space<vmem>>, %arg20: memref<60x6xf32, #tpu.memory_space<vmem>>, %arg21: memref<1x6xf32, #tpu.memory_space<vmem>>, %arg22: memref<1x1x6xf32, #tpu.memory_space<vmem>>, %arg23: memref<36x128xf32, #tpu.memory_space<vmem>>, %arg24: memref<20x128xf32, #tpu.memory_space<vmem>>, %arg25: memref<14x128xf32, #tpu.memory_space<vmem>>) attributes {dimension_semantics = [#tpu.dimension_semantics<parallel>], iteration_bounds = array<i64: 2>, scalar_prefetch = 0 : i64, scratch_operands = 3 : i64, tpu.core_type = #tpu.core_type<tc>, window_params = [{transform_indices = @transform_0, window_bounds = array<i64: 1, 32, 128>}, {pipeline_mode = #tpu.pipeline_mode<synchronous>, transform_indices = @transform_1, window_bounds = array<i64: 5, 128, 256>}, {pipeline_mode = #tpu.pipeline_mode<synchronous>, transform_indices = @transform_2, window_bounds = array<i64: 1, 256>}, {pipeline_mode = #tpu.pipeline_mode<synchronous>, transform_indices = @transform_3, window_bounds = array<i64: 2, 16, 32>}, {pipeline_mode = #tpu.pipeline_mode<synchronous>, transform_indices = @transform_4, window_bounds = array<i64: 2, 256, 128>}, {pipeline_mode = #tpu.pipeline_mode<synchronous>, transform_indices = @transform_5, window_bounds = array<i64: 5, 128, 256>}, {pipeline_mode = #tpu.pipeline_mode<synchronous>, transform_indices = @transform_6, window_bounds = array<i64: 1, 256>}, {pipeline_mode = #tpu.pipeline_mode<synchronous>, transform_indices = @transform_7, window_bounds = array<i64: 2, 8, 16>}, {pipeline_mode = #tpu.pipeline_mode<synchronous>, transform_indices = @transform_8, window_bounds = array<i64: 2, 256, 128>}, {pipeline_mode = #tpu.pipeline_mode<synchronous>, transform_indices = @transform_9, window_bounds = array<i64: 7, 128, 128>}, {pipeline_mode = #tpu.pipeline_mode<synchronous>, transform_indices = @transform_10, window_bounds = array<i64: 1, 128>}, {pipeline_mode = #tpu.pipeline_mode<synchronous>, transform_indices = @transform_11, window_bounds = array<i64: 2, 4, 8>}, {pipeline_mode = #tpu.pipeline_mode<synchronous>, transform_indices = @transform_12, window_bounds = array<i64: 2, 128, 64>}, {pipeline_mode = #tpu.pipeline_mode<synchronous>, transform_indices = @transform_13, window_bounds = array<i64: 4, 64, 51>}, {pipeline_mode = #tpu.pipeline_mode<synchronous>, transform_indices = @transform_14, window_bounds = array<i64: 1, 51>}, {pipeline_mode = #tpu.pipeline_mode<synchronous>, transform_indices = @transform_15, window_bounds = array<i64: 51, 5>}, {pipeline_mode = #tpu.pipeline_mode<synchronous>, transform_indices = @transform_16, window_bounds = array<i64: 1, 5>}, {pipeline_mode = #tpu.pipeline_mode<synchronous>, transform_indices = @transform_17, window_bounds = array<i64: 5, 60>}, {pipeline_mode = #tpu.pipeline_mode<synchronous>, transform_indices = @transform_18, window_bounds = array<i64: 1, 60>}, {pipeline_mode = #tpu.pipeline_mode<synchronous>, transform_indices = @transform_19, window_bounds = array<i64: 60, 6>}, {pipeline_mode = #tpu.pipeline_mode<synchronous>, transform_indices = @transform_20, window_bounds = array<i64: 1, 6>}, {transform_indices = @transform_21, window_bounds = array<i64: 1, 1, 6>}]} {
    %c0 = arith.constant 0 : index
    %c0_0 = arith.constant 0 : index
    %c0_1 = arith.constant 0 : index
    %0 = vector.load %arg1[%c0, %c0_0, %c0_1] : memref<1x32x128xf32, #tpu.memory_space<vmem>>, vector<1x32x128xf32>
    %1 = vector.shape_cast %0 : vector<1x32x128xf32> to vector<32x128xf32>
    %cst = arith.constant 0.000000e+00 : f32
    %2 = vector.broadcast %cst : f32 to vector<36x128xf32>
    %c0_2 = arith.constant 0 : index
    %c0_3 = arith.constant 0 : index
    %3 = vector.load %arg23[%c0_2, %c0_3] : memref<36x128xf32, #tpu.memory_space<vmem>>, vector<36x128xf32>
    tpu.vector_store %arg23[%c0_2, %c0_3], %2 {strides = array<i32>} : memref<36x128xf32, #tpu.memory_space<vmem>>, vector<36x128xf32>,
    %c2 = arith.constant 2 : index
    %c0_4 = arith.constant 0 : index
    %4 = vector.load %arg23[%c2, %c0_4] : memref<36x128xf32, #tpu.memory_space<vmem>>, vector<32x128xf32>
    tpu.vector_store %arg23[%c2, %c0_4], %1 {strides = array<i32>} : memref<36x128xf32, #tpu.memory_space<vmem>>, vector<32x128xf32>,
    %cst_5 = arith.constant 0.000000e+00 : f32
    %5 = vector.broadcast %cst_5 : f32 to vector<32x256xf32>
    %c0_6 = arith.constant 0 : index
    %c0_7 = arith.constant 0 : index
    %6 = vector.load %arg23[%c0_6, %c0_7] : memref<36x128xf32, #tpu.memory_space<vmem>>, vector<32x128xf32>
    %c0_8 = arith.constant 0 : index
    %c0_9 = arith.constant 0 : index
    %c0_10 = arith.constant 0 : index
    %7 = vector.load %arg2[%c0_8, %c0_9, %c0_10] : memref<5x128x256xf32, #tpu.memory_space<vmem>>, vector<1x128x256xf32>
    %8 = vector.shape_cast %7 : vector<1x128x256xf32> to vector<128x256xf32>
    %cst_11 = arith.constant dense<0.000000e+00> : vector<32x256xf32>
    %9 = tpu.matmul %6, %8, %cst_11 {dimension_numbers = #tpu.dot_dimension_numbers<[1], [0], [0], [1], [0, 0, 1, 1], [], []>} : vector<32x128xf32>, vector<128x256xf32>, vector<32x256xf32> -> vector<32x256xf32>
    %10 = arith.addf %5, %9 : vector<32x256xf32>
    %c1 = arith.constant 1 : index
    %c0_12 = arith.constant 0 : index
    %11 = vector.load %arg23[%c1, %c0_12] : memref<36x128xf32, #tpu.memory_space<vmem>>, vector<32x128xf32>
    %c1_13 = arith.constant 1 : index
    %c0_14 = arith.constant 0 : index
    %c0_15 = arith.constant 0 : index
    %12 = vector.load %arg2[%c1_13, %c0_14, %c0_15] : memref<5x128x256xf32, #tpu.memory_space<vmem>>, vector<1x128x256xf32>
    %13 = vector.shape_cast %12 : vector<1x128x256xf32> to vector<128x256xf32>
    %cst_16 = arith.constant dense<0.000000e+00> : vector<32x256xf32>
    %14 = tpu.matmul %11, %13, %cst_16 {dimension_numbers = #tpu.dot_dimension_numbers<[1], [0], [0], [1], [0, 0, 1, 1], [], []>} : vector<32x128xf32>, vector<128x256xf32>, vector<32x256xf32> -> vector<32x256xf32>
    %15 = arith.addf %10, %14 : vector<32x256xf32>
    %c2_17 = arith.constant 2 : index
    %c0_18 = arith.constant 0 : index
    %16 = vector.load %arg23[%c2_17, %c0_18] : memref<36x128xf32, #tpu.memory_space<vmem>>, vector<32x128xf32>
    %c2_19 = arith.constant 2 : index
    %c0_20 = arith.constant 0 : index
    %c0_21 = arith.constant 0 : index
    %17 = vector.load %arg2[%c2_19, %c0_20, %c0_21] : memref<5x128x256xf32, #tpu.memory_space<vmem>>, vector<1x128x256xf32>
    %18 = vector.shape_cast %17 : vector<1x128x256xf32> to vector<128x256xf32>
    %cst_22 = arith.constant dense<0.000000e+00> : vector<32x256xf32>
    %19 = tpu.matmul %16, %18, %cst_22 {dimension_numbers = #tpu.dot_dimension_numbers<[1], [0], [0], [1], [0, 0, 1, 1], [], []>} : vector<32x128xf32>, vector<128x256xf32>, vector<32x256xf32> -> vector<32x256xf32>
    %20 = arith.addf %15, %19 : vector<32x256xf32>
    %c3 = arith.constant 3 : index
    %c0_23 = arith.constant 0 : index
    %21 = vector.load %arg23[%c3, %c0_23] : memref<36x128xf32, #tpu.memory_space<vmem>>, vector<32x128xf32>
    %c3_24 = arith.constant 3 : index
    %c0_25 = arith.constant 0 : index
    %c0_26 = arith.constant 0 : index
    %22 = vector.load %arg2[%c3_24, %c0_25, %c0_26] : memref<5x128x256xf32, #tpu.memory_space<vmem>>, vector<1x128x256xf32>
    %23 = vector.shape_cast %22 : vector<1x128x256xf32> to vector<128x256xf32>
    %cst_27 = arith.constant dense<0.000000e+00> : vector<32x256xf32>
    %24 = tpu.matmul %21, %23, %cst_27 {dimension_numbers = #tpu.dot_dimension_numbers<[1], [0], [0], [1], [0, 0, 1, 1], [], []>} : vector<32x128xf32>, vector<128x256xf32>, vector<32x256xf32> -> vector<32x256xf32>
    %25 = arith.addf %20, %24 : vector<32x256xf32>
    %c4 = arith.constant 4 : index
    %c0_28 = arith.constant 0 : index
    %26 = vector.load %arg23[%c4, %c0_28] : memref<36x128xf32, #tpu.memory_space<vmem>>, vector<32x128xf32>
    %c4_29 = arith.constant 4 : index
    %c0_30 = arith.constant 0 : index
    %c0_31 = arith.constant 0 : index
    %27 = vector.load %arg2[%c4_29, %c0_30, %c0_31] : memref<5x128x256xf32, #tpu.memory_space<vmem>>, vector<1x128x256xf32>
    %28 = vector.shape_cast %27 : vector<1x128x256xf32> to vector<128x256xf32>
    %cst_32 = arith.constant dense<0.000000e+00> : vector<32x256xf32>
    %29 = tpu.matmul %26, %28, %cst_32 {dimension_numbers = #tpu.dot_dimension_numbers<[1], [0], [0], [1], [0, 0, 1, 1], [], []>} : vector<32x128xf32>, vector<128x256xf32>, vector<32x256xf32> -> vector<32x256xf32>
    %30 = arith.addf %25, %29 : vector<32x256xf32>
    %c0_33 = arith.constant 0 : index
    %c0_34 = arith.constant 0 : index
    %31 = vector.load %arg3[%c0_33, %c0_34] : memref<1x256xf32, #tpu.memory_space<vmem>>, vector<1x256xf32>
    %32 = vector.broadcast %31 : vector<1x256xf32> to vector<32x256xf32>
    %33 = arith.addf %30, %32 : vector<32x256xf32>
    %cst_35 = arith.constant 0.000000e+00 : f32
    %34 = vector.broadcast %cst_35 : f32 to vector<32x256xf32>
    %35 = arith.maximumf %33, %34 : vector<32x256xf32>
    %c0_36 = arith.constant 0 : index
    %c0_37 = arith.constant 0 : index
    %c0_38 = arith.constant 0 : index
    %36 = vector.load %arg4[%c0_36, %c0_37, %c0_38] : memref<2x16x32xf32, #tpu.memory_space<vmem>>, vector<1x16x32xf32>
    %37 = vector.shape_cast %36 : vector<1x16x32xf32> to vector<16x32xf32>
    %cst_39 = arith.constant dense<0.000000e+00> : vector<16x256xf32>
    %38 = tpu.matmul %37, %35, %cst_39 {dimension_numbers = #tpu.dot_dimension_numbers<[1], [0], [0], [1], [0, 0, 1, 1], [], []>} : vector<16x32xf32>, vector<32x256xf32>, vector<16x256xf32> -> vector<16x256xf32>
    %c1_40 = arith.constant 1 : index
    %c0_41 = arith.constant 0 : index
    %c0_42 = arith.constant 0 : index
    %39 = vector.load %arg4[%c1_40, %c0_41, %c0_42] : memref<2x16x32xf32, #tpu.memory_space<vmem>>, vector<1x16x32xf32>
    %40 = vector.shape_cast %39 : vector<1x16x32xf32> to vector<16x32xf32>
    %cst_43 = arith.constant dense<0.000000e+00> : vector<16x256xf32>
    %41 = tpu.matmul %40, %35, %cst_43 {dimension_numbers = #tpu.dot_dimension_numbers<[1], [0], [0], [1], [0, 0, 1, 1], [], []>} : vector<16x32xf32>, vector<32x256xf32>, vector<16x256xf32> -> vector<16x256xf32>
    %42 = arith.maximumf %38, %41 : vector<16x256xf32>
    %c0_44 = arith.constant 0 : index
    %c0_45 = arith.constant 0 : index
    %c0_46 = arith.constant 0 : index
    %43 = vector.load %arg5[%c0_44, %c0_45, %c0_46] : memref<2x256x128xf32, #tpu.memory_space<vmem>>, vector<1x256x128xf32>
    %44 = vector.shape_cast %43 : vector<1x256x128xf32> to vector<256x128xf32>
    %cst_47 = arith.constant dense<0.000000e+00> : vector<16x128xf32>
    %45 = tpu.matmul %42, %44, %cst_47 {dimension_numbers = #tpu.dot_dimension_numbers<[1], [0], [0], [1], [0, 0, 1, 1], [], []>} : vector<16x256xf32>, vector<256x128xf32>, vector<16x128xf32> -> vector<16x128xf32>
    %c1_48 = arith.constant 1 : index
    %c0_49 = arith.constant 0 : index
    %c0_50 = arith.constant 0 : index
    %46 = vector.load %arg5[%c1_48, %c0_49, %c0_50] : memref<2x256x128xf32, #tpu.memory_space<vmem>>, vector<1x256x128xf32>
    %47 = vector.shape_cast %46 : vector<1x256x128xf32> to vector<256x128xf32>
    %cst_51 = arith.constant dense<0.000000e+00> : vector<16x128xf32>
    %48 = tpu.matmul %42, %47, %cst_51 {dimension_numbers = #tpu.dot_dimension_numbers<[1], [0], [0], [1], [0, 0, 1, 1], [], []>} : vector<16x256xf32>, vector<256x128xf32>, vector<16x128xf32> -> vector<16x128xf32>
    %49 = arith.maximumf %45, %48 : vector<16x128xf32>
    %cst_52 = arith.constant 0.000000e+00 : f32
    %50 = vector.broadcast %cst_52 : f32 to vector<20x128xf32>
    %c0_53 = arith.constant 0 : index
    %c0_54 = arith.constant 0 : index
    %51 = vector.load %arg24[%c0_53, %c0_54] : memref<20x128xf32, #tpu.memory_space<vmem>>, vector<20x128xf32>
    tpu.vector_store %arg24[%c0_53, %c0_54], %50 {strides = array<i32>} : memref<20x128xf32, #tpu.memory_space<vmem>>, vector<20x128xf32>,
    %c2_55 = arith.constant 2 : index
    %c0_56 = arith.constant 0 : index
    %52 = vector.load %arg24[%c2_55, %c0_56] : memref<20x128xf32, #tpu.memory_space<vmem>>, vector<16x128xf32>
    tpu.vector_store %arg24[%c2_55, %c0_56], %49 {strides = array<i32>} : memref<20x128xf32, #tpu.memory_space<vmem>>, vector<16x128xf32>,
    %cst_57 = arith.constant 0.000000e+00 : f32
    %53 = vector.broadcast %cst_57 : f32 to vector<16x256xf32>
    %c0_58 = arith.constant 0 : index
    %c0_59 = arith.constant 0 : index
    %54 = vector.load %arg24[%c0_58, %c0_59] : memref<20x128xf32, #tpu.memory_space<vmem>>, vector<16x128xf32>
    %c0_60 = arith.constant 0 : index
    %c0_61 = arith.constant 0 : index
    %c0_62 = arith.constant 0 : index
    %55 = vector.load %arg6[%c0_60, %c0_61, %c0_62] : memref<5x128x256xf32, #tpu.memory_space<vmem>>, vector<1x128x256xf32>
    %56 = vector.shape_cast %55 : vector<1x128x256xf32> to vector<128x256xf32>
    %cst_63 = arith.constant dense<0.000000e+00> : vector<16x256xf32>
    %57 = tpu.matmul %54, %56, %cst_63 {dimension_numbers = #tpu.dot_dimension_numbers<[1], [0], [0], [1], [0, 0, 1, 1], [], []>} : vector<16x128xf32>, vector<128x256xf32>, vector<16x256xf32> -> vector<16x256xf32>
    %58 = arith.addf %53, %57 : vector<16x256xf32>
    %c1_64 = arith.constant 1 : index
    %c0_65 = arith.constant 0 : index
    %59 = vector.load %arg24[%c1_64, %c0_65] : memref<20x128xf32, #tpu.memory_space<vmem>>, vector<16x128xf32>
    %c1_66 = arith.constant 1 : index
    %c0_67 = arith.constant 0 : index
    %c0_68 = arith.constant 0 : index
    %60 = vector.load %arg6[%c1_66, %c0_67, %c0_68] : memref<5x128x256xf32, #tpu.memory_space<vmem>>, vector<1x128x256xf32>
    %61 = vector.shape_cast %60 : vector<1x128x256xf32> to vector<128x256xf32>
    %cst_69 = arith.constant dense<0.000000e+00> : vector<16x256xf32>
    %62 = tpu.matmul %59, %61, %cst_69 {dimension_numbers = #tpu.dot_dimension_numbers<[1], [0], [0], [1], [0, 0, 1, 1], [], []>} : vector<16x128xf32>, vector<128x256xf32>, vector<16x256xf32> -> vector<16x256xf32>
    %63 = arith.addf %58, %62 : vector<16x256xf32>
    %c2_70 = arith.constant 2 : index
    %c0_71 = arith.constant 0 : index
    %64 = vector.load %arg24[%c2_70, %c0_71] : memref<20x128xf32, #tpu.memory_space<vmem>>, vector<16x128xf32>
    %c2_72 = arith.constant 2 : index
    %c0_73 = arith.constant 0 : index
    %c0_74 = arith.constant 0 : index
    %65 = vector.load %arg6[%c2_72, %c0_73, %c0_74] : memref<5x128x256xf32, #tpu.memory_space<vmem>>, vector<1x128x256xf32>
    %66 = vector.shape_cast %65 : vector<1x128x256xf32> to vector<128x256xf32>
    %cst_75 = arith.constant dense<0.000000e+00> : vector<16x256xf32>
    %67 = tpu.matmul %64, %66, %cst_75 {dimension_numbers = #tpu.dot_dimension_numbers<[1], [0], [0], [1], [0, 0, 1, 1], [], []>} : vector<16x128xf32>, vector<128x256xf32>, vector<16x256xf32> -> vector<16x256xf32>
    %68 = arith.addf %63, %67 : vector<16x256xf32>
    %c3_76 = arith.constant 3 : index
    %c0_77 = arith.constant 0 : index
    %69 = vector.load %arg24[%c3_76, %c0_77] : memref<20x128xf32, #tpu.memory_space<vmem>>, vector<16x128xf32>
    %c3_78 = arith.constant 3 : index
    %c0_79 = arith.constant 0 : index
    %c0_80 = arith.constant 0 : index
    %70 = vector.load %arg6[%c3_78, %c0_79, %c0_80] : memref<5x128x256xf32, #tpu.memory_space<vmem>>, vector<1x128x256xf32>
    %71 = vector.shape_cast %70 : vector<1x128x256xf32> to vector<128x256xf32>
    %cst_81 = arith.constant dense<0.000000e+00> : vector<16x256xf32>
    %72 = tpu.matmul %69, %71, %cst_81 {dimension_numbers = #tpu.dot_dimension_numbers<[1], [0], [0], [1], [0, 0, 1, 1], [], []>} : vector<16x128xf32>, vector<128x256xf32>, vector<16x256xf32> -> vector<16x256xf32>
    %73 = arith.addf %68, %72 : vector<16x256xf32>
    %c4_82 = arith.constant 4 : index
    %c0_83 = arith.constant 0 : index
    %74 = vector.load %arg24[%c4_82, %c0_83] : memref<20x128xf32, #tpu.memory_space<vmem>>, vector<16x128xf32>
    %c4_84 = arith.constant 4 : index
    %c0_85 = arith.constant 0 : index
    %c0_86 = arith.constant 0 : index
    %75 = vector.load %arg6[%c4_84, %c0_85, %c0_86] : memref<5x128x256xf32, #tpu.memory_space<vmem>>, vector<1x128x256xf32>
    %76 = vector.shape_cast %75 : vector<1x128x256xf32> to vector<128x256xf32>
    %cst_87 = arith.constant dense<0.000000e+00> : vector<16x256xf32>
    %77 = tpu.matmul %74, %76, %cst_87 {dimension_numbers = #tpu.dot_dimension_numbers<[1], [0], [0], [1], [0, 0, 1, 1], [], []>} : vector<16x128xf32>, vector<128x256xf32>, vector<16x256xf32> -> vector<16x256xf32>
    %78 = arith.addf %73, %77 : vector<16x256xf32>
    %c0_88 = arith.constant 0 : index
    %c0_89 = arith.constant 0 : index
    %79 = vector.load %arg7[%c0_88, %c0_89] : memref<1x256xf32, #tpu.memory_space<vmem>>, vector<1x256xf32>
    %80 = vector.broadcast %79 : vector<1x256xf32> to vector<16x256xf32>
    %81 = arith.addf %78, %80 : vector<16x256xf32>
    %cst_90 = arith.constant 0.000000e+00 : f32
    %82 = vector.broadcast %cst_90 : f32 to vector<16x256xf32>
    %83 = arith.maximumf %81, %82 : vector<16x256xf32>
    %c0_91 = arith.constant 0 : index
    %c0_92 = arith.constant 0 : index
    %c0_93 = arith.constant 0 : index
    %84 = vector.load %arg8[%c0_91, %c0_92, %c0_93] : memref<2x8x16xf32, #tpu.memory_space<vmem>>, vector<1x8x16xf32>
    %85 = vector.shape_cast %84 : vector<1x8x16xf32> to vector<8x16xf32>
    %cst_94 = arith.constant dense<0.000000e+00> : vector<8x256xf32>
    %86 = tpu.matmul %85, %83, %cst_94 {dimension_numbers = #tpu.dot_dimension_numbers<[1], [0], [0], [1], [0, 0, 1, 1], [], []>} : vector<8x16xf32>, vector<16x256xf32>, vector<8x256xf32> -> vector<8x256xf32>
    %c1_95 = arith.constant 1 : index
    %c0_96 = arith.constant 0 : index
    %c0_97 = arith.constant 0 : index
    %87 = vector.load %arg8[%c1_95, %c0_96, %c0_97] : memref<2x8x16xf32, #tpu.memory_space<vmem>>, vector<1x8x16xf32>
    %88 = vector.shape_cast %87 : vector<1x8x16xf32> to vector<8x16xf32>
    %cst_98 = arith.constant dense<0.000000e+00> : vector<8x256xf32>
    %89 = tpu.matmul %88, %83, %cst_98 {dimension_numbers = #tpu.dot_dimension_numbers<[1], [0], [0], [1], [0, 0, 1, 1], [], []>} : vector<8x16xf32>, vector<16x256xf32>, vector<8x256xf32> -> vector<8x256xf32>
    %90 = arith.maximumf %86, %89 : vector<8x256xf32>
    %c0_99 = arith.constant 0 : index
    %c0_100 = arith.constant 0 : index
    %c0_101 = arith.constant 0 : index
    %91 = vector.load %arg9[%c0_99, %c0_100, %c0_101] : memref<2x256x128xf32, #tpu.memory_space<vmem>>, vector<1x256x128xf32>
    %92 = vector.shape_cast %91 : vector<1x256x128xf32> to vector<256x128xf32>
    %cst_102 = arith.constant dense<0.000000e+00> : vector<8x128xf32>
    %93 = tpu.matmul %90, %92, %cst_102 {dimension_numbers = #tpu.dot_dimension_numbers<[1], [0], [0], [1], [0, 0, 1, 1], [], []>} : vector<8x256xf32>, vector<256x128xf32>, vector<8x128xf32> -> vector<8x128xf32>
    %c1_103 = arith.constant 1 : index
    %c0_104 = arith.constant 0 : index
    %c0_105 = arith.constant 0 : index
    %94 = vector.load %arg9[%c1_103, %c0_104, %c0_105] : memref<2x256x128xf32, #tpu.memory_space<vmem>>, vector<1x256x128xf32>
    %95 = vector.shape_cast %94 : vector<1x256x128xf32> to vector<256x128xf32>
    %cst_106 = arith.constant dense<0.000000e+00> : vector<8x128xf32>
    %96 = tpu.matmul %90, %95, %cst_106 {dimension_numbers = #tpu.dot_dimension_numbers<[1], [0], [0], [1], [0, 0, 1, 1], [], []>} : vector<8x256xf32>, vector<256x128xf32>, vector<8x128xf32> -> vector<8x128xf32>
    %97 = arith.maximumf %93, %96 : vector<8x128xf32>
    %cst_107 = arith.constant 0.000000e+00 : f32
    %98 = vector.broadcast %cst_107 : f32 to vector<14x128xf32>
    %c0_108 = arith.constant 0 : index
    %c0_109 = arith.constant 0 : index
    %99 = vector.load %arg25[%c0_108, %c0_109] : memref<14x128xf32, #tpu.memory_space<vmem>>, vector<14x128xf32>
    tpu.vector_store %arg25[%c0_108, %c0_109], %98 {strides = array<i32>} : memref<14x128xf32, #tpu.memory_space<vmem>>, vector<14x128xf32>,
    %c3_110 = arith.constant 3 : index
    %c0_111 = arith.constant 0 : index
    %100 = vector.load %arg25[%c3_110, %c0_111] : memref<14x128xf32, #tpu.memory_space<vmem>>, vector<8x128xf32>
    tpu.vector_store %arg25[%c3_110, %c0_111], %97 {strides = array<i32>} : memref<14x128xf32, #tpu.memory_space<vmem>>, vector<8x128xf32>,
    %cst_112 = arith.constant 0.000000e+00 : f32
    %101 = vector.broadcast %cst_112 : f32 to vector<8x128xf32>
    %c0_113 = arith.constant 0 : index
    %c0_114 = arith.constant 0 : index
    %102 = vector.load %arg25[%c0_113, %c0_114] : memref<14x128xf32, #tpu.memory_space<vmem>>, vector<8x128xf32>
    %c0_115 = arith.constant 0 : index
    %c0_116 = arith.constant 0 : index
    %c0_117 = arith.constant 0 : index
    %103 = vector.load %arg10[%c0_115, %c0_116, %c0_117] : memref<7x128x128xf32, #tpu.memory_space<vmem>>, vector<1x128x128xf32>
    %104 = vector.shape_cast %103 : vector<1x128x128xf32> to vector<128x128xf32>
    %cst_118 = arith.constant dense<0.000000e+00> : vector<8x128xf32>
    %105 = tpu.matmul %102, %104, %cst_118 {dimension_numbers = #tpu.dot_dimension_numbers<[1], [0], [0], [1], [0, 0, 1, 1], [], []>} : vector<8x128xf32>, vector<128x128xf32>, vector<8x128xf32> -> vector<8x128xf32>
    %106 = arith.addf %101, %105 : vector<8x128xf32>
    %c1_119 = arith.constant 1 : index
    %c0_120 = arith.constant 0 : index
    %107 = vector.load %arg25[%c1_119, %c0_120] : memref<14x128xf32, #tpu.memory_space<vmem>>, vector<8x128xf32>
    %c1_121 = arith.constant 1 : index
    %c0_122 = arith.constant 0 : index
    %c0_123 = arith.constant 0 : index
    %108 = vector.load %arg10[%c1_121, %c0_122, %c0_123] : memref<7x128x128xf32, #tpu.memory_space<vmem>>, vector<1x128x128xf32>
    %109 = vector.shape_cast %108 : vector<1x128x128xf32> to vector<128x128xf32>
    %cst_124 = arith.constant dense<0.000000e+00> : vector<8x128xf32>
    %110 = tpu.matmul %107, %109, %cst_124 {dimension_numbers = #tpu.dot_dimension_numbers<[1], [0], [0], [1], [0, 0, 1, 1], [], []>} : vector<8x128xf32>, vector<128x128xf32>, vector<8x128xf32> -> vector<8x128xf32>
    %111 = arith.addf %106, %110 : vector<8x128xf32>
    %c2_125 = arith.constant 2 : index
    %c0_126 = arith.constant 0 : index
    %112 = vector.load %arg25[%c2_125, %c0_126] : memref<14x128xf32, #tpu.memory_space<vmem>>, vector<8x128xf32>
    %c2_127 = arith.constant 2 : index
    %c0_128 = arith.constant 0 : index
    %c0_129 = arith.constant 0 : index
    %113 = vector.load %arg10[%c2_127, %c0_128, %c0_129] : memref<7x128x128xf32, #tpu.memory_space<vmem>>, vector<1x128x128xf32>
    %114 = vector.shape_cast %113 : vector<1x128x128xf32> to vector<128x128xf32>
    %cst_130 = arith.constant dense<0.000000e+00> : vector<8x128xf32>
    %115 = tpu.matmul %112, %114, %cst_130 {dimension_numbers = #tpu.dot_dimension_numbers<[1], [0], [0], [1], [0, 0, 1, 1], [], []>} : vector<8x128xf32>, vector<128x128xf32>, vector<8x128xf32> -> vector<8x128xf32>
    %116 = arith.addf %111, %115 : vector<8x128xf32>
    %c3_131 = arith.constant 3 : index
    %c0_132 = arith.constant 0 : index
    %117 = vector.load %arg25[%c3_131, %c0_132] : memref<14x128xf32, #tpu.memory_space<vmem>>, vector<8x128xf32>
    %c3_133 = arith.constant 3 : index
    %c0_134 = arith.constant 0 : index
    %c0_135 = arith.constant 0 : index
    %118 = vector.load %arg10[%c3_133, %c0_134, %c0_135] : memref<7x128x128xf32, #tpu.memory_space<vmem>>, vector<1x128x128xf32>
    %119 = vector.shape_cast %118 : vector<1x128x128xf32> to vector<128x128xf32>
    %cst_136 = arith.constant dense<0.000000e+00> : vector<8x128xf32>
    %120 = tpu.matmul %117, %119, %cst_136 {dimension_numbers = #tpu.dot_dimension_numbers<[1], [0], [0], [1], [0, 0, 1, 1], [], []>} : vector<8x128xf32>, vector<128x128xf32>, vector<8x128xf32> -> vector<8x128xf32>
    %121 = arith.addf %116, %120 : vector<8x128xf32>
    %c4_137 = arith.constant 4 : index
    %c0_138 = arith.constant 0 : index
    %122 = vector.load %arg25[%c4_137, %c0_138] : memref<14x128xf32, #tpu.memory_space<vmem>>, vector<8x128xf32>
    %c4_139 = arith.constant 4 : index
    %c0_140 = arith.constant 0 : index
    %c0_141 = arith.constant 0 : index
    %123 = vector.load %arg10[%c4_139, %c0_140, %c0_141] : memref<7x128x128xf32, #tpu.memory_space<vmem>>, vector<1x128x128xf32>
    %124 = vector.shape_cast %123 : vector<1x128x128xf32> to vector<128x128xf32>
    %cst_142 = arith.constant dense<0.000000e+00> : vector<8x128xf32>
    %125 = tpu.matmul %122, %124, %cst_142 {dimension_numbers = #tpu.dot_dimension_numbers<[1], [0], [0], [1], [0, 0, 1, 1], [], []>} : vector<8x128xf32>, vector<128x128xf32>, vector<8x128xf32> -> vector<8x128xf32>
    %126 = arith.addf %121, %125 : vector<8x128xf32>
    %c5 = arith.constant 5 : index
    %c0_143 = arith.constant 0 : index
    %127 = vector.load %arg25[%c5, %c0_143] : memref<14x128xf32, #tpu.memory_space<vmem>>, vector<8x128xf32>
    %c5_144 = arith.constant 5 : index
    %c0_145 = arith.constant 0 : index
    %c0_146 = arith.constant 0 : index
    %128 = vector.load %arg10[%c5_144, %c0_145, %c0_146] : memref<7x128x128xf32, #tpu.memory_space<vmem>>, vector<1x128x128xf32>
    %129 = vector.shape_cast %128 : vector<1x128x128xf32> to vector<128x128xf32>
    %cst_147 = arith.constant dense<0.000000e+00> : vector<8x128xf32>
    %130 = tpu.matmul %127, %129, %cst_147 {dimension_numbers = #tpu.dot_dimension_numbers<[1], [0], [0], [1], [0, 0, 1, 1], [], []>} : vector<8x128xf32>, vector<128x128xf32>, vector<8x128xf32> -> vector<8x128xf32>
    %131 = arith.addf %126, %130 : vector<8x128xf32>
    %c6 = arith.constant 6 : index
    %c0_148 = arith.constant 0 : index
    %132 = vector.load %arg25[%c6, %c0_148] : memref<14x128xf32, #tpu.memory_space<vmem>>, vector<8x128xf32>
    %c6_149 = arith.constant 6 : index
    %c0_150 = arith.constant 0 : index
    %c0_151 = arith.constant 0 : index
    %133 = vector.load %arg10[%c6_149, %c0_150, %c0_151] : memref<7x128x128xf32, #tpu.memory_space<vmem>>, vector<1x128x128xf32>
    %134 = vector.shape_cast %133 : vector<1x128x128xf32> to vector<128x128xf32>
    %cst_152 = arith.constant dense<0.000000e+00> : vector<8x128xf32>
    %135 = tpu.matmul %132, %134, %cst_152 {dimension_numbers = #tpu.dot_dimension_numbers<[1], [0], [0], [1], [0, 0, 1, 1], [], []>} : vector<8x128xf32>, vector<128x128xf32>, vector<8x128xf32> -> vector<8x128xf32>
    %136 = arith.addf %131, %135 : vector<8x128xf32>
    %c0_153 = arith.constant 0 : index
    %c0_154 = arith.constant 0 : index
    %137 = vector.load %arg11[%c0_153, %c0_154] : memref<1x128xf32, #tpu.memory_space<vmem>>, vector<1x128xf32>
    %138 = vector.broadcast %137 : vector<1x128xf32> to vector<8x128xf32>
    %139 = arith.addf %136, %138 : vector<8x128xf32>
    %cst_155 = arith.constant 0.000000e+00 : f32
    %140 = vector.broadcast %cst_155 : f32 to vector<8x128xf32>
    %141 = arith.maximumf %139, %140 : vector<8x128xf32>
    %c0_156 = arith.constant 0 : index
    %c0_157 = arith.constant 0 : index
    %c0_158 = arith.constant 0 : index
    %142 = vector.load %arg12[%c0_156, %c0_157, %c0_158] : memref<2x4x8xf32, #tpu.memory_space<vmem>>, vector<1x4x8xf32>
    %143 = vector.shape_cast %142 : vector<1x4x8xf32> to vector<4x8xf32>
    %cst_159 = arith.constant dense<0.000000e+00> : vector<4x128xf32>
    %144 = tpu.matmul %143, %141, %cst_159 {dimension_numbers = #tpu.dot_dimension_numbers<[1], [0], [0], [1], [0, 0, 1, 1], [], []>} : vector<4x8xf32>, vector<8x128xf32>, vector<4x128xf32> -> vector<4x128xf32>
    %c1_160 = arith.constant 1 : index
    %c0_161 = arith.constant 0 : index
    %c0_162 = arith.constant 0 : index
    %145 = vector.load %arg12[%c1_160, %c0_161, %c0_162] : memref<2x4x8xf32, #tpu.memory_space<vmem>>, vector<1x4x8xf32>
    %146 = vector.shape_cast %145 : vector<1x4x8xf32> to vector<4x8xf32>
    %cst_163 = arith.constant dense<0.000000e+00> : vector<4x128xf32>
    %147 = tpu.matmul %146, %141, %cst_163 {dimension_numbers = #tpu.dot_dimension_numbers<[1], [0], [0], [1], [0, 0, 1, 1], [], []>} : vector<4x8xf32>, vector<8x128xf32>, vector<4x128xf32> -> vector<4x128xf32>
    %148 = arith.maximumf %144, %147 : vector<4x128xf32>
    %c0_164 = arith.constant 0 : index
    %c0_165 = arith.constant 0 : index
    %c0_166 = arith.constant 0 : index
    %149 = vector.load %arg13[%c0_164, %c0_165, %c0_166] : memref<2x128x64xf32, #tpu.memory_space<vmem>>, vector<1x128x64xf32>
    %150 = vector.shape_cast %149 : vector<1x128x64xf32> to vector<128x64xf32>
    %cst_167 = arith.constant dense<0.000000e+00> : vector<4x64xf32>
    %151 = tpu.matmul %148, %150, %cst_167 {dimension_numbers = #tpu.dot_dimension_numbers<[1], [0], [0], [1], [0, 0, 1, 1], [], []>} : vector<4x128xf32>, vector<128x64xf32>, vector<4x64xf32> -> vector<4x64xf32>
    %c1_168 = arith.constant 1 : index
    %c0_169 = arith.constant 0 : index
    %c0_170 = arith.constant 0 : index
    %152 = vector.load %arg13[%c1_168, %c0_169, %c0_170] : memref<2x128x64xf32, #tpu.memory_space<vmem>>, vector<1x128x64xf32>
    %153 = vector.shape_cast %152 : vector<1x128x64xf32> to vector<128x64xf32>
    %cst_171 = arith.constant dense<0.000000e+00> : vector<4x64xf32>
    %154 = tpu.matmul %148, %153, %cst_171 {dimension_numbers = #tpu.dot_dimension_numbers<[1], [0], [0], [1], [0, 0, 1, 1], [], []>} : vector<4x128xf32>, vector<128x64xf32>, vector<4x64xf32> -> vector<4x64xf32>
    %155 = arith.maximumf %151, %154 : vector<4x64xf32>
    %cst_172 = arith.constant 0.000000e+00 : f32
    %156 = vector.broadcast %cst_172 : f32 to vector<1x51xf32>
    %157 = vector.extract_strided_slice %155 {offsets = [0, 0], sizes = [1, 64], strides = [1, 1]} : vector<4x64xf32> to vector<1x64xf32>
    %c0_173 = arith.constant 0 : index
    %c0_174 = arith.constant 0 : index
    %c0_175 = arith.constant 0 : index
    %158 = vector.load %arg14[%c0_173, %c0_174, %c0_175] : memref<4x64x51xf32, #tpu.memory_space<vmem>>, vector<1x64x51xf32>
    %159 = vector.shape_cast %158 : vector<1x64x51xf32> to vector<64x51xf32>
    %cst_176 = arith.constant dense<0.000000e+00> : vector<1x51xf32>
    %160 = tpu.matmul %157, %159, %cst_176 {dimension_numbers = #tpu.dot_dimension_numbers<[1], [0], [0], [1], [0, 0, 1, 1], [], []>} : vector<1x64xf32>, vector<64x51xf32>, vector<1x51xf32> -> vector<1x51xf32>
    %161 = arith.addf %156, %160 : vector<1x51xf32>
    %162 = vector.extract_strided_slice %155 {offsets = [1, 0], sizes = [1, 64], strides = [1, 1]} : vector<4x64xf32> to vector<1x64xf32>
    %c1_177 = arith.constant 1 : index
    %c0_178 = arith.constant 0 : index
    %c0_179 = arith.constant 0 : index
    %163 = vector.load %arg14[%c1_177, %c0_178, %c0_179] : memref<4x64x51xf32, #tpu.memory_space<vmem>>, vector<1x64x51xf32>
    %164 = vector.shape_cast %163 : vector<1x64x51xf32> to vector<64x51xf32>
    %cst_180 = arith.constant dense<0.000000e+00> : vector<1x51xf32>
    %165 = tpu.matmul %162, %164, %cst_180 {dimension_numbers = #tpu.dot_dimension_numbers<[1], [0], [0], [1], [0, 0, 1, 1], [], []>} : vector<1x64xf32>, vector<64x51xf32>, vector<1x51xf32> -> vector<1x51xf32>
    %166 = arith.addf %161, %165 : vector<1x51xf32>
    %167 = vector.extract_strided_slice %155 {offsets = [2, 0], sizes = [1, 64], strides = [1, 1]} : vector<4x64xf32> to vector<1x64xf32>
    %c2_181 = arith.constant 2 : index
    %c0_182 = arith.constant 0 : index
    %c0_183 = arith.constant 0 : index
    %168 = vector.load %arg14[%c2_181, %c0_182, %c0_183] : memref<4x64x51xf32, #tpu.memory_space<vmem>>, vector<1x64x51xf32>
    %169 = vector.shape_cast %168 : vector<1x64x51xf32> to vector<64x51xf32>
    %cst_184 = arith.constant dense<0.000000e+00> : vector<1x51xf32>
    %170 = tpu.matmul %167, %169, %cst_184 {dimension_numbers = #tpu.dot_dimension_numbers<[1], [0], [0], [1], [0, 0, 1, 1], [], []>} : vector<1x64xf32>, vector<64x51xf32>, vector<1x51xf32> -> vector<1x51xf32>
    %171 = arith.addf %166, %170 : vector<1x51xf32>
    %172 = vector.extract_strided_slice %155 {offsets = [3, 0], sizes = [1, 64], strides = [1, 1]} : vector<4x64xf32> to vector<1x64xf32>
    %c3_185 = arith.constant 3 : index
    %c0_186 = arith.constant 0 : index
    %c0_187 = arith.constant 0 : index
    %173 = vector.load %arg14[%c3_185, %c0_186, %c0_187] : memref<4x64x51xf32, #tpu.memory_space<vmem>>, vector<1x64x51xf32>
    %174 = vector.shape_cast %173 : vector<1x64x51xf32> to vector<64x51xf32>
    %cst_188 = arith.constant dense<0.000000e+00> : vector<1x51xf32>
    %175 = tpu.matmul %172, %174, %cst_188 {dimension_numbers = #tpu.dot_dimension_numbers<[1], [0], [0], [1], [0, 0, 1, 1], [], []>} : vector<1x64xf32>, vector<64x51xf32>, vector<1x51xf32> -> vector<1x51xf32>
    %176 = arith.addf %171, %175 : vector<1x51xf32>
    %c0_189 = arith.constant 0 : index
    %c0_190 = arith.constant 0 : index
    %177 = vector.load %arg15[%c0_189, %c0_190] : memref<1x51xf32, #tpu.memory_space<vmem>>, vector<1x51xf32>
    %178 = arith.addf %176, %177 : vector<1x51xf32>
    %cst_191 = arith.constant 0.000000e+00 : f32
    %179 = vector.broadcast %cst_191 : f32 to vector<1x51xf32>
    %180 = arith.maximumf %178, %179 : vector<1x51xf32>
    %c0_192 = arith.constant 0 : index
    %c0_193 = arith.constant 0 : index
    %181 = vector.load %arg16[%c0_192, %c0_193] : memref<51x5xf32, #tpu.memory_space<vmem>>, vector<51x5xf32>
    %cst_194 = arith.constant dense<0.000000e+00> : vector<1x5xf32>
    %182 = tpu.matmul %180, %181, %cst_194 {dimension_numbers = #tpu.dot_dimension_numbers<[1], [0], [0], [1], [0, 0, 1, 1], [], []>} : vector<1x51xf32>, vector<51x5xf32>, vector<1x5xf32> -> vector<1x5xf32>
    %c0_195 = arith.constant 0 : index
    %c0_196 = arith.constant 0 : index
    %183 = vector.load %arg17[%c0_195, %c0_196] : memref<1x5xf32, #tpu.memory_space<vmem>>, vector<1x5xf32>
    %184 = arith.addf %182, %183 : vector<1x5xf32>
    %cst_197 = arith.constant 0.000000e+00 : f32
    %185 = vector.broadcast %cst_197 : f32 to vector<1x5xf32>
    %186 = arith.maximumf %184, %185 : vector<1x5xf32>
    %c0_198 = arith.constant 0 : index
    %c0_199 = arith.constant 0 : index
    %187 = vector.load %arg18[%c0_198, %c0_199] : memref<5x60xf32, #tpu.memory_space<vmem>>, vector<5x60xf32>
    %cst_200 = arith.constant dense<0.000000e+00> : vector<1x60xf32>
    %188 = tpu.matmul %186, %187, %cst_200 {dimension_numbers = #tpu.dot_dimension_numbers<[1], [0], [0], [1], [0, 0, 1, 1], [], []>} : vector<1x5xf32>, vector<5x60xf32>, vector<1x60xf32> -> vector<1x60xf32>
    %c0_201 = arith.constant 0 : index
    %c0_202 = arith.constant 0 : index
    %189 = vector.load %arg19[%c0_201, %c0_202] : memref<1x60xf32, #tpu.memory_space<vmem>>, vector<1x60xf32>
    %190 = arith.addf %188, %189 : vector<1x60xf32>
    %cst_203 = arith.constant 0.000000e+00 : f32
    %191 = vector.broadcast %cst_203 : f32 to vector<1x60xf32>
    %192 = arith.maximumf %190, %191 : vector<1x60xf32>
    %c0_204 = arith.constant 0 : index
    %c0_205 = arith.constant 0 : index
    %193 = vector.load %arg20[%c0_204, %c0_205] : memref<60x6xf32, #tpu.memory_space<vmem>>, vector<60x6xf32>
    %cst_206 = arith.constant dense<0.000000e+00> : vector<1x6xf32>
    %194 = tpu.matmul %192, %193, %cst_206 {dimension_numbers = #tpu.dot_dimension_numbers<[1], [0], [0], [1], [0, 0, 1, 1], [], []>} : vector<1x60xf32>, vector<60x6xf32>, vector<1x6xf32> -> vector<1x6xf32>
    %c0_207 = arith.constant 0 : index
    %c0_208 = arith.constant 0 : index
    %195 = vector.load %arg21[%c0_207, %c0_208] : memref<1x6xf32, #tpu.memory_space<vmem>>, vector<1x6xf32>
    %196 = arith.addf %194, %195 : vector<1x6xf32>
    %cst_209 = arith.constant 0.000000e+00 : f32
    %197 = vector.broadcast %cst_209 : f32 to vector<1x6xf32>
    %198 = arith.maximumf %196, %197 : vector<1x6xf32>
    %c0_210 = arith.constant 0 : index
    %c0_211 = arith.constant 0 : index
    %c0_212 = arith.constant 0 : index
    %199 = vector.load %arg22[%c0_210, %c0_211, %c0_212] : memref<1x1x6xf32, #tpu.memory_space<vmem>>, vector<1x1x6xf32>
    %200 = vector.shape_cast %199 : vector<1x1x6xf32> to vector<1x6xf32>
    %201 = vector.shape_cast %198 : vector<1x6xf32> to vector<1x1x6xf32>
    tpu.vector_store %arg22[%c0_210, %c0_211, %c0_212], %201 {strides = array<i32>} : memref<1x1x6xf32, #tpu.memory_space<vmem>>, vector<1x1x6xf32>,
    return
  }
  func.func @transform_0(%arg0: i32) -> (i32, i32, i32) {
    %c0_i32 = arith.constant 0 : i32
    %c0_i32_0 = arith.constant 0 : i32
    %c0_i32_1 = arith.constant 0 : i32
    return %arg0, %c0_i32, %c0_i32_0 : i32, i32, i32
  }
  func.func @transform_1(%arg0: i32) -> (i32, i32, i32) {
    %c0_i32 = arith.constant 0 : i32
    %c0_i32_0 = arith.constant 0 : i32
    %c0_i32_1 = arith.constant 0 : i32
    %c0_i32_2 = arith.constant 0 : i32
    return %c0_i32, %c0_i32_0, %c0_i32_1 : i32, i32, i32
  }
  func.func @transform_2(%arg0: i32) -> (i32, i32) {
    %c0_i32 = arith.constant 0 : i32
    %c0_i32_0 = arith.constant 0 : i32
    %c0_i32_1 = arith.constant 0 : i32
    return %c0_i32, %c0_i32_0 : i32, i32
  }
  func.func @transform_3(%arg0: i32) -> (i32, i32, i32) {
    %c0_i32 = arith.constant 0 : i32
    %c0_i32_0 = arith.constant 0 : i32
    %c0_i32_1 = arith.constant 0 : i32
    %c0_i32_2 = arith.constant 0 : i32
    return %c0_i32, %c0_i32_0, %c0_i32_1 : i32, i32, i32
  }
  func.func @transform_4(%arg0: i32) -> (i32, i32, i32) {
    %c0_i32 = arith.constant 0 : i32
    %c0_i32_0 = arith.constant 0 : i32
    %c0_i32_1 = arith.constant 0 : i32
    %c0_i32_2 = arith.constant 0 : i32
    return %c0_i32, %c0_i32_0, %c0_i32_1 : i32, i32, i32
  }
  func.func @transform_5(%arg0: i32) -> (i32, i32, i32) {
    %c0_i32 = arith.constant 0 : i32
    %c0_i32_0 = arith.constant 0 : i32
    %c0_i32_1 = arith.constant 0 : i32
    %c0_i32_2 = arith.constant 0 : i32
    return %c0_i32, %c0_i32_0, %c0_i32_1 : i32, i32, i32
  }
  func.func @transform_6(%arg0: i32) -> (i32, i32) {
    %c0_i32 = arith.constant 0 : i32
    %c0_i32_0 = arith.constant 0 : i32
    %c0_i32_1 = arith.constant 0 : i32
    return %c0_i32, %c0_i32_0 : i32, i32
  }
  func.func @transform_7(%arg0: i32) -> (i32, i32, i32) {
    %c0_i32 = arith.constant 0 : i32
    %c0_i32_0 = arith.constant 0 : i32
    %c0_i32_1 = arith.constant 0 : i32
    %c0_i32_2 = arith.constant 0 : i32
    return %c0_i32, %c0_i32_0, %c0_i32_1 : i32, i32, i32
  }
  func.func @transform_8(%arg0: i32) -> (i32, i32, i32) {
    %c0_i32 = arith.constant 0 : i32
    %c0_i32_0 = arith.constant 0 : i32
    %c0_i32_1 = arith.constant 0 : i32
    %c0_i32_2 = arith.constant 0 : i32
    return %c0_i32, %c0_i32_0, %c0_i32_1 : i32, i32, i32
  }
  func.func @transform_9(%arg0: i32) -> (i32, i32, i32) {
    %c0_i32 = arith.constant 0 : i32
    %c0_i32_0 = arith.constant 0 : i32
    %c0_i32_1 = arith.constant 0 : i32
    %c0_i32_2 = arith.constant 0 : i32
    return %c0_i32, %c0_i32_0, %c0_i32_1 : i32, i32, i32
  }
  func.func @transform_10(%arg0: i32) -> (i32, i32) {
    %c0_i32 = arith.constant 0 : i32
    %c0_i32_0 = arith.constant 0 : i32
    %c0_i32_1 = arith.constant 0 : i32
    return %c0_i32, %c0_i32_0 : i32, i32
  }
  func.func @transform_11(%arg0: i32) -> (i32, i32, i32) {
    %c0_i32 = arith.constant 0 : i32
    %c0_i32_0 = arith.constant 0 : i32
    %c0_i32_1 = arith.constant 0 : i32
    %c0_i32_2 = arith.constant 0 : i32
    return %c0_i32, %c0_i32_0, %c0_i32_1 : i32, i32, i32
  }
  func.func @transform_12(%arg0: i32) -> (i32, i32, i32) {
    %c0_i32 = arith.constant 0 : i32
    %c0_i32_0 = arith.constant 0 : i32
    %c0_i32_1 = arith.constant 0 : i32
    %c0_i32_2 = arith.constant 0 : i32
    return %c0_i32, %c0_i32_0, %c0_i32_1 : i32, i32, i32
  }
  func.func @transform_13(%arg0: i32) -> (i32, i32, i32) {
    %c0_i32 = arith.constant 0 : i32
    %c0_i32_0 = arith.constant 0 : i32
    %c0_i32_1 = arith.constant 0 : i32
    %c0_i32_2 = arith.constant 0 : i32
    return %c0_i32, %c0_i32_0, %c0_i32_1 : i32, i32, i32
  }
  func.func @transform_14(%arg0: i32) -> (i32, i32) {
    %c0_i32 = arith.constant 0 : i32
    %c0_i32_0 = arith.constant 0 : i32
    %c0_i32_1 = arith.constant 0 : i32
    return %c0_i32, %c0_i32_0 : i32, i32
  }
  func.func @transform_15(%arg0: i32) -> (i32, i32) {
    %c0_i32 = arith.constant 0 : i32
    %c0_i32_0 = arith.constant 0 : i32
    %c0_i32_1 = arith.constant 0 : i32
    return %c0_i32, %c0_i32_0 : i32, i32
  }
  func.func @transform_16(%arg0: i32) -> (i32, i32) {
    %c0_i32 = arith.constant 0 : i32
    %c0_i32_0 = arith.constant 0 : i32
    %c0_i32_1 = arith.constant 0 : i32
    return %c0_i32, %c0_i32_0 : i32, i32
  }
  func.func @transform_17(%arg0: i32) -> (i32, i32) {
    %c0_i32 = arith.constant 0 : i32
    %c0_i32_0 = arith.constant 0 : i32
    %c0_i32_1 = arith.constant 0 : i32
    return %c0_i32, %c0_i32_0 : i32, i32
  }
  func.func @transform_18(%arg0: i32) -> (i32, i32) {
    %c0_i32 = arith.constant 0 : i32
    %c0_i32_0 = arith.constant 0 : i32
    %c0_i32_1 = arith.constant 0 : i32
    return %c0_i32, %c0_i32_0 : i32, i32
  }
  func.func @transform_19(%arg0: i32) -> (i32, i32) {
    %c0_i32 = arith.constant 0 : i32
    %c0_i32_0 = arith.constant 0 : i32
    %c0_i32_1 = arith.constant 0 : i32
    return %c0_i32, %c0_i32_0 : i32, i32
  }
  func.func @transform_20(%arg0: i32) -> (i32, i32) {
    %c0_i32 = arith.constant 0 : i32
    %c0_i32_0 = arith.constant 0 : i32
    %c0_i32_1 = arith.constant 0 : i32
    return %c0_i32, %c0_i32_0 : i32, i32
  }
  func.func @transform_21(%arg0: i32) -> (i32, i32, i32) {
    %c0_i32 = arith.constant 0 : i32
    %c0_i32_0 = arith.constant 0 : i32
    %c0_i32_1 = arith.constant 0 : i32
    return %arg0, %c0_i32, %c0_i32_0 : i32, i32, i32
  }
}

</mosaic_0001>

<bundles_post_ra>
// kernel: cnn_discrete_forward.1
= control target key start
LH: loop header
LB: loop body
LE: loop exit
PB: predicated region body
PF: predicated region fallthrough
CT: control target
= control target key end

     0   :  { %s7694_s0 = inlined_call_operand.vmem [shape: f32[2,32,128], index: 0, kind: input, shape index: {}]   ;;  %s7695_s1 = inlined_call_operand.vmem [shape: f32[5,128,256], index: 1, kind: input, shape index: {}]   ;;  %s7696_s2 = inlined_call_operand.hbm [shape: f32[1,256], index: 2, kind: input, shape index: {}]   ;;  %s7697_s3 = inlined_call_operand.hbm [shape: f32[2,16,32], index: 3, kind: input, shape index: {}]   ;;  %s7698_s4 = inlined_call_operand.vmem [shape: f32[2,256,128], index: 4, kind: input, shape index: {}]   ;;  %s7699_s5 = inlined_call_operand.hbm [shape: f32[5,128,256], index: 5, kind: input, shape index: {}]   ;;  %s7700_s6 = inlined_call_operand.hbm [shape: f32[1,256], index: 6, kind: input, shape index: {}]   ;;  %s7701_s7 = inlined_call_operand.vmem [shape: f32[2,8,16], index: 7, kind: input, shape index: {}]   ;;  %s7702_s8 = inlined_call_operand.hbm [shape: f32[2,256,128], index: 8, kind: input, shape index: {}]   ;;  %s7703_s9 = inlined_call_operand.hbm [shape: f32[7,128,128], index: 9, kind: input, shape index: {}]   ;;  %s7704_s10 = inlined_call_operand.vmem [shape: f32[1,128], index: 10, kind: input, shape index: {}]   ;;  %s7705_s11 = inlined_call_operand.vmem [shape: f32[2,4,8], index: 11, kind: input, shape index: {}]   ;;  %s7706_s12 = inlined_call_operand.vmem [shape: f32[2,128,64], index: 12, kind: input, shape index: {}]   ;;  %s7707_s13 = inlined_call_operand.vmem [shape: f32[4,64,51], index: 13, kind: input, shape index: {}]   ;;  %s7708_s14 = inlined_call_operand.hbm [shape: f32[1,51], index: 14, kind: input, shape index: {}]   ;;  %s7709_s15 = inlined_call_operand.vmem [shape: f32[51,5], index: 15, kind: input, shape index: {}]   ;;  %s7710_s16 = inlined_call_operand.hbm [shape: f32[1,5], index: 16, kind: input, shape index: {}]   ;;  %s7711_s17 = inlined_call_operand.vmem [shape: f32[5,60], index: 17, kind: input, shape index: {}]   ;;  %s7712_s18 = inlined_call_operand.hbm [shape: f32[1,60], index: 18, kind: input, shape index: {}]   ;;  %s7713_s19 = inlined_call_operand.vmem [shape: f32[60,6], index: 19, kind: input, shape index: {}]   ;;  %s7714_s20 = inlined_call_operand.hbm [shape: f32[1,6], index: 20, kind: input, shape index: {}]   ;;  %s7715_s21 = inlined_call_operand.hbm [shape: f32[2,1,6], index: 21, kind: output, shape index: {}]  }
   0x1   :  { %7733 = sst [smem:[#allocation37_spill]] %s7694_s0 }
   0x2   :  { %7734 = sst [smem:[#allocation38_spill]] %s7695_s1 }
   0x3   :  { %7735 = sst [smem:[#allocation39_spill]] %s7696_s2 }
   0x4   :  { %7736 = sst [smem:[#allocation40_spill]] %s7697_s3 }
   0x5   :  { %7737 = sst [smem:[#allocation41_spill]] %s7698_s4 }
   0x6   :  { %7738 = sst [smem:[#allocation42_spill]] %s7699_s5 }
   0x7   :  { %7739 = sst [smem:[#allocation43_spill]] %s7700_s6 }
   0x8   :  { %7740 = sst [smem:[#allocation44_spill]] %s7715_s21 }
   0x9   :  { %26 = vsyncpa [#allocation6], 0 }
   0xa   :  { %27 = vsyncpa [#allocation9], 0 }
   0xb   :  { %28 = vsyncpa [#allocation12], 0 }
   0xc   :  { %29 = vsyncpa [#allocation15], 0 }
   0xd   :  { %30 = vsyncpa [#allocation18], 0 }
   0xe   :  { %31 = vsyncpa [#allocation21], 0 }
   0xf   :  { %32 = vsyncpa [#allocation7], 0 }
  0x10   :  { %34 = vsyncpa [#allocation7 + $0x1], 0  ;;  %s6217_s2 = smov 0   ;;  %s6219_s25 = smov 0  }
  0x11   :  { %s6221_s26 = smov 0   ;;  %s6223_s27 = smov 0  }
  0x12 LB: > { %7741 = sst [smem:[#allocation30_spill]] %s6076_s2  ;;  %s6238_s3 = sadd.s32 4294967295, %s6088_s27   ;;  %s6088_s27 = sphi %s6223_s27, %s7782_s27   ;;  %s6084_s26 = sphi %s6221_s26, %s7784_s26   ;;  %s6080_s25 = sphi %s6219_s25, %s7786_s25   ;;  %s6076_s2 = sphi %s6217_s2, %s7785_s2  }
  0x13   : > { %7742 = sst [smem:[#allocation31_spill]] %s6084_s26  ;;  %s4545_s28 = sadd.s32 4294967294, %s6088_s27  }
  0x14   : > { %7743 = sst [smem:[#allocation32_spill]] %s6088_s27  ;;  %s6242_s29 = sadd.s32 1, %s6088_s27  }
  0x15   : > { %7744 = sst [smem:[#allocation33_spill]] %s6242_s29  ;;  %s493_s0 = sadd.s32 1, %s6084_s26 }
  0x16   : > { %s490_s4 = ssub.s32 %s6088_s27, %s6242_s29  ;;  %p503_p0 = scmp.ne.s32.totalorder %s6084_s26, %s6080_s25 }
  0x17   : > { %p491_p1 = scmp.eq.s32.totalorder %s490_s4, 0  ;;  %p504_p2 = scmp.eq.s32.totalorder %s6238_s3, 1 }
  0x18   : > { %p509_p3 = scmp.ne.s32.totalorder %s6080_s25, %s6076_s2  ;;  %p510_p4 = scmp.eq.s32.totalorder %s4545_s28, 1 }
  0x19   : > { %s6253_s30 = scalar_select %p491_p1, %s6084_s26, %s493_s0  }
  0x1a   : > { %p6255_p5 = por %p504_p2, %p503_p0  ;;  %p6259_p6 = por %p510_p4, %p509_p3 }
  0x1b   : > { %7745 = sst [smem:[#allocation34_spill]] %s6253_s30  ;;  %p4546_p7 = scmp.ge.s32.totalorder %s6088_s27, 1 }
  0x1c   : > { %s7746_s5 = scalar_select %p6255_p5, 1, 0 }
  0x1d   : > { %s7748_s22 = scalar_select %p6259_p6, 1, 0 }
  0x1e   : > { %7747 = sst [smem:[#allocation35_spill]] %s7746_s5  ;;  %p517_p8 = scmp.lt.s32.totalorder %s6088_s27, 3 }
  0x1f   : > { %7749 = sst [smem:[#allocation36_spill]] %s7748_s22  ;;  %p7727_p9 = scmp.eq.s32.totalorder %s6238_s3, 0 }
  0x20   : > { %p6266_p10 = pnand %p4546_p7, %p517_p8  ;;  %s6090_s1 = smov [#allocation8]  }
  0x21   : > { %s543_s24 = sshll.u32 %s6090_s1, 4  ;;  %s6091_s0 = smov [#allocation11]   ;;  %s544_s24 = int_to_ptr.vmem [resolvable:$true] %s543_s24 }
  0x22   : > { %s7750_s23 = scalar_select %p6266_p10, 1, 0 }
  0x23   : > { %p5638_p11 = pneg %p6266_p10  ;;  %s573_s4 = sshll.u32 %s6091_s0, 4  ;;  %s574_s4 = int_to_ptr.vmem [resolvable:$true] %s573_s4 }
  0x24   : > { %s6092_s30 = smov [#allocation14]   ;;  %s5755_s1 = scalar_lea.vmem %s544_s24, 512 }
  0x25   : > { %p6274_p12 = pnand %p7727_p9, %p5638_p11  ;;  %s599_s26 = sshll.u32 %s6092_s30, 4  ;;  %s600_s26 = int_to_ptr.vmem [resolvable:$true] %s599_s26 }
  0x26   : > { %p5756_p0 = scmp.ne.s32.totalorder %s544_s24, %s5755_s1  ;;  %p5763_p3 = scmp.lt.s32.totalorder %s544_s24, %s544_s24 }
  0x27   : > { %p6280_p13 = pneg %p6274_p12  ;;  %p5764_p4 = scmp.lt.s32.totalorder %s5755_s1, %s5755_s1 }
  0x29   : > { %p5758_p1 = pnand %p5756_p0, %p6280_p13  ;;  %p5765_p7 = por %p5764_p4, %p5763_p3 }
  0x2b   : > { %p5759_p2 = pneg %p5758_p1 }
  0x2d   : > { %p5766_p8 = pnand %p5765_p7, %p5759_p2 }
  0x2f   : > { %5769 = shalt.err (!%p5766_p8)
}
  0x30   : > { %s7730_s0 = smov 128   ;;  %s7731_s30 = smov 8  }
  0x31   : > { %s7753_s27 = sld [smem:[#allocation40_spill]]  ;;  %s5781_s21 = scalar_lea.vmem %s574_s4, 32 }
  0x32   : > { %p5782_p11 = scmp.ne.s32.totalorder %s574_s4, %s5781_s21  ;;  %p5789_p3 = scmp.lt.s32.totalorder %s574_s4, %s574_s4 }
  0x33   : > { %p5790_p2 = scmp.lt.s32.totalorder %s5781_s21, %s5781_s21 }
  0x34   : > { %p5784_p0 = pnand %p5782_p11, %p6280_p13 }
  0x35   : > { %p5791_p4 = por %p5790_p2, %p5789_p3 }
  0x36   : > { %p5785_p1 = pneg %p5784_p0 }
  0x37   : > { %5644 = dma.hbm_to_vmem [thread:$0]  (!%p6274_p12), %s7753_s27, 512, %s544_s24, [#allocation9], %s7730_s0, %s7730_s0, %s7731_s30  }
  0x38   : > { %p5792_p7 = pnand %p5791_p4, %p5785_p1 }
  0x3a   : > { %5795 = shalt.err (!%p5792_p7)
}
  0x3b   : > { %s7754_s6 = sld [smem:[#allocation43_spill]]  ;;  %s5807_s2 = scalar_lea.vmem %s600_s26, 14336 }
  0x3c   : > { %p5808_p8 = scmp.ne.s32.totalorder %s600_s26, %s5807_s2  ;;  %p5815_p11 = scmp.lt.s32.totalorder %s600_s26, %s600_s26 }
  0x3d   : > { %p5816_p0 = scmp.lt.s32.totalorder %s5807_s2, %s5807_s2 }
  0x3e   : > { %p5810_p9 = pnand %p5808_p8, %p6280_p13 }
  0x3f   : > { %p5817_p5 = por %p5816_p0, %p5815_p11 }
  0x40   : > { %p5811_p6 = pneg %p5810_p9 }
  0x41   : > { %5650 = dma.hbm_to_vmem [thread:$0]  (!%p6274_p12), %s7754_s6, 32, %s574_s4, [#allocation12]  }
  0x42   : > { %p5818_p10 = pnand %p5817_p5, %p5811_p6 }
  0x44   : > { %5821 = shalt.err (!%p5818_p10)
}
  0x45   : > { %5656 = dma.hbm_to_vmem [thread:$0]  (!%p6274_p12), %s7703_s9, 14336, %s600_s26, [#allocation15], %s7730_s0, %s7730_s0, %s7731_s30  }
  0x46   : > { %s6095_s5 = smov [#allocation17]   ;;  %s6096_s24 = smov [#allocation5]  }
  0x47   : > { %s639_s22 = sshll.u32 %s6095_s5, 4  ;;  %s533_s4 = sshll.u32 %s6096_s24, 4  ;;  %s640_s22 = int_to_ptr.vmem [resolvable:$true] %s639_s22  ;;  %s534_s4 = int_to_ptr.vmem [resolvable:$true] %s533_s4 }
  0x48   : > { %s5833_s1 = scalar_lea.vmem %s640_s22, 16  ;;  %s5840_s2 = scalar_lea.vmem %s640_s22, 32 }
  0x49   : > { %p5834_p9 = scmp.ne.s32.totalorder %s640_s22, %s5833_s1  ;;  %p5841_p10 = scmp.lt.s32.totalorder %s640_s22, %s640_s22 }
  0x4a   : > { %p5842_p1 = scmp.lt.s32.totalorder %s5840_s2, %s5833_s1 }
  0x4b   : > { %p5836_p5 = pnand %p5834_p9, %p6280_p13 }
  0x4c   : > { %p5843_p3 = por %p5842_p1, %p5841_p10 }
  0x4d   : > { %p5837_p6 = pneg %p5836_p5 }
  0x4f   : > { %p5844_p2 = pnand %p5843_p3, %p5837_p6 }
  0x51   : > { %5847 = shalt.err (!%p5844_p2)
}
  0x52   : > { %5662 = dma.hbm_to_vmem [thread:$0]  (!%p6274_p12), %s7710_s16, 16, %s640_s22, [#allocation18]  }
  0x53   : > { %s5859_s27 = scalar_lea.vmem %s534_s4, 32  ;;  %p5867_p11 = scmp.lt.s32.totalorder %s534_s4, %s534_s4 }
  0x54   : > { %p5860_p4 = scmp.ne.s32.totalorder %s534_s4, %s5859_s27  ;;  %p5868_p0 = scmp.lt.s32.totalorder %s5859_s27, %s5859_s27 }
  0x56   : > { %p5862_p7 = pnand %p5860_p4, %p6280_p13  ;;  %p5869_p9 = por %p5868_p0, %p5867_p11 }
  0x58   : > { %p5863_p8 = pneg %p5862_p7 }
  0x5a   : > { %p5870_p5 = pnand %p5869_p9, %p5863_p8 }
  0x5c   : > { %5873 = shalt.err (!%p5870_p5)
}
  0x5d   : > { %s7755_s1 = sld [smem:[#allocation39_spill]]  ;;  %s6097_s2 = smov [#allocation10]  }
  0x5e   : > { %s559_s22 = sshll.u32 %s6097_s2, 4  ;;  %s560_s22 = int_to_ptr.vmem [resolvable:$true] %s559_s22 }
  0x5f   : > { %s5885_s21 = scalar_lea.vmem %s560_s22, 20480  ;;  %p5893_p3 = scmp.lt.s32.totalorder %s560_s22, %s560_s22 }
  0x60   : > { %p5886_p6 = scmp.ne.s32.totalorder %s560_s22, %s5885_s21  ;;  %p5894_p2 = scmp.lt.s32.totalorder %s5885_s21, %s5885_s21 }
  0x62   : > { %p5888_p10 = pnand %p5886_p6, %p6280_p13  ;;  %p5895_p4 = por %p5894_p2, %p5893_p3 }
  0x63   : > { %5641 = dma.hbm_to_vmem [thread:$0]  (!%p6274_p12), %s7755_s1, 32, %s534_s4, [#allocation6]  }
  0x64   : > { %p5889_p1 = pneg %p5888_p10 }
  0x66   : > { %p5896_p7 = pnand %p5895_p4, %p5889_p1 }
  0x68   : > { %5899 = shalt.err (!%p5896_p7)
}
  0x69   : > { %s6098_s26 = smov 256   ;;  %s6099_s27 = smov 16  }
  0x6a   : > { %s7756_s24 = sld [smem:[#allocation42_spill]]  ;;  %s6100_s1 = smov [#allocation13]  }
  0x6b   : > { %s586_s2 = sshll.u32 %s6100_s1, 4  ;;  %s6101_s0 = smov [#allocation16]   ;;  %s587_s2 = int_to_ptr.vmem [resolvable:$true] %s586_s2 }
  0x6c   : > { %s625_s30 = sshll.u32 %s6101_s0, 4  ;;  %s5911_s6 = scalar_lea.vmem %s587_s2, 8192  ;;  %s626_s30 = int_to_ptr.vmem [resolvable:$true] %s625_s30 }
  0x6d   : > { %p5912_p8 = scmp.ne.s32.totalorder %s587_s2, %s5911_s6  ;;  %p5919_p9 = scmp.lt.s32.totalorder %s587_s2, %s587_s2 }
  0x6e   : > { %p5920_p5 = scmp.lt.s32.totalorder %s5911_s6, %s5911_s6 }
  0x6f   : > { %p5914_p11 = pnand %p5912_p8, %p6280_p13 }
  0x70   : > { %5647 = dma.hbm_to_vmem [thread:$0]  (!%p6274_p12), %s7756_s24, 20480, %s560_s22, [#allocation9], %s6098_s26, %s6098_s26, %s6099_s27  }
  0x71   : > { %p5915_p0 = pneg %p5914_p11  ;;  %p5921_p6 = por %p5920_p5, %p5919_p9 }
  0x73   : > { %p5922_p10 = pnand %p5921_p6, %p5915_p0 }
  0x75   : > { %5925 = shalt.err (!%p5922_p10)
}
  0x76   : > { %s7757_s21 = smov 8   ;;  %s7758_s22 = smov 128  }
  0x77   : > { %5653 = dma.hbm_to_vmem [thread:$0]  (!%p6274_p12), %s7702_s8, 8192, %s587_s2, [#allocation12], %s7758_s22, %s7758_s22, %s7757_s21  }
  0x78   : > { %s5937_s0 = scalar_lea.vmem %s626_s30, 16  ;;  %s5944_s5 = scalar_lea.vmem %s626_s30, 32 }
  0x79   : > { %p5938_p1 = scmp.ne.s32.totalorder %s626_s30, %s5937_s0  ;;  %p5945_p4 = scmp.lt.s32.totalorder %s626_s30, %s626_s30 }
  0x7a   : > { %p5946_p7 = scmp.lt.s32.totalorder %s5944_s5, %s5937_s0 }
  0x7b   : > { %p5940_p3 = pnand %p5938_p1, %p6280_p13 }
  0x7c   : > { %p5947_p8 = por %p5946_p7, %p5945_p4 }
  0x7d   : > { %p5941_p2 = pneg %p5940_p3 }
  0x7f   : > { %p5948_p11 = pnand %p5947_p8, %p5941_p2 }
  0x81   : > { %5951 = shalt.err (!%p5948_p11)
}
  0x82   : > { %5659 = dma.hbm_to_vmem [thread:$0]  (!%p6274_p12), %s7708_s14, 16, %s626_s30, [#allocation15]  }
  0x83   : > { %s6102_s24 = smov [#allocation19]   ;;  %s6103_s2 = smov [#allocation20]  }
  0x84   : > { %s653_s1 = sshll.u32 %s6102_s24, 4  ;;  %s667_s21 = sshll.u32 %s6103_s2, 4  ;;  %s654_s1 = int_to_ptr.vmem [resolvable:$true] %s653_s1  ;;  %s668_s21 = int_to_ptr.vmem [resolvable:$true] %s667_s21 }
  0x85   : > { %s5963_s22 = scalar_lea.vmem %s654_s1, 16  ;;  %s5970_s26 = scalar_lea.vmem %s654_s1, 32 }
  0x86   : > { %p5964_p0 = scmp.ne.s32.totalorder %s654_s1, %s5963_s22  ;;  %p5971_p6 = scmp.lt.s32.totalorder %s654_s1, %s654_s1 }
  0x87   : > { %p5972_p10 = scmp.lt.s32.totalorder %s5970_s26, %s5963_s22 }
  0x88   : > { %p5966_p9 = pnand %p5964_p0, %p6280_p13 }
  0x89   : > { %p5973_p1 = por %p5972_p10, %p5971_p6 }
  0x8a   : > { %p5967_p5 = pneg %p5966_p9 }
  0x8c   : > { %p5974_p3 = pnand %p5973_p1, %p5967_p5 }
  0x8e   : > { %5977 = shalt.err (!%p5974_p3)
}
  0x8f   : > { %5665 = dma.hbm_to_vmem [thread:$0]  (!%p6274_p12), %s7712_s18, 16, %s654_s1, [#allocation18]  }
  0x90   : > { %s5989_s0 = scalar_lea.vmem %s668_s21, 16  ;;  %s5996_s5 = scalar_lea.vmem %s668_s21, 32 }
  0x91   : > { %p5990_p2 = scmp.ne.s32.totalorder %s668_s21, %s5989_s0  ;;  %p5997_p8 = scmp.lt.s32.totalorder %s668_s21, %s668_s21 }
  0x92   : > { %p5998_p11 = scmp.lt.s32.totalorder %s5996_s5, %s5989_s0 }
  0x93   : > { %p5992_p4 = pnand %p5990_p2, %p6280_p13 }
  0x94   : > { %p5999_p0 = por %p5998_p11, %p5997_p8 }
  0x95   : > { %p5993_p7 = pneg %p5992_p4 }
  0x97   : > { %p6000_p9 = pnand %p5999_p0, %p5993_p7 }
  0x99   : > { %6003 = shalt.err (!%p6000_p9)
}
  0x9a   : > { %5668 = dma.hbm_to_vmem [thread:$0]  (!%p6274_p12), %s7714_s20, 16, %s668_s21, [#allocation21]  }
  0x9b   : > { %p7759_p5 = scmp.ne.s32.totalorder %s7750_s23, 0 }
  0x9c   : > { %p7760_p6 = scmp.eq.s32.totalorder (!%p7759_p5), %s6238_s3, 0 }
  0x9d   : > { %688 = sbr.rel (%p7759_p5) target bundleno = 3129 (0xc39), region = 104 }
  0xa2   : > { %6047 = dma.done.wait (%p7760_p6), [#allocation6], 32   ;;  %p7761_p13 = pmov %p7760_p6 }
  0xa3   : > { %p7762_p10 = pmov %p7760_p6 }
  0xa4   : > { %6049 = vsyncadd (%p7761_p13), [#allocation6], 4294967264 }
  0xa5   : > { %6051 = dma.done.wait (%p7762_p10), [#allocation9], 20992   ;;  %p7763_p1 = pmov %p7760_p6 }
  0xa7   : > { %6053 = vsyncadd (%p7763_p1), [#allocation9], 4294946304  ;;  %p7764_p3 = pmov %p7763_p1 }
  0xa8   : > { %p7765_p12 = pmov %p7763_p1 }
  0xa9   : > { %6055 = dma.done.wait (%p7764_p3), [#allocation12], 8224  }
  0xaa   : > { %6057 = vsyncadd (%p7765_p12), [#allocation12], 4294959072  ;;  %p7766_p2 = pmov %p7763_p1 }
  0xab   : > { %p7767_p4 = pmov %p7763_p1 }
  0xac   : > { %6059 = dma.done.wait (%p7766_p2), [#allocation15], 14352  }
  0xad   : > { %6061 = vsyncadd (%p7767_p4), [#allocation15], 4294952944  ;;  %p7768_p7 = pmov %p7763_p1 }
  0xae   : > { %p7769_p8 = pmov %p7763_p1 }
  0xaf   : > { %6063 = dma.done.wait (%p7768_p7), [#allocation18], 32  }
  0xb0   : > { %6065 = vsyncadd (%p7769_p8), [#allocation18], 4294967264  ;;  %p7770_p11 = pmov %p7763_p1 }
  0xb1   : > { %p7771_p0 = pmov %p7763_p1 }
  0xb2   : > { %6067 = dma.done.wait (%p7770_p11), [#allocation21], 16  }
  0xb3   : > { %6069 = vsyncadd (%p7771_p0), [#allocation21], 4294967280  ;;  %v6104_v0 = vmov 0.0   ;;  %s7772_s28 = sld [smem:[#allocation38_spill]]  ;;  %p783_p9 = scmp.lt.s32.totalorder %s6238_s3, 1  ;;  %vm1484_vm0 = vcmask 261120  }
  0xb4   : > { %938 = vmatprep.mubr.f32.mxu0 %v6104_v0  ;;  %792 = vst [vmem:[#allocation2] sm:$0xff] %v6104_v0  ;;  %793 = vst [vmem:[#allocation2 + $0x8] sm:$0xff] %v6104_v0  ;;  %1027 = vmatprep.mubr.f32.mxu1 %v6104_v0  ;;  %s7773_s22 = sld [smem:[#allocation37_spill]]  ;;  %vm2472_vm1 = vcmask 130048   ;;  %vm6105_vm2 = vmmov 0   ;;  %vm3464_vm3 = vcmask 64512  }
  0xb5   : > { %794 = vst [vmem:[#allocation2 + $0x10] sm:$0xff] %v6104_v0  ;;  %795 = vst [vmem:[#allocation2 + $0x18] sm:$0xff] %v6104_v0  ;;  %s6489_s29 = scalar_select %p783_p9, %s6238_s3, 1  ;;  %vm3807_vm4 = vcmask 523264   ;;  %vm4133_vm5 = vcmask 1042432   ;;  %vm4129_vm6 = vcmask 416768  }
  0xb6   : > { %796 = vst [vmem:[#allocation2 + $0x20] sm:$0xf] %v6104_v0  ;;  %1875 = vst [vmem:[#allocation3] sm:$0xff] %v6104_v0  ;;  %s7774_s4 = sld [smem:[#allocation41_spill]]  ;;  %vm4214_vm7 = vcmask 1044480   ;;  %vm4302_vm8 = vcmask 1043456  }
  0xb7   : > { %1876 = vst [vmem:[#allocation3 + $0x8] sm:$0xff] %v6104_v0  ;;  %1877 = vst [vmem:[#allocation3 + $0x10] sm:$0xf] %v6104_v0  ;;  %s4795_s2 = sshll.u32 %s6489_s29, 5  ;;  %vm4210_vm9 = vcmask 39936   ;;  %vm4298_vm10 = vcmask 490496  }
  0xb8   : > { %2831 = vst [vmem:[#allocation4] sm:$0xff] %v6104_v0  ;;  %2832 = vst [vmem:[#allocation4 + $0x8] sm:$0x3f] %v6104_v0  ;;  %s781_s5 = sand.u32 1, %s6080_s25   ;;  %s7775_s6 = sld [smem:[#allocation35_spill]]  ;;  %vm4377_vm11 = vcmask 40960  }
  0xb9   : > { %v4602_v1 = vld [vmem:[%s7772_s28 + $0x1f8] sm:$0xff]  ;;  %v4601_v3 = vld [vmem:[%s7772_s28 + $0x1f0] sm:$0xff]  ;;  %v4600_v5 = vld [vmem:[%s7772_s28 + $0x1e8] sm:$0xff]  ;;  %s4792_s29 = sshll.u32 %s6238_s3, 4  ;;  %s7776_s21 = sld [smem:[#allocation44_spill]] }
  0xba   : > { %v836_v2 = vld [vmem:[%s7772_s28 + $0xf8] sm:$0xff]  ;;  %874 = vmatprep.subr.mxu0 %v4602_v1  ;;  %v835_v4 = vld [vmem:[%s7772_s28 + $0xf0] sm:$0xff]  ;;  %v834_v6 = vld [vmem:[%s7772_s28 + $0xe8] sm:$0xff]  ;;  %s6537_s26 = scalar_lea.vmem %s7773_s22, %s4795_s2  ;;  %s782_s2 = scalar_lea.vmem [#allocation22], %s781_s5 }
  0xbb   : > { %963 = vmatprep.subr.mxu1 %v836_v2  ;;  %875 = vmatpush1.msra.mxu0 %v4601_v3  ;;  %v4599_v7 = vld [vmem:[%s7772_s28 + $0x1e0] sm:$0xff]  ;;  %v4598_v9 = vld [vmem:[%s7772_s28 + $0x1d8] sm:$0xff]  ;;  %v4597_v11 = vld [vmem:[%s7772_s28 + $0x1d0] sm:$0xff]  ;;  %s4392_s23 = sshll.u32 %s782_s2, 4  ;;  %s4380_s22 = scalar_lea.sflag [#allocation7], %s781_s5  ;;  %s4393_s23 = int_to_ptr.vmem [resolvable:$true] %s4392_s23 }
  0xbc   : > { %964 = vmatpush1.msra.mxu1 %v835_v4  ;;  %v833_v8 = vld [vmem:[%s7772_s28 + $0xe0] sm:$0xff]  ;;  %876 = vmatprep.subr.mxu0 %v4600_v5  ;;  %v832_v10 = vld [vmem:[%s7772_s28 + $0xd8] sm:$0xff]  ;;  %v831_v12 = vld [vmem:[%s7772_s28 + $0xd0] sm:$0xff]  ;;  %s6004_s30 = scalar_lea.vmem %s4393_s23, 16  ;;  %s6106_s27 = smov [#allocation22]  }
  0xbd   : > { %965 = vmatprep.subr.mxu1 %v834_v6  ;;  %877 = vmatpush1.msra.mxu0 %v4599_v7  ;;  %v4596_v13 = vld [vmem:[%s7772_s28 + $0x1c8] sm:$0xff]  ;;  %v4595_v15 = vld [vmem:[%s7772_s28 + $0x1c0] sm:$0xff]  ;;  %v4594_v17 = vld [vmem:[%s7772_s28 + $0x1b8] sm:$0xff]  ;;  %p6005_p5 = scmp.ne.s32.totalorder %s4393_s23, %s6004_s30  ;;  %s6008_s3 = sshll.u32 %s6106_s27, 4  ;;  %s6009_s3 = int_to_ptr.vmem [resolvable:$false] %s6008_s3 }
  0xbe   : > { %966 = vmatpush1.msra.mxu1 %v833_v8  ;;  %v830_v14 = vld [vmem:[%s7772_s28 + $0xc8] sm:$0xff]  ;;  %878 = vmatprep.subr.mxu0 %v4598_v9  ;;  %v829_v16 = vld [vmem:[%s7772_s28 + $0xc0] sm:$0xff]  ;;  %v828_v18 = vld [vmem:[%s7772_s28 + $0xb8] sm:$0xff]  ;;  %p7777_p6 = scmp.ne.s32.totalorder %s7775_s6, 0  ;;  %s6010_s0 = scalar_lea.vmem %s6009_s3, 32 }
  0xbf   : > { %967 = vmatprep.subr.mxu1 %v832_v10  ;;  %879 = vmatpush1.msra.mxu0 %v4597_v11  ;;  %v4593_v19 = vld [vmem:[%s7772_s28 + $0x1b0] sm:$0xff]  ;;  %v4592_v21 = vld [vmem:[%s7772_s28 + $0x1a8] sm:$0xff]  ;;  %v4591_v23 = vld [vmem:[%s7772_s28 + $0x1a0] sm:$0xff]  ;;  %p6011_p1 = scmp.lt.s32.totalorder %s4393_s23, %s6009_s3  ;;  %p6012_p3 = scmp.lt.s32.totalorder %s6010_s0, %s6004_s30 }
  0xc0   : > { %968 = vmatpush1.msra.mxu1 %v831_v12  ;;  %880 = vmatprep.subr.mxu0 %v4596_v13  ;;  %v827_v20 = vld [vmem:[%s7772_s28 + $0xb0] sm:$0xff]  ;;  %v826_v22 = vld [vmem:[%s7772_s28 + $0xa8] sm:$0xff]  ;;  %v825_v24 = vld [vmem:[%s7772_s28 + $0xa0] sm:$0xff]  ;;  %p6006_p13 = pnand %p6005_p5, %p7777_p6 }
  0xc1   : > { %969 = vmatprep.subr.mxu1 %v830_v14  ;;  %881 = vmatpush1.msra.mxu0 %v4595_v15  ;;  %v4590_v25 = vld [vmem:[%s7772_s28 + $0x198] sm:$0xff]  ;;  %v4589_v27 = vld [vmem:[%s7772_s28 + $0x190] sm:$0xff]  ;;  %v4588_v29 = vld [vmem:[%s7772_s28 + $0x188] sm:$0xff]  ;;  %p6013_p12 = por %p6012_p3, %p6011_p1 }
  0xc2   : > { %970 = vmatpush1.msra.mxu1 %v829_v16  ;;  %882 = vmatprep.subr.mxu0 %v4594_v17  ;;  %v824_v26 = vld [vmem:[%s7772_s28 + $0x98] sm:$0xff]  ;;  %v823_v28 = vld [vmem:[%s7772_s28 + $0x90] sm:$0xff]  ;;  %v822_v30 = vld [vmem:[%s7772_s28 + $0x88] sm:$0xff]  ;;  %p6007_p10 = pneg %p6006_p13 }
  0xc3   : > { %971 = vmatprep.subr.mxu1 %v828_v18  ;;  %883 = vmatpush1.msra.mxu0 %v4593_v19  ;;  %v4587_v31 = vld [vmem:[%s7772_s28 + $0x180] sm:$0xff]  ;;  %v4586_v33 = vld [vmem:[%s7772_s28 + $0x178] sm:$0xff]  ;;  %v4585_v35 = vld [vmem:[%s7772_s28 + $0x170] sm:$0xff] }
  0xc4   : > { %972 = vmatpush1.msra.mxu1 %v827_v20  ;;  %884 = vmatprep.subr.mxu0 %v4592_v21  ;;  %v821_v32 = vld [vmem:[%s7772_s28 + $0x80] sm:$0xff]  ;;  %v820_v34 = vld [vmem:[%s7772_s28 + $0x78] sm:$0xff]  ;;  %v819_v36 = vld [vmem:[%s7772_s28 + $0x70] sm:$0xff]  ;;  %p6014_p2 = pnand %p6013_p12, %p6007_p10 }
  0xc5   : > { %973 = vmatprep.subr.mxu1 %v826_v22  ;;  %885 = vmatpush1.msra.mxu0 %v4591_v23  ;;  %v4584_v37 = vld [vmem:[%s7772_s28 + $0x168] sm:$0xff]  ;;  %v4583_v39 = vld [vmem:[%s7772_s28 + $0x160] sm:$0xff]  ;;  %v4582_v41 = vld [vmem:[%s7772_s28 + $0x158] sm:$0xff] }
  0xc6   : > { %974 = vmatpush1.msra.mxu1 %v825_v24  ;;  %886 = vmatprep.subr.mxu0 %v4590_v25  ;;  %v818_v38 = vld [vmem:[%s7772_s28 + $0x68] sm:$0xff]  ;;  %v817_v40 = vld [vmem:[%s7772_s28 + $0x60] sm:$0xff]  ;;  %v816_v42 = vld [vmem:[%s7772_s28 + $0x58] sm:$0xff] }
  0xc7   : > { %975 = vmatprep.subr.mxu1 %v824_v26  ;;  %887 = vmatpush1.msra.mxu0 %v4589_v27  ;;  %v4581_v43 = vld [vmem:[%s7772_s28 + $0x150] sm:$0xff]  ;;  %v4580_v45 = vld [vmem:[%s7772_s28 + $0x148] sm:$0xff]  ;;  %v4579_v47 = vld [vmem:[%s7772_s28 + $0x140] sm:$0xff] }
  0xc8   : > { %976 = vmatpush1.msra.mxu1 %v823_v28  ;;  %888 = vmatprep.subr.mxu0 %v4588_v29  ;;  %v815_v44 = vld [vmem:[%s7772_s28 + $0x50] sm:$0xff]  ;;  %v814_v46 = vld [vmem:[%s7772_s28 + $0x48] sm:$0xff]  ;;  %v813_v48 = vld [vmem:[%s7772_s28 + $0x40] sm:$0xff] }
  0xc9   : > { %977 = vmatprep.subr.mxu1 %v822_v30  ;;  %889 = vmatpush1.msra.mxu0 %v4587_v31  ;;  %v6558_v49 = vld [vmem:[%s6537_s26] sm:$0xff]  ;;  %v4578_v50 = vld [vmem:[%s7772_s28 + $0x138] sm:$0xff]  ;;  %v4577_v52 = vld [vmem:[%s7772_s28 + $0x130] sm:$0xff] }
  0xca   : > { %978 = vmatpush1.msra.mxu1 %v821_v32  ;;  %890 = vmatprep.subr.mxu0 %v4586_v33  ;;  %v812_v51 = vld [vmem:[%s7772_s28 + $0x38] sm:$0xff]  ;;  %797 = vst [vmem:[#allocation2 + $0x2] sm:$0xff] %v6558_v49  ;;  %v811_v53 = vld [vmem:[%s7772_s28 + $0x30] sm:$0xff]  ;;  %v4576_v54 = vld [vmem:[%s7772_s28 + $0x128] sm:$0xff] }
  0xcb   : > { %979 = vmatprep.subr.mxu1 %v820_v34  ;;  %891 = vmatpush1.msra.mxu0 %v4585_v35  ;;  %v810_v55 = vld [vmem:[%s7772_s28 + $0x28] sm:$0xff]  ;;  %v4575_v56 = vld [vmem:[%s7772_s28 + $0x120] sm:$0xff]  ;;  %v4574_v58 = vld [vmem:[%s7772_s28 + $0x118] sm:$0xff] }
  0xcc   : > { %980 = vmatpush1.msra.mxu1 %v819_v36  ;;  %892 = vmatprep.subr.mxu0 %v4584_v37  ;;  %v809_v57 = vld [vmem:[%s7772_s28 + $0x20] sm:$0xff]  ;;  %v808_v59 = vld [vmem:[%s7772_s28 + $0x18] sm:$0xff]  ;;  %v4573_v60 = vld [vmem:[%s7772_s28 + $0x110] sm:$0xff] }
  0xcd   : > { %981 = vmatprep.subr.mxu1 %v818_v38  ;;  %893 = vmatpush1.msra.mxu0 %v4583_v39  ;;  %v807_v61 = vld [vmem:[%s7772_s28 + $0x10] sm:$0xff]  ;;  %v4572_v62 = vld [vmem:[%s7772_s28 + $0x108] sm:$0xff]  ;;  %v4571_v1 = vld [vmem:[%s7772_s28 + $0x100] sm:$0xff] }
  0xce   : > { %982 = vmatpush1.msra.mxu1 %v817_v40  ;;  %894 = vmatprep.subr.mxu0 %v4582_v41  ;;  %v806_v63 = vld [vmem:[%s7772_s28 + $0x8] sm:$0xff]  ;;  %v805_v2 = vld [vmem:[%s7772_s28] sm:$0xff]  ;;  %v4634_v5 = vld [vmem:[%s7772_s28 + $0x2f8] sm:$0xff] }
  0xcf   : > { %983 = vmatprep.subr.mxu1 %v816_v42  ;;  %895 = vmatpush1.msra.mxu0 %v4581_v43  ;;  %v4666_v6 = vld [vmem:[%s7772_s28 + $0x3f8] sm:$0xff]  ;;  %v4633_v7 = vld [vmem:[%s7772_s28 + $0x2f0] sm:$0xff]  ;;  %v4632_v9 = vld [vmem:[%s7772_s28 + $0x2e8] sm:$0xff] }
  0xd0   : > { %984 = vmatpush1.msra.mxu1 %v815_v44  ;;  %896 = vmatprep.subr.mxu0 %v4580_v45  ;;  %v4665_v8 = vld [vmem:[%s7772_s28 + $0x3f0] sm:$0xff]  ;;  %v4664_v10 = vld [vmem:[%s7772_s28 + $0x3e8] sm:$0xff]  ;;  %v4631_v11 = vld [vmem:[%s7772_s28 + $0x2e0] sm:$0xff] }
  0xd1   : > { %985 = vmatprep.subr.mxu1 %v814_v46  ;;  %897 = vmatpush1.msra.mxu0 %v4579_v47  ;;  %v837_v3 = vld [vmem:[#allocation2 + $0x1] sm:$0xff]  ;;  %v4630_v14 = vld [vmem:[%s7772_s28 + $0x2d8] sm:$0xff]  ;;  %v4629_v16 = vld [vmem:[%s7772_s28 + $0x2d0] sm:$0xff] }
  0xd2   : > { %986 = vmatpush1.msra.mxu1 %v813_v48  ;;  %898 = vmatprep.subr.mxu0 %v4578_v50  ;;  %v801_v4 = vld [vmem:[#allocation2] sm:$0xff]  ;;  %v6634_v13 = vld [vmem:[%s6537_s26 + $0x8] sm:$0xff]  ;;  %v4662_v15 = vld [vmem:[%s7772_s28 + $0x3d8] sm:$0xff] }
  0xd3   : > { %987 = vmatprep.subr.mxu1 %v812_v51  ;;  %899 = vmatpush1.msra.mxu0 %v4577_v52  ;;  %v4663_v12 = vld [vmem:[%s7772_s28 + $0x3e0] sm:$0xff]  ;;  %798 = vst [vmem:[#allocation2 + $0xa] sm:$0xff] %v6634_v13  ;;  %v4661_v17 = vld [vmem:[%s7772_s28 + $0x3d0] sm:$0xff]  ;;  %v4628_v18 = vld [vmem:[%s7772_s28 + $0x2c8] sm:$0xff] }
  0xd4   : > { %988 = vmatpush1.msra.mxu1 %v811_v53  ;;  %900 = vmatprep.subr.mxu0 %v4576_v54  ;;  %v4660_v19 = vld [vmem:[%s7772_s28 + $0x3c8] sm:$0xff]  ;;  %v6656_v20 = vld [vmem:[%s6537_s26 + $0x10] sm:$0xff]  ;;  %v4627_v21 = vld [vmem:[%s7772_s28 + $0x2c0] sm:$0xff] }
  0xd5   : > { %989 = vmatprep.subr.mxu1 %v810_v55  ;;  %901 = vmatpush1.msra.mxu0 %v4575_v56  ;;  %v4659_v22 = vld [vmem:[%s7772_s28 + $0x3c0] sm:$0xff]  ;;  %799 = vst [vmem:[#allocation2 + $0x12] sm:$0xff] %v6656_v20  ;;  %v4626_v23 = vld [vmem:[%s7772_s28 + $0x2b8] sm:$0xff]  ;;  %v4625_v25 = vld [vmem:[%s7772_s28 + $0x2b0] sm:$0xff] }
  0xd6   : > { %990 = vmatpush1.msra.mxu1 %v809_v57  ;;  %902 = vmatprep.subr.mxu0 %v4574_v58  ;;  %v4658_v24 = vld [vmem:[%s7772_s28 + $0x3b8] sm:$0xff]  ;;  %v4657_v26 = vld [vmem:[%s7772_s28 + $0x3b0] sm:$0xff]  ;;  %v4624_v28 = vld [vmem:[%s7772_s28 + $0x2a8] sm:$0xff] }
  0xd7   : > { %991 = vmatprep.subr.mxu1 %v808_v59  ;;  %903 = vmatpush1.msra.mxu0 %v4573_v60  ;;  %v6678_v27 = vld [vmem:[%s6537_s26 + $0x18] sm:$0xff]  ;;  %v4656_v29 = vld [vmem:[%s7772_s28 + $0x3a8] sm:$0xff]  ;;  %v4623_v30 = vld [vmem:[%s7772_s28 + $0x2a0] sm:$0xff]  ;;  %s4390_s26 = scalar_lea.hbm %s7776_s21, %s4792_s29 }
  0xd8   : > { %992 = vmatpush1.msra.mxu1 %v807_v61  ;;  %904 = vmatprep.subr.mxu0 %v4572_v62  ;;  %800 = vst [vmem:[#allocation2 + $0x1a] sm:$0xff] %v6678_v27  ;;  %v4655_v31 = vld [vmem:[%s7772_s28 + $0x3a0] sm:$0xff]  ;;  %v4622_v32 = vld [vmem:[%s7772_s28 + $0x298] sm:$0xff]  ;;  %v4621_v34 = vld [vmem:[%s7772_s28 + $0x290] sm:$0xff] }
  0xd9   : > { %993 = vmatprep.subr.mxu1 %v806_v63  ;;  %905 = vmatpush1.msra.mxu0 %v4571_v1  ;;  %v4654_v33 = vld [vmem:[%s7772_s28 + $0x398] sm:$0xff]  ;;  %v4653_v35 = vld [vmem:[%s7772_s28 + $0x390] sm:$0xff]  ;;  %v4620_v36 = vld [vmem:[%s7772_s28 + $0x288] sm:$0xff] }
  0xda   : > { %994 = vmatpush1.msra.mxu1 %v805_v2  ;;  %939 = vmatmul.mubr.f32.vlgmr.msra.gmra.mxu0 %v837_v3  ;;  %v4652_v37 = vld [vmem:[%s7772_s28 + $0x388] sm:$0xff]  ;;  %v4619_v38 = vld [vmem:[%s7772_s28 + $0x280] sm:$0xff]  ;;  %v4618_v40 = vld [vmem:[%s7772_s28 + $0x278] sm:$0xff] }
  0xdb   : > { %1028 = vmatmul.mubr.f32.vlgmr.msra.gmra.mxu1 %v801_v4  ;;  %1089 = vmatprep.subr.mxu0 %v4634_v5  ;;  %v4651_v39 = vld [vmem:[%s7772_s28 + $0x380] sm:$0xff]  ;;  %v4617_v41 = vld [vmem:[%s7772_s28 + $0x270] sm:$0xff]  ;;  %v4616_v42 = vld [vmem:[%s7772_s28 + $0x268] sm:$0xff] }
  0xdc   : > { %1223 = vmatprep.subr.mxu1 %v4666_v6  ;;  %1090 = vmatpush1.msra.mxu0 %v4633_v7  ;;  %v4650_v43 = vld [vmem:[%s7772_s28 + $0x378] sm:$0xff]  ;;  %v838_v44 = vld [vmem:[#allocation2 + $0x9] sm:$0xff]  ;;  %v4615_v46 = vld [vmem:[%s7772_s28 + $0x260] sm:$0xff] }
  0xdd   : > { %1224 = vmatpush1.msra.mxu1 %v4665_v8  ;;  %1091 = vmatprep.subr.mxu0 %v4632_v9  ;;  %v802_v45 = vld [vmem:[#allocation2 + $0x8] sm:$0xff]  ;;  %v4649_v47 = vld [vmem:[%s7772_s28 + $0x370] sm:$0xff]  ;;  %v4614_v48 = vld [vmem:[%s7772_s28 + $0x258] sm:$0xff] }
  0xde   : > { %1225 = vmatprep.subr.mxu1 %v4664_v10  ;;  %1092 = vmatpush1.msra.mxu0 %v4631_v11  ;;  %v4648_v50 = vld [vmem:[%s7772_s28 + $0x368] sm:$0xff]  ;;  %v4613_v51 = vld [vmem:[%s7772_s28 + $0x250] sm:$0xff]  ;;  %v4647_v52 = vld [vmem:[%s7772_s28 + $0x360] sm:$0xff] }
  0xdf   : > { %1226 = vmatpush1.msra.mxu1 %v4663_v12  ;;  %1093 = vmatprep.subr.mxu0 %v4630_v14  ;;  %v4612_v53 = vld [vmem:[%s7772_s28 + $0x248] sm:$0xff]  ;;  %v4646_v54 = vld [vmem:[%s7772_s28 + $0x358] sm:$0xff]  ;;  %v803_v56 = vld [vmem:[#allocation2 + $0x10] sm:$0xff] }
  0xe0   : > { %1227 = vmatprep.subr.mxu1 %v4662_v15  ;;  %1094 = vmatpush1.msra.mxu0 %v4629_v16  ;;  %v839_v55 = vld [vmem:[#allocation2 + $0x11] sm:$0xff]  ;;  %v4611_v57 = vld [vmem:[%s7772_s28 + $0x240] sm:$0xff]  ;;  %v4644_v60 = vld [vmem:[%s7772_s28 + $0x348] sm:$0xff] }
  0xe1   : > { %1228 = vmatpush1.msra.mxu1 %v4661_v17  ;;  %1095 = vmatprep.subr.mxu0 %v4628_v18  ;;  %v4645_v58 = vld [vmem:[%s7772_s28 + $0x350] sm:$0xff]  ;;  %v4610_v59 = vld [vmem:[%s7772_s28 + $0x238] sm:$0xff]  ;;  %v4643_v62 = vld [vmem:[%s7772_s28 + $0x340] sm:$0xff] }
  0xe2   : > { %1229 = vmatprep.subr.mxu1 %v4660_v19  ;;  %1096 = vmatpush1.msra.mxu0 %v4627_v21  ;;  %v4609_v61 = vld [vmem:[%s7772_s28 + $0x230] sm:$0xff]  ;;  %v4608_v63 = vld [vmem:[%s7772_s28 + $0x228] sm:$0xff]  ;;  %v4642_v1 = vld [vmem:[%s7772_s28 + $0x338] sm:$0xff] }
  0xe3   : > { %1230 = vmatpush1.msra.mxu1 %v4659_v22  ;;  %1097 = vmatprep.subr.mxu0 %v4626_v23  ;;  %v840_v2 = vld [vmem:[#allocation2 + $0x19] sm:$0xff]  ;;  %v4641_v5 = vld [vmem:[%s7772_s28 + $0x330] sm:$0xff]  ;;  %v4640_v7 = vld [vmem:[%s7772_s28 + $0x328] sm:$0xff] }
  0xe4   : > { %1231 = vmatprep.subr.mxu1 %v4658_v24  ;;  %1098 = vmatpush1.msra.mxu0 %v4625_v25  ;;  %v804_v3 = vld [vmem:[#allocation2 + $0x18] sm:$0xff]  ;;  %v4607_v4 = vld [vmem:[%s7772_s28 + $0x220] sm:$0xff]  ;;  %v4605_v8 = vld [vmem:[%s7772_s28 + $0x210] sm:$0xff] }
  0xe5   : > { %1232 = vmatpush1.msra.mxu1 %v4657_v26  ;;  %1099 = vmatprep.subr.mxu0 %v4624_v28  ;;  %v4606_v6 = vld [vmem:[%s7772_s28 + $0x218] sm:$0xff]  ;;  %v4639_v9 = vld [vmem:[%s7772_s28 + $0x320] sm:$0xff]  ;;  %v4604_v10 = vld [vmem:[%s7772_s28 + $0x208] sm:$0xff] }
  0xe6   : > { %1233 = vmatprep.subr.mxu1 %v4656_v29  ;;  %1100 = vmatpush1.msra.mxu0 %v4623_v30  ;;  %v4638_v11 = vld [vmem:[%s7772_s28 + $0x318] sm:$0xff]  ;;  %v4603_v12 = vld [vmem:[%s7772_s28 + $0x200] sm:$0xff]  ;;  %v4637_v14 = vld [vmem:[%s7772_s28 + $0x310] sm:$0xff] }
  0xe7   : > { %1234 = vmatpush1.msra.mxu1 %v4655_v31  ;;  %1101 = vmatprep.subr.mxu0 %v4622_v32  ;;  %v4636_v15 = vld [vmem:[%s7772_s28 + $0x308] sm:$0xff]  ;;  %v4698_v16 = vld [vmem:[%s7772_s28 + $0x4f8] sm:$0xff]  ;;  %v4635_v17 = vld [vmem:[%s7772_s28 + $0x300] sm:$0xff] }
  0xe8   : > { %1235 = vmatprep.subr.mxu1 %v4654_v33  ;;  %1102 = vmatpush1.msra.mxu0 %v4621_v34  ;;  %v4697_v18 = vld [vmem:[%s7772_s28 + $0x4f0] sm:$0xff]  ;;  %v1186_v19 = vld [vmem:[#allocation2 + $0x3] sm:$0xff]  ;;  %v4690_v28 = vld [vmem:[%s7772_s28 + $0x4b8] sm:$0xff] }
  0xe9   : > { %1236 = vmatpush1.msra.mxu1 %v4653_v35  ;;  %1103 = vmatprep.subr.mxu0 %v4620_v36  ;;  %v4696_v21 = vld [vmem:[%s7772_s28 + $0x4e8] sm:$0xff]  ;;  %v4695_v22 = vld [vmem:[%s7772_s28 + $0x4e0] sm:$0xff]  ;;  %v4693_v23 = vld [vmem:[%s7772_s28 + $0x4d0] sm:$0xff] }
  0xea   : > { %1237 = vmatprep.subr.mxu1 %v4652_v37  ;;  %1104 = vmatpush1.msra.mxu0 %v4619_v38  ;;  %v1187_v24 = vld [vmem:[#allocation2 + $0xb] sm:$0xff]  ;;  %v4691_v26 = vld [vmem:[%s7772_s28 + $0x4c0] sm:$0xff]  ;;  %v1188_v30 = vld [vmem:[#allocation2 + $0x13] sm:$0xff] }
  0xeb   : > { %1238 = vmatpush1.msra.mxu1 %v4651_v39  ;;  %1105 = vmatprep.subr.mxu0 %v4618_v40  ;;  %v4692_v25 = vld [vmem:[%s7772_s28 + $0x4c8] sm:$0xff]  ;;  %v4689_v29 = vld [vmem:[%s7772_s28 + $0x4b0] sm:$0xff]  ;;  %v4687_v31 = vld [vmem:[%s7772_s28 + $0x4a0] sm:$0xff] }
  0xec   : > { %944 = vmatprep.mubr.f32.mxu0 %v6104_v0  ;;  %1106 = vmatpush1.msra.mxu0 %v4617_v41  ;;  %v4686_v32 = vld [vmem:[%s7772_s28 + $0x498] sm:$0xff]  ;;  %v4685_v33 = vld [vmem:[%s7772_s28 + $0x490] sm:$0xff]  ;;  %v4683_v35 = vld [vmem:[%s7772_s28 + $0x480] sm:$0xff] }
  0xed   : > { %1033 = vmatprep.mubr.f32.mxu1 %v6104_v0  ;;  %1107 = vmatprep.subr.mxu0 %v4616_v42  ;;  %v1189_v34 = vld [vmem:[#allocation2 + $0x1b] sm:$0xff]  ;;  %v4681_v37 = vld [vmem:[%s7772_s28 + $0x470] sm:$0xff]  ;;  %v4676_v41 = vld [vmem:[%s7772_s28 + $0x448] sm:$0xff] }
  0xee   : > { %1239 = vmatprep.subr.mxu1 %v4650_v43  ;;  %945 = vmatmul.mubr.f32.gmra.mxu0 %v838_v44  ;;  %v4682_v36 = vld [vmem:[%s7772_s28 + $0x478] sm:$0xff]  ;;  %v4679_v38 = vld [vmem:[%s7772_s28 + $0x460] sm:$0xff]  ;;  %v4677_v40 = vld [vmem:[%s7772_s28 + $0x450] sm:$0xff] }
  0xef   : > { %1034 = vmatmul.mubr.f32.gmra.mxu1 %v802_v45  ;;  %1108 = vmatpush1.msra.mxu0 %v4615_v46  ;;  %v4678_v39 = vld [vmem:[%s7772_s28 + $0x458] sm:$0xff]  ;;  %v4675_v42 = vld [vmem:[%s7772_s28 + $0x440] sm:$0xff]  ;;  %v4673_v44 = vld [vmem:[%s7772_s28 + $0x430] sm:$0xff] }
  0xf0   : > { %1240 = vmatpush1.msra.mxu1 %v4649_v47  ;;  %1109 = vmatprep.subr.mxu0 %v4614_v48  ;;  %v4674_v43 = vld [vmem:[%s7772_s28 + $0x438] sm:$0xff]  ;;  %v4672_v45 = vld [vmem:[%s7772_s28 + $0x428] sm:$0xff]  ;;  %v4671_v46 = vld [vmem:[%s7772_s28 + $0x420] sm:$0xff] }
  0xf1   : > { %1241 = vmatprep.subr.mxu1 %v4648_v50  ;;  %1110 = vmatpush1.msra.mxu0 %v4613_v51  ;;  %v4670_v47 = vld [vmem:[%s7772_s28 + $0x418] sm:$0xff]  ;;  %v4669_v48 = vld [vmem:[%s7772_s28 + $0x410] sm:$0xff]  ;;  %v4668_v50 = vld [vmem:[%s7772_s28 + $0x408] sm:$0xff] }
  0xf2   : > { %1242 = vmatpush1.msra.mxu1 %v4647_v52  ;;  %950 = vmatprep.mubr.f32.mxu0 %v6104_v0  ;;  %v4667_v51 = vld [vmem:[%s7772_s28 + $0x400] sm:$0xff] }
  0xf3   : > { %1039 = vmatprep.mubr.f32.mxu1 %v6104_v0  ;;  %1111 = vmatprep.subr.mxu0 %v4612_v53  ;;  %v1320_v52 = vld [vmem:[#allocation2 + $0x4] sm:$0xff]  ;;  %v1321_v53 = vld [vmem:[#allocation2 + $0xc] sm:$0xff] }
  0xf4   : > { %1243 = vmatprep.subr.mxu1 %v4646_v54  ;;  %951 = vmatmul.mubr.f32.gmra.mxu0 %v839_v55  ;;  %v1322_v54 = vld [vmem:[#allocation2 + $0x14] sm:$0xff]  ;;  %v1323_v55 = vld [vmem:[#allocation2 + $0x1c] sm:$0xff] }
  0xf5   : > { %1040 = vmatmul.mubr.f32.gmra.mxu1 %v803_v56  ;;  %1112 = vmatpush1.msra.mxu0 %v4611_v57  ;;  %v4734_v56 = vld [vmem:[%s7774_s4 + $0x1f8] sm:$0xff] }
  0xf6   : > { %1244 = vmatpush1.msra.mxu1 %v4645_v58  ;;  %1113 = vmatprep.subr.mxu0 %v4610_v59  ;;  %v4718_v57 = vld [vmem:[%s7774_s4 + $0x178] sm:$0xff]  ;;  %v4733_v58 = vld [vmem:[%s7774_s4 + $0x1f0] sm:$0xff]  ;;  %v4732_v59 = vld [vmem:[%s7774_s4 + $0x1e8] sm:$0xff] }
  0xf7   : > { %1245 = vmatprep.subr.mxu1 %v4644_v60  ;;  %1114 = vmatpush1.msra.mxu0 %v4609_v61  ;;  %v4716_v60 = vld [vmem:[%s7774_s4 + $0x168] sm:$0xff]  ;;  %v4731_v61 = vld [vmem:[%s7774_s4 + $0x1e0] sm:$0xff] }
  0xf8   : > { %1246 = vmatpush1.msra.mxu1 %v4643_v62  ;;  %956 = vmatprep.mubr.f32.mxu0 %v6104_v0  ;;  %v4715_v62 = vld [vmem:[%s7774_s4 + $0x160] sm:$0xff] }
  0xf9   : > { %1045 = vmatprep.mubr.f32.mxu1 %v6104_v0  ;;  %1115 = vmatprep.subr.mxu0 %v4608_v63  ;;  %v4730_v63 = vld [vmem:[%s7774_s4 + $0x1d8] sm:$0xff] }
  0xfa   : > { %1247 = vmatprep.subr.mxu1 %v4642_v1  ;;  %957 = vmatmul.mubr.f32.gmra.mxu0 %v840_v2  ;;  %v4714_v1 = vld [vmem:[%s7774_s4 + $0x158] sm:$0xff]  ;;  %v4729_v2 = vld [vmem:[%s7774_s4 + $0x1d0] sm:$0xff] }
  0xfb   : > { %1046 = vmatmul.mubr.f32.gmra.mxu1 %v804_v3  ;;  %1116 = vmatpush1.msra.mxu0 %v4607_v4  ;;  %v4713_v3 = vld [vmem:[%s7774_s4 + $0x150] sm:$0xff]  ;;  %v4728_v4 = vld [vmem:[%s7774_s4 + $0x1c8] sm:$0xff] }
  0xfc   : > { %1248 = vmatpush1.msra.mxu1 %v4641_v5  ;;  %1117 = vmatprep.subr.mxu0 %v4606_v6  ;;  %v4712_v5 = vld [vmem:[%s7774_s4 + $0x148] sm:$0xff]  ;;  %v4727_v6 = vld [vmem:[%s7774_s4 + $0x1c0] sm:$0xff] }
  0xfd   : > { %1249 = vmatprep.subr.mxu1 %v4640_v7  ;;  %1118 = vmatpush1.msra.mxu0 %v4605_v8  ;;  %v4711_v7 = vld [vmem:[%s7774_s4 + $0x140] sm:$0xff]  ;;  %v4726_v8 = vld [vmem:[%s7774_s4 + $0x1b8] sm:$0xff] }
  0xfe   : > { %1250 = vmatpush1.msra.mxu1 %v4639_v9  ;;  %1119 = vmatprep.subr.mxu0 %v4604_v10  ;;  %v4710_v9 = vld [vmem:[%s7774_s4 + $0x138] sm:$0xff] }
  0xff   : > { %1251 = vmatprep.subr.mxu1 %v4638_v11  ;;  %1120 = vmatpush1.msra.mxu0 %v4603_v12 }
 0x100   : > { %1153 = vmatprep.mubr.f32.mxu0 %v6104_v0  ;;  %1252 = vmatpush1.msra.mxu1 %v4637_v14 }
 0x101   : > { %1154 = vmatmul.mubr.f32.vlgmr.msra.gmra.mxu0 %v6558_v49  ;;  %1253 = vmatprep.subr.mxu1 %v4636_v15  ;;  %v4694_v49 = vld [vmem:[%s7772_s28 + $0x4d8] sm:$0xff] }
 0x102   : > { %1357 = vmatprep.subr.mxu0 %v4698_v16  ;;  %1254 = vmatpush1.msra.mxu1 %v4635_v17 }
 0x103   : > { %1287 = vmatprep.mubr.f32.mxu1 %v6104_v0  ;;  %1358 = vmatpush1.msra.mxu0 %v4697_v18 }
 0x104   : > { %1288 = vmatmul.mubr.f32.vlgmr.msra.gmra.mxu1 %v1186_v19  ;;  %1359 = vmatprep.subr.mxu0 %v4696_v21 }
 0x105   : > { %1159 = vmatprep.mubr.f32.mxu0 %v6104_v0  ;;  %1360 = vmatpush1.msra.mxu0 %v4695_v22 }
 0x106   : > { %1293 = vmatprep.mubr.f32.mxu1 %v6104_v0  ;;  %1160 = vmatmul.mubr.f32.gmra.mxu0 %v6634_v13  ;;  %v4688_v13 = vld [vmem:[%s7772_s28 + $0x4a8] sm:$0xff] }
 0x107   : > { %1361 = vmatprep.subr.mxu0 %v4694_v49  ;;  %1165 = vmatprep.mubr.f32.mxu0 %v6104_v0 }
 0x108   : > { %1362 = vmatpush1.msra.mxu0 %v4693_v23  ;;  %1294 = vmatmul.mubr.f32.gmra.mxu1 %v1187_v24 }
 0x109   : > { %1363 = vmatprep.subr.mxu0 %v4692_v25  ;;  %1299 = vmatprep.mubr.f32.mxu1 %v6104_v0 }
 0x10a   : > { %1364 = vmatpush1.msra.mxu0 %v4691_v26 }
 0x10b   : > { %1166 = vmatmul.mubr.f32.gmra.mxu0 %v6656_v20  ;;  %1365 = vmatprep.subr.mxu0 %v4690_v28  ;;  %v4684_v20 = vld [vmem:[%s7772_s28 + $0x488] sm:$0xff] }
 0x10c   : > { %1366 = vmatpush1.msra.mxu0 %v4689_v29  ;;  %1300 = vmatmul.mubr.f32.gmra.mxu1 %v1188_v30 }
 0x10d   : > { %1367 = vmatprep.subr.mxu0 %v4688_v13  ;;  %1171 = vmatprep.mubr.f32.mxu0 %v6104_v0 }
 0x10e   : > { %1368 = vmatpush1.msra.mxu0 %v4687_v31  ;;  %1305 = vmatprep.mubr.f32.mxu1 %v6104_v0 }
 0x10f   : > { %1172 = vmatmul.mubr.f32.gmra.mxu0 %v6678_v27  ;;  %1369 = vmatprep.subr.mxu0 %v4686_v32  ;;  %v4680_v27 = vld [vmem:[%s7772_s28 + $0x468] sm:$0xff] }
 0x110   : > { %1370 = vmatpush1.msra.mxu0 %v4685_v33  ;;  %1306 = vmatmul.mubr.f32.gmra.mxu1 %v1189_v34 }
 0x111   : > { %1371 = vmatprep.subr.mxu0 %v4684_v20  ;;  %1421 = vmatprep.mubr.f32.mxu0 %v6104_v0 }
 0x112   : > { %1372 = vmatpush1.msra.mxu0 %v4683_v35  ;;  %1555 = vmatprep.mubr.f32.mxu1 %v6104_v0 }
 0x113   : > { %1373 = vmatprep.subr.mxu0 %v4682_v36 }
 0x114   : > { %1374 = vmatpush1.msra.mxu0 %v4681_v37 }
 0x115   : > { %1375 = vmatprep.subr.mxu0 %v4680_v27 }
 0x116   : > { %1376 = vmatpush1.msra.mxu0 %v4679_v38 }
 0x117   : > { %1377 = vmatprep.subr.mxu0 %v4678_v39 }
 0x118   : > { %1378 = vmatpush1.msra.mxu0 %v4677_v40  ;;  %v1456_v40 = vlaneseq }
 0x119   : > { %1379 = vmatprep.subr.mxu0 %v4676_v41 }
 0x11a   : > { %1380 = vmatpush1.msra.mxu0 %v4675_v42 }
 0x11b   : > { %1381 = vmatprep.subr.mxu0 %v4674_v43 }
 0x11c   : > { %1382 = vmatpush1.msra.mxu0 %v4673_v44 }
 0x11d   : > { %1383 = vmatprep.subr.mxu0 %v4672_v45 }
 0x11e   : > { %1384 = vmatpush1.msra.mxu0 %v4671_v46 }
 0x11f   : > { %1385 = vmatprep.subr.mxu0 %v4670_v47  ;;  %v6986_v47 = vshrl.u32 %v1456_v40, 7 }
 0x120   : > { %1386 = vmatpush1.msra.mxu0 %v4669_v48 }
 0x121   : > { %1387 = vmatprep.subr.mxu0 %v4668_v50 }
 0x122   : > { %1388 = vmatpush1.msra.mxu0 %v4667_v51 }
 0x123   : > { %1422 = vmatmul.mubr.f32.vlgmr.msra.gmra.mxu0 %v1320_v52  ;;  %4834 = vmatprep.subr.mxu0 %v4734_v56 }
 0x124   : > { %1427 = vmatprep.mubr.f32.mxu0 %v6104_v0  ;;  %4835 = vmatpush3.msra.mxu0 %v4718_v57 }
 0x125   : > { %4836 = vmatprep.subr.mxu0 %v4733_v58 }
 0x127   : > { %1428 = vmatmul.mubr.f32.gmra.mxu0 %v1321_v53 }
 0x128   : > { %1433 = vmatprep.mubr.f32.mxu0 %v6104_v0 }
 0x12b   : > { %1434 = vmatmul.mubr.f32.gmra.mxu0 %v1322_v54 }
 0x12c   : > { %1439 = vmatprep.mubr.f32.mxu0 %v6104_v0  ;;  %v4717_v0 = vld [vmem:[%s7774_s4 + $0x170] sm:$0xff] }
 0x12d   : > { %4837 = vmatpush3.msra.mxu0 %v4717_v0 }
 0x12e   : > { %4838 = vmatprep.subr.mxu0 %v4732_v59 }
 0x12f   : > { %1440 = vmatmul.mubr.f32.gmra.mxu0 %v1323_v55 }
 0x130   : > { %4839 = vmatpush3.msra.mxu0 %v4716_v60 }
 0x131   : > { %4840 = vmatprep.subr.mxu0 %v4731_v61 }
 0x132   : > { %4841 = vmatpush3.msra.mxu0 %v4715_v62  ;;  %v1458_v62 = vsub.s32 0, %v6986_v47 }
 0x133   : > { %4842 = vmatprep.subr.mxu0 %v4730_v63 }
 0x134   : > { %4843 = vmatpush3.msra.mxu0 %v4714_v1 }
 0x135   : > { %4844 = vmatprep.subr.mxu0 %v4729_v2 }
 0x136   : > { %4845 = vmatpush3.msra.mxu0 %v4713_v3 }
 0x137   : > { %4846 = vmatprep.subr.mxu0 %v4728_v4  ;;  %v1454_v4 = vld [vmem:[#allocation5] sm:$0x3] }
 0x138   : > { %4847 = vmatpush3.msra.mxu0 %v4712_v5  ;;  %v1462_v5 = vsub.s32 1, %v6986_v47  ;;  %v7167_v47 = vld [vmem:[#allocation4] sm:$0xff] }
 0x139   : > { %4848 = vmatprep.subr.mxu0 %v4727_v6 }
 0x13a   : > { %4849 = vmatpush3.msra.mxu0 %v4711_v7 }
 0x13b   : > { %4850 = vmatprep.subr.mxu0 %v4726_v8 }
 0x13c   : > { %4851 = vmatpush3.msra.mxu0 %v4710_v9 }
 0x19a   : > { %v940_v10 = vpop.f32.mrf.mxu0 }
 0x19b   : > { %v1029_v15 = vpop.f32.mrf.mxu1 }
 0x19c   : > { %v942_v11 = vpop.f32.mrf.mxu0  ;;  %v1030_v59 = vadd.f32 %v1029_v15, %v940_v10  ;;  %v1459_v10 = vrot.slane %v1454_v4, %v1458_v62 }
 0x19d   : > { %v1031_v17 = vpop.f32.mrf.mxu1 }
 0x19e   : > { %v1032_v57 = vadd.f32 %v1031_v17, %v942_v11 }
 0x1ae   : > { %v946_v12 = vpop.f32.mrf.mxu0 }
 0x1af   : > { %v1035_v19 = vpop.f32.mrf.mxu1 }
 0x1b0   : > { %v948_v14 = vpop.f32.mrf.mxu0  ;;  %v1036_v54 = vadd.f32 %v1035_v19, %v946_v12  ;;  %v1463_v19 = vrot.slane %v1454_v4, %v1462_v5  ;;  %v1664_v4 = vld [vmem:[%s7774_s4 + $0x30] sm:$0xff] }
 0x1b1   : > { %v1037_v22 = vpop.f32.mrf.mxu1 }
 0x1b2   : > { %v1038_v50 = vadd.f32 %v1037_v22, %v948_v14 }
 0x1b4   : > { %v952_v16 = vpop.f32.mrf.mxu0 }
 0x1b5   : > { %v1041_v23 = vpop.f32.mrf.mxu1 }
 0x1b6   : > { %v954_v18 = vpop.f32.mrf.mxu0  ;;  %v1042_v45 = vadd.f32 %v1041_v23, %v952_v16 }
 0x1b7   : > { %v1043_v25 = vpop.f32.mrf.mxu1 }
 0x1b8   : > { %v1044_v43 = vadd.f32 %v1043_v25, %v954_v18 }
 0x1ba   : > { %v958_v21 = vpop.f32.mrf.mxu0 }
 0x1bb   : > { %v1047_v28 = vpop.f32.mrf.mxu1 }
 0x1bc   : > { %v960_v49 = vpop.f32.mrf.mxu0  ;;  %v1048_v44 = vadd.f32 %v1047_v28, %v958_v21 }
 0x1bd   : > { %v1049_v30 = vpop.f32.mrf.mxu1 }
 0x1be   : > { %v1050_v51 = vadd.f32 %v1049_v30, %v960_v49 }
 0x1c1   : > { %v1155_v24 = vpop.f32.mrf.mxu0 }
 0x1c2   : > { %v1178_v6 = vadd.f32 %v1155_v24, %v1030_v59  ;;  %v1667_v59 = vld [vmem:[%s7774_s4 + $0x48] sm:$0xff] }
 0x1c3   : > { %v1157_v26 = vpop.f32.mrf.mxu0 }
 0x1c4   : > { %v1289_v13 = vpop.f32.mrf.mxu1  ;;  %v1179_v1 = vadd.f32 %v1157_v26, %v1032_v57  ;;  %v1684_v57 = vld [vmem:[%s7774_s4 + $0xd0] sm:$0xff] }
 0x1c5   : > { %v1312_v49 = vadd.f32 %v1289_v13, %v1178_v6  ;;  %v4709_v6 = vld [vmem:[%s7774_s4 + $0x130] sm:$0xff] }
 0x1c6   : > { %v1161_v29 = vpop.f32.mrf.mxu0  ;;  %v1291_v32 = vpop.f32.mrf.mxu1 }
 0x1c7   : > { %v1180_v60 = vadd.f32 %v1161_v29, %v1036_v54  ;;  %v1313_v18 = vadd.f32 %v1291_v32, %v1179_v1  ;;  %v1670_v54 = vld [vmem:[%s7774_s4 + $0x60] sm:$0xff]  ;;  %v1665_v1 = vld [vmem:[%s7774_s4 + $0x38] sm:$0xff] }
 0x1c8   : > { %v1163_v31 = vpop.f32.mrf.mxu0  ;;  %v1295_v34 = vpop.f32.mrf.mxu1 }
 0x1c9   : > { %v1181_v58 = vadd.f32 %v1163_v31, %v1038_v50  ;;  %v1314_v16 = vadd.f32 %v1295_v34, %v1180_v60  ;;  %v1570_v50 = vld [vmem:[#allocation8 + $0x18] sm:$0xff]  ;;  %v1682_v60 = vld [vmem:[%s7774_s4 + $0xc0] sm:$0xff] }
 0x1ca   : > { %v1297_v35 = vpop.f32.mrf.mxu1 }
 0x1cb   : > { %v1167_v33 = vpop.f32.mrf.mxu0  ;;  %v1315_v9 = vadd.f32 %v1297_v35, %v1181_v58  ;;  %v1668_v58 = vld [vmem:[%s7774_s4 + $0x50] sm:$0xff] }
 0x1cc   : > { %v1301_v37 = vpop.f32.mrf.mxu1  ;;  %v1182_v55 = vadd.f32 %v1167_v33, %v1042_v45  ;;  %v1673_v45 = vld [vmem:[%s7774_s4 + $0x78] sm:$0xff] }
 0x1cd   : > { %v1169_v20 = vpop.f32.mrf.mxu0 }
 0x1ce   : > { %v1303_v39 = vpop.f32.mrf.mxu1  ;;  %v1183_v52 = vadd.f32 %v1169_v20, %v1044_v43  ;;  %v1316_v7 = vadd.f32 %v1301_v37, %v1182_v55  ;;  %v1569_v43 = vld [vmem:[#allocation8 + $0x10] sm:$0xff]  ;;  %v1685_v55 = vld [vmem:[%s7774_s4 + $0xd8] sm:$0xff] }
 0x1cf   : > { %v1173_v36 = vpop.f32.mrf.mxu0 }
 0x1d0   : > { %v1307_v46 = vpop.f32.mrf.mxu1  ;;  %v1184_v53 = vadd.f32 %v1173_v36, %v1048_v44  ;;  %v1317_v2 = vadd.f32 %v1303_v39, %v1183_v52  ;;  %v1689_v44 = vld [vmem:[%s7774_s4 + $0xf8] sm:$0xff]  ;;  %v1671_v52 = vld [vmem:[%s7774_s4 + $0x68] sm:$0xff] }
 0x1d1   : > { %v1175_v27 = vpop.f32.mrf.mxu0 }
 0x1d2   : > { %v1185_v0 = vadd.f32 %v1175_v27, %v1050_v51  ;;  %v1309_v61 = vpop.f32.mrf.mxu1  ;;  %v1318_v3 = vadd.f32 %v1307_v46, %v1184_v53  ;;  %v1688_v46 = vld [vmem:[%s7774_s4 + $0xf0] sm:$0xff]  ;;  %v1687_v51 = vld [vmem:[%s7774_s4 + $0xe8] sm:$0xff]  ;;  %v1686_v53 = vld [vmem:[%s7774_s4 + $0xe0] sm:$0xff] }
 0x1d4   : > { %v1319_v12 = vadd.f32 %v1309_v61, %v1185_v0  ;;  %v1683_v0 = vld [vmem:[%s7774_s4 + $0xc8] sm:$0xff]  ;;  %v1666_v61 = vld [vmem:[%s7774_s4 + $0x40] sm:$0xff] }
 0x1e3   : > { %v1423_v38 = vpop.f32.mrf.mxu0 }
 0x1e4   : > { %v1446_v29 = vadd.f32 %v1423_v38, %v1312_v49  ;;  %v1482_v38 = vld [vmem:[#allocation8] sm:$0xff] }
 0x1e5   : > { %v1425_v41 = vpop.f32.mrf.mxu0  ;;  %v1660_v49 = vld [vmem:[%s7774_s4 + $0x10] sm:$0xff] }
 0x1e6   : > { %v1447_v25 = vadd.f32 %v1425_v41, %v1313_v18  ;;  %v1466_v32 = vadd.f32 %v1459_v10, %v1446_v29  ;;  %v6995_v41 = vld [vmem:[#allocation3] sm:$0xff]  ;;  %v1661_v18 = vld [vmem:[%s7774_s4 + $0x18] sm:$0xff]  ;;  %v1674_v29 = vld [vmem:[%s7774_s4 + $0x80] sm:$0xff] }
 0x1e7   : > { %v1429_v42 = vpop.f32.mrf.mxu0 }
 0x1e8   : > { %v1448_v23 = vadd.f32 %v1429_v42, %v1314_v16  ;;  %v1467_v35 = vadd.f32 %v1463_v19, %v1447_v25  ;;  %v1474_v40 = vmax.f32 %v1466_v32, 0.0  ;;  %v1483_v42 = vld [vmem:[#allocation8 + $0x8] sm:$0xff]  ;;  %v4720_v25 = vld [vmem:[%s7774_s4 + $0x188] sm:$0xff] }
 0x1e9   : > { %v1431_v48 = vpop.f32.mrf.mxu0  ;;  %v1662_v16 = vld [vmem:[%s7774_s4 + $0x20] sm:$0xff] }
 0x1ea   : > { %v1449_v21 = vadd.f32 %v1431_v48, %v1315_v9  ;;  %v1468_v34 = vadd.f32 %v1459_v10, %v1448_v23  ;;  %v1475_v39 = vmax.f32 %v1467_v35, 0.0  ;;  %v1672_v48 = vld [vmem:[%s7774_s4 + $0x70] sm:$0xff]  ;;  %v1663_v9 = vld [vmem:[%s7774_s4 + $0x28] sm:$0xff] }
 0x1eb   : > { %v1435_v56 = vpop.f32.mrf.mxu0  ;;  %v4705_v23 = vld [vmem:[%s7774_s4 + $0x110] sm:$0xff] }
 0x1ec   : > { %v1450_v15 = vadd.f32 %v1435_v56, %v1316_v7  ;;  %v1469_v31 = vadd.f32 %v1463_v19, %v1449_v21  ;;  %v1476_v13 = vmax.f32 %v1468_v34, 0.0  ;;  %v1669_v56 = vld [vmem:[%s7774_s4 + $0x58] sm:$0xff]  ;;  %v1679_v7 = vld [vmem:[%s7774_s4 + $0xa8] sm:$0xff]  ;;  %v1676_v21 = vld [vmem:[%s7774_s4 + $0x90] sm:$0xff] }
 0x1ed   : > { %v1437_v63 = vpop.f32.mrf.mxu0  ;;  %v1948_v34 = vld [vmem:[#allocation10 + $0x1f8] sm:$0xff] }
 0x1ee   : > { %v1451_v11 = vadd.f32 %v1437_v63, %v1317_v2  ;;  %v1470_v30 = vadd.f32 %v1459_v10, %v1450_v15  ;;  %v1477_v27 = vmax.f32 %v1469_v31, 0.0  ;;  %v1681_v63 = vld [vmem:[%s7774_s4 + $0xb8] sm:$0xff]  ;;  %v1680_v2 = vld [vmem:[%s7774_s4 + $0xb0] sm:$0xff]  ;;  %v1658_v31 = vld [vmem:[%s7774_s4] sm:$0xff] }
 0x1ef   : > { %v1441_v8 = vpop.f32.mrf.mxu0  ;;  %v1677_v15 = vld [vmem:[%s7774_s4 + $0x98] sm:$0xff] }
 0x1f0   : > { %v1452_v14 = vadd.f32 %v1441_v8, %v1318_v3  ;;  %v1471_v26 = vadd.f32 %v1463_v19, %v1451_v11  ;;  %v1478_v37 = vmax.f32 %v1470_v30, 0.0  ;;  %v4725_v3 = vld [vmem:[%s7774_s4 + $0x1b0] sm:$0xff]  ;;  %v4724_v8 = vld [vmem:[%s7774_s4 + $0x1a8] sm:$0xff]  ;;  %v1678_v11 = vld [vmem:[%s7774_s4 + $0xa0] sm:$0xff] }
 0x1f1   : > { %v1443_v17 = vpop.f32.mrf.mxu0  ;;  %4852 = vmatprep.subr.mxu0 %v4725_v3  ;;  %v4719_v30 = vld [vmem:[%s7774_s4 + $0x180] sm:$0xff] }
 0x1f2   : > { %v1453_v22 = vadd.f32 %v1443_v17, %v1319_v12  ;;  %v1472_v24 = vadd.f32 %v1459_v10, %v1452_v14  ;;  %v1479_v36 = vmax.f32 %v1471_v26, 0.0  ;;  %4853 = vmatpush3.msra.mxu0 %v4709_v6  ;;  %v4708_v12 = vld [vmem:[%s7774_s4 + $0x128] sm:$0xff]  ;;  %v4723_v14 = vld [vmem:[%s7774_s4 + $0x1a0] sm:$0xff]  ;;  %v4722_v17 = vld [vmem:[%s7774_s4 + $0x198] sm:$0xff] }
 0x1f3   : > { %4854 = vmatprep.subr.mxu0 %v4724_v8  ;;  %v4707_v10 = vld [vmem:[%s7774_s4 + $0x120] sm:$0xff]  ;;  %v1659_v26 = vld [vmem:[%s7774_s4 + $0x8] sm:$0xff]  ;;  %v1902_v6 = vld [vmem:[#allocation10 + $0xa0] sm:$0xff] }
 0x1f4   : > { %v1473_v28 = vadd.f32 %v1463_v19, %v1453_v22  ;;  %v1480_v20 = vmax.f32 %v1472_v24, 0.0  ;;  %4855 = vmatpush3.msra.mxu0 %v4708_v12  ;;  %v4706_v19 = vld [vmem:[%s7774_s4 + $0x118] sm:$0xff]  ;;  %v4721_v22 = vld [vmem:[%s7774_s4 + $0x190] sm:$0xff]  ;;  %v1675_v24 = vld [vmem:[%s7774_s4 + $0x88] sm:$0xff] }
 0x1f5   : > { %4856 = vmatprep.subr.mxu0 %v4723_v14  ;;  %v1903_v3 = vld [vmem:[#allocation10 + $0xa8] sm:$0xff]  ;;  %v1901_v8 = vld [vmem:[#allocation10 + $0x98] sm:$0xff]  ;;  %v1900_v12 = vld [vmem:[#allocation10 + $0x90] sm:$0xff] }
 0x1f6   : > { %v1481_v33 = vmax.f32 %v1473_v28, 0.0  ;;  %4857 = vmatpush3.msra.mxu0 %v4707_v10  ;;  %v4704_v28 = vld [vmem:[%s7774_s4 + $0x108] sm:$0xff]  ;;  %v1899_v14 = vld [vmem:[#allocation10 + $0x88] sm:$0xff]  ;;  %v1898_v10 = vld [vmem:[#allocation10 + $0x80] sm:$0xff] }
 0x1f7   : > { %4858 = vmatprep.subr.mxu0 %v4722_v17  ;;  %v1897_v17 = vld [vmem:[#allocation10 + $0x78] sm:$0xff] }
 0x1f8   : > { %1515 = vmatprep.subr.mxu1 %v1481_v33  ;;  %4859 = vmatpush3.msra.mxu0 %v4706_v19  ;;  %v1896_v19 = vld [vmem:[#allocation10 + $0x70] sm:$0xff] }
 0x1f9   : > { %1516 = vmatpush1.msra.mxu1 %v1480_v20  ;;  %4860 = vmatprep.subr.mxu0 %v4721_v22  ;;  %v1895_v22 = vld [vmem:[#allocation10 + $0x68] sm:$0xff] }
 0x1fa   : > { %1517 = vmatprep.subr.mxu1 %v1479_v36  ;;  %4861 = vmatpush3.msra.mxu0 %v4705_v23  ;;  %v1894_v23 = vld [vmem:[#allocation10 + $0x60] sm:$0xff] }
 0x1fb   : > { %1518 = vmatpush1.msra.mxu1 %v1478_v37  ;;  %4862 = vmatprep.subr.mxu0 %v4720_v25  ;;  %v1893_v25 = vld [vmem:[#allocation10 + $0x58] sm:$0xff] }
 0x1fc   : > { %1519 = vmatprep.subr.mxu1 %v1477_v27  ;;  %4863 = vmatpush3.msra.mxu0 %v4704_v28  ;;  %v1892_v28 = vld [vmem:[#allocation10 + $0x50] sm:$0xff] }
 0x1fd   : > { %1520 = vmatpush1.msra.mxu1 %v1476_v13  ;;  %4864 = vmatprep.subr.mxu0 %v4719_v30  ;;  %v1891_v30 = vld [vmem:[#allocation10 + $0x48] sm:$0xff] }
 0x1fe   : > { %1521 = vmatprep.subr.mxu1 %v1475_v39 }
 0x1ff   : > { %1522 = vmatpush1.msra.mxu1 %v1474_v40 }
 0x200   : > { %4699 = vmatmul.mubr.msk.f32.vlgmr.msra.gmra.mxu1 %vm1484_vm0, %v1482_v38  ;;  %1601 = vmatprep.subr.mxu1 %v1481_v33  ;;  %v4703_v33 = vld [vmem:[%s7774_s4 + $0x100] sm:$0xff] }
 0x201   : > { %1602 = vmatpush1.msra.mxu1 %v1480_v20  ;;  %1561 = vmatprep.mubr.f32.mxu1 %v6995_v41  ;;  %v1913_v20 = vld [vmem:[#allocation10 + $0xf8] sm:$0xff] }
 0x202   : > { %1603 = vmatprep.subr.mxu1 %v1479_v36  ;;  %4865 = vmatpush3.msra.mxu0 %v4703_v33  ;;  %v1890_v33 = vld [vmem:[#allocation10 + $0x40] sm:$0xff] }
 0x203   : > { %1604 = vmatpush1.msra.mxu1 %v1478_v37  ;;  %2026 = vmatprep.subr.mxu0 %v1913_v20  ;;  %v1889_v20 = vld [vmem:[#allocation10 + $0x38] sm:$0xff] }
 0x204   : > { %4700 = vmatmul.mubr.msk.f32.gmra.mxu1 %vm1484_vm0, %v1483_v42  ;;  %1605 = vmatprep.subr.mxu1 %v1477_v27  ;;  %v1947_v42 = vld [vmem:[#allocation10 + $0x1f0] sm:$0xff] }
 0x205   : > { %1606 = vmatpush1.msra.mxu1 %v1476_v13  ;;  %1641 = vmatprep.mubr.f32.mxu1 %v6995_v41 }
 0x206   : > { %1607 = vmatprep.subr.mxu1 %v1475_v39 }
 0x207   : > { %1608 = vmatpush1.msra.mxu1 %v1474_v40 }
 0x208   : > { %4701 = vmatmul.mubr.msk.f32.vlgmr.msra.gmra.mxu1 %vm1484_vm0, %v1569_v43  ;;  %4796 = vmatprep.subr.mxu1 %v1689_v44  ;;  %v1912_v43 = vld [vmem:[#allocation10 + $0xf0] sm:$0xff]  ;;  %v1946_v44 = vld [vmem:[#allocation10 + $0x1e8] sm:$0xff] }
 0x209   : > { %1647 = vmatprep.mubr.f32.mxu1 %v6995_v41  ;;  %4797 = vmatpush3.msra.mxu1 %v1673_v45  ;;  %v1911_v45 = vld [vmem:[#allocation10 + $0xe8] sm:$0xff] }
 0x20a   : > { %4798 = vmatprep.subr.mxu1 %v1688_v46 }
 0x20b   : > { %4799 = vmatpush3.msra.mxu1 %v1672_v48 }
 0x20c   : > { %4702 = vmatmul.mubr.msk.f32.gmra.mxu1 %vm1484_vm0, %v1570_v50  ;;  %4800 = vmatprep.subr.mxu1 %v1687_v51  ;;  %v1945_v51 = vld [vmem:[#allocation10 + $0x1e0] sm:$0xff] }
 0x20d   : > { %4801 = vmatpush3.msra.mxu1 %v1671_v52  ;;  %v1910_v52 = vld [vmem:[#allocation10 + $0xe0] sm:$0xff] }
 0x20e   : > { %4802 = vmatprep.subr.mxu1 %v1686_v53  ;;  %v1944_v53 = vld [vmem:[#allocation10 + $0x1d8] sm:$0xff] }
 0x20f   : > { %4803 = vmatpush3.msra.mxu1 %v1670_v54  ;;  %v1909_v54 = vld [vmem:[#allocation10 + $0xd8] sm:$0xff] }
 0x210   : > { %4804 = vmatprep.subr.mxu1 %v1685_v55  ;;  %v1943_v55 = vld [vmem:[#allocation10 + $0x1d0] sm:$0xff] }
 0x211   : > { %4805 = vmatpush3.msra.mxu1 %v1669_v56  ;;  %v1908_v56 = vld [vmem:[#allocation10 + $0xd0] sm:$0xff] }
 0x212   : > { %4806 = vmatprep.subr.mxu1 %v1684_v57  ;;  %v1942_v57 = vld [vmem:[#allocation10 + $0x1c8] sm:$0xff] }
 0x213   : > { %4807 = vmatpush3.msra.mxu1 %v1668_v58  ;;  %v1907_v58 = vld [vmem:[#allocation10 + $0xc8] sm:$0xff] }
 0x214   : > { %4808 = vmatprep.subr.mxu1 %v1683_v0  ;;  %v1941_v0 = vld [vmem:[#allocation10 + $0x1c0] sm:$0xff] }
 0x215   : > { %4809 = vmatpush3.msra.mxu1 %v1667_v59  ;;  %v1906_v59 = vld [vmem:[#allocation10 + $0xc0] sm:$0xff] }
 0x216   : > { %4810 = vmatprep.subr.mxu1 %v1682_v60  ;;  %v1940_v60 = vld [vmem:[#allocation10 + $0x1b8] sm:$0xff] }
 0x217   : > { %4811 = vmatpush3.msra.mxu1 %v1666_v61  ;;  %v1905_v61 = vld [vmem:[#allocation10 + $0xb8] sm:$0xff] }
 0x218   : > { %4812 = vmatprep.subr.mxu1 %v1681_v63  ;;  %v1939_v63 = vld [vmem:[#allocation10 + $0x1b0] sm:$0xff] }
 0x219   : > { %4813 = vmatpush3.msra.mxu1 %v1665_v1  ;;  %v1904_v1 = vld [vmem:[#allocation10 + $0xb0] sm:$0xff] }
 0x21a   : > { %4814 = vmatprep.subr.mxu1 %v1680_v2  ;;  %v1938_v2 = vld [vmem:[#allocation10 + $0x1a8] sm:$0xff] }
 0x21b   : > { %4815 = vmatpush3.msra.mxu1 %v1664_v4  ;;  %v1937_v4 = vld [vmem:[#allocation10 + $0x1a0] sm:$0xff] }
 0x21c   : > { %4816 = vmatprep.subr.mxu1 %v1679_v7  ;;  %v1936_v7 = vld [vmem:[#allocation10 + $0x198] sm:$0xff] }
 0x21d   : > { %4817 = vmatpush3.msra.mxu1 %v1663_v9  ;;  %v1935_v9 = vld [vmem:[#allocation10 + $0x190] sm:$0xff] }
 0x21e   : > { %4818 = vmatprep.subr.mxu1 %v1678_v11  ;;  %v1934_v11 = vld [vmem:[#allocation10 + $0x188] sm:$0xff] }
 0x21f   : > { %4819 = vmatpush3.msra.mxu1 %v1662_v16  ;;  %v1933_v16 = vld [vmem:[#allocation10 + $0x180] sm:$0xff] }
 0x220   : > { %4820 = vmatprep.subr.mxu1 %v1677_v15  ;;  %v1932_v15 = vld [vmem:[#allocation10 + $0x178] sm:$0xff] }
 0x221   : > { %4821 = vmatpush3.msra.mxu1 %v1661_v18  ;;  %v1931_v18 = vld [vmem:[#allocation10 + $0x170] sm:$0xff] }
 0x222   : > { %4822 = vmatprep.subr.mxu1 %v1676_v21  ;;  %v1930_v21 = vld [vmem:[#allocation10 + $0x168] sm:$0xff] }
 0x223   : > { %4823 = vmatpush3.msra.mxu1 %v1660_v49  ;;  %v1929_v49 = vld [vmem:[#allocation10 + $0x160] sm:$0xff] }
 0x224   : > { %4824 = vmatprep.subr.mxu1 %v1675_v24  ;;  %v1928_v24 = vld [vmem:[#allocation10 + $0x158] sm:$0xff] }
 0x225   : > { %4825 = vmatpush3.msra.mxu1 %v1659_v26  ;;  %v1927_v26 = vld [vmem:[#allocation10 + $0x150] sm:$0xff] }
 0x226   : > { %4826 = vmatprep.subr.mxu1 %v1674_v29  ;;  %v1926_v29 = vld [vmem:[#allocation10 + $0x148] sm:$0xff] }
 0x227   : > { %4827 = vmatpush3.msra.mxu1 %v1658_v31  ;;  %v1925_v31 = vld [vmem:[#allocation10 + $0x140] sm:$0xff] }
 0x228   : > { %1949 = vmatprep.subr.mxu1 %v1948_v34  ;;  %v1924_v34 = vld [vmem:[#allocation10 + $0x138] sm:$0xff] }
 0x2c0   : > { %v1557_v35 = vpop.f32.mrf.mxu1 }
 0x2c2   : > { %v1559_v36 = vpop.f32.mrf.mxu1 }
 0x2c4   : > { %v1563_v32 = vpop.f32.mrf.mxu1 }
 0x2c6   : > { %v1565_v37 = vpop.f32.mrf.mxu1 }
 0x2c8   : > { %v1643_v27 = vpop.f32.mrf.mxu1 }
 0x2c9   : > { %v1654_v40 = vmax.f32 %v1557_v35, %v1643_v27  ;;  %v1923_v35 = vld [vmem:[#allocation10 + $0x130] sm:$0xff]  ;;  %v1921_v27 = vld [vmem:[#allocation10 + $0x120] sm:$0xff] }
 0x2ca   : > { %v1645_v13 = vpop.f32.mrf.mxu1 }
 0x2cb   : > { %v1655_v39 = vmax.f32 %v1559_v36, %v1645_v13  ;;  %v1888_v36 = vld [vmem:[#allocation10 + $0x30] sm:$0xff]  ;;  %v1886_v13 = vld [vmem:[#allocation10 + $0x20] sm:$0xff] }
 0x2cc   : > { %v1649_v38 = vpop.f32.mrf.mxu1 }
 0x2cd   : > { %1754 = vmatprep.mubr.f32.mxu1 %v1655_v39  ;;  %1862 = vmatprep.mubr.f32.mxu0 %v1655_v39  ;;  %v1656_v50 = vmax.f32 %v1563_v32, %v1649_v38  ;;  %v1922_v32 = vld [vmem:[#allocation10 + $0x128] sm:$0xff]  ;;  %v1920_v39 = vld [vmem:[#allocation10 + $0x118] sm:$0xff]  ;;  %v1919_v38 = vld [vmem:[#allocation10 + $0x110] sm:$0xff] }
 0x2ce   : > { %v1651_v46 = vpop.f32.mrf.mxu1  ;;  %1755 = vmatmul.mubr.f32.vlgmr.msra.gmra.mxu1 %v1654_v40  ;;  %1863 = vmatmul.mubr.f32.vlgmr.msra.gmra.mxu0 %v1654_v40  ;;  %v1885_v40 = vld [vmem:[#allocation10 + $0x18] sm:$0xff] }
 0x2cf   : > { %v1657_v48 = vmax.f32 %v1565_v37, %v1651_v46  ;;  %1950 = vmatpush1.msra.mxu1 %v1947_v42  ;;  %2027 = vmatpush1.msra.mxu0 %v1912_v43  ;;  %v1887_v37 = vld [vmem:[#allocation10 + $0x28] sm:$0xff]  ;;  %v1884_v42 = vld [vmem:[#allocation10 + $0x10] sm:$0xff]  ;;  %v1882_v46 = vld [vmem:[#allocation10] sm:$0xff] }
 0x2d0   : > { %1951 = vmatprep.subr.mxu1 %v1946_v44  ;;  %2028 = vmatprep.subr.mxu0 %v1911_v45  ;;  %v1918_v43 = vld [vmem:[#allocation10 + $0x108] sm:$0xff]  ;;  %v1917_v45 = vld [vmem:[#allocation10 + $0x100] sm:$0xff] }
 0x2d1   : > { %1759 = vmatprep.mubr.f32.mxu1 %v1657_v48  ;;  %1867 = vmatprep.mubr.f32.mxu0 %v1657_v48  ;;  %v1883_v44 = vld [vmem:[#allocation10 + $0x8] sm:$0xff]  ;;  %v2137_v48 = vld [vmem:[#allocation10 + $0x2f8] sm:$0xff] }
 0x2d2   : > { %1760 = vmatmul.mubr.f32.gmra.mxu1 %v1656_v50  ;;  %1868 = vmatmul.mubr.f32.gmra.mxu0 %v1656_v50  ;;  %v2253_v50 = vld [vmem:[#allocation10 + $0x3f8] sm:$0xff] }
 0x2d3   : > { %1952 = vmatpush1.msra.mxu1 %v1945_v51  ;;  %2029 = vmatpush1.msra.mxu0 %v1910_v52 }
 0x2d4   : > { %1953 = vmatprep.subr.mxu1 %v1944_v53  ;;  %2030 = vmatprep.subr.mxu0 %v1909_v54 }
 0x2d5   : > { %1954 = vmatpush1.msra.mxu1 %v1943_v55  ;;  %2031 = vmatpush1.msra.mxu0 %v1908_v56 }
 0x2d6   : > { %1955 = vmatprep.subr.mxu1 %v1942_v57  ;;  %2032 = vmatprep.subr.mxu0 %v1907_v58 }
 0x2d7   : > { %1956 = vmatpush1.msra.mxu1 %v1941_v0  ;;  %2033 = vmatpush1.msra.mxu0 %v1906_v59 }
 0x2d8   : > { %1957 = vmatprep.subr.mxu1 %v1940_v60  ;;  %2034 = vmatprep.subr.mxu0 %v1905_v61 }
 0x2d9   : > { %1958 = vmatpush1.msra.mxu1 %v1939_v63  ;;  %2035 = vmatpush1.msra.mxu0 %v1904_v1 }
 0x2da   : > { %1959 = vmatprep.subr.mxu1 %v1938_v2  ;;  %2036 = vmatprep.subr.mxu0 %v1903_v3  ;;  %v2136_v2 = vld [vmem:[#allocation10 + $0x2f0] sm:$0xff] }
 0x2db   : > { %1960 = vmatpush1.msra.mxu1 %v1937_v4  ;;  %2037 = vmatpush1.msra.mxu0 %v1902_v6  ;;  %v2252_v3 = vld [vmem:[#allocation10 + $0x3f0] sm:$0xff]  ;;  %v2135_v4 = vld [vmem:[#allocation10 + $0x2e8] sm:$0xff] }
 0x2dc   : > { %1961 = vmatprep.subr.mxu1 %v1936_v7  ;;  %2038 = vmatprep.subr.mxu0 %v1901_v8  ;;  %v2251_v8 = vld [vmem:[#allocation10 + $0x3e8] sm:$0xff] }
 0x2dd   : > { %1962 = vmatpush1.msra.mxu1 %v1935_v9  ;;  %2039 = vmatpush1.msra.mxu0 %v1900_v12  ;;  %v2134_v9 = vld [vmem:[#allocation10 + $0x2e0] sm:$0xff] }
 0x2de   : > { %1963 = vmatprep.subr.mxu1 %v1934_v11  ;;  %2040 = vmatprep.subr.mxu0 %v1899_v14  ;;  %v2250_v12 = vld [vmem:[#allocation10 + $0x3e0] sm:$0xff]  ;;  %v2133_v11 = vld [vmem:[#allocation10 + $0x2d8] sm:$0xff] }
 0x2df   : > { %1964 = vmatpush1.msra.mxu1 %v1933_v16  ;;  %2041 = vmatpush1.msra.mxu0 %v1898_v10  ;;  %v2249_v14 = vld [vmem:[#allocation10 + $0x3d8] sm:$0xff] }
 0x2e0   : > { %1965 = vmatprep.subr.mxu1 %v1932_v15  ;;  %2042 = vmatprep.subr.mxu0 %v1897_v17  ;;  %v2132_v15 = vld [vmem:[#allocation10 + $0x2d0] sm:$0xff] }
 0x2e1   : > { %1966 = vmatpush1.msra.mxu1 %v1931_v18  ;;  %2043 = vmatpush1.msra.mxu0 %v1896_v19  ;;  %v2248_v17 = vld [vmem:[#allocation10 + $0x3d0] sm:$0xff]  ;;  %v2131_v18 = vld [vmem:[#allocation10 + $0x2c8] sm:$0xff] }
 0x2e2   : > { %2013 = vmatprep.mubr.f32.mxu1 %v6995_v41  ;;  %2090 = vmatprep.mubr.f32.mxu0 %v6995_v41  ;;  %v2247_v19 = vld [vmem:[#allocation10 + $0x3c8] sm:$0xff] }
 0x2e3   : > { %1967 = vmatprep.subr.mxu1 %v1930_v21  ;;  %2044 = vmatprep.subr.mxu0 %v1895_v22  ;;  %v2130_v21 = vld [vmem:[#allocation10 + $0x2c0] sm:$0xff] }
 0x2e4   : > { %1968 = vmatpush1.msra.mxu1 %v1929_v49  ;;  %2045 = vmatpush1.msra.mxu0 %v1894_v23  ;;  %v2246_v22 = vld [vmem:[#allocation10 + $0x3c0] sm:$0xff]  ;;  %v2129_v49 = vld [vmem:[#allocation10 + $0x2b8] sm:$0xff] }
 0x2e5   : > { %1969 = vmatprep.subr.mxu1 %v1928_v24  ;;  %2046 = vmatprep.subr.mxu0 %v1893_v25  ;;  %v2245_v23 = vld [vmem:[#allocation10 + $0x3b8] sm:$0xff]  ;;  %v2128_v24 = vld [vmem:[#allocation10 + $0x2b0] sm:$0xff] }
 0x2e6   : > { %1970 = vmatpush1.msra.mxu1 %v1927_v26  ;;  %2047 = vmatpush1.msra.mxu0 %v1892_v28  ;;  %v2244_v25 = vld [vmem:[#allocation10 + $0x3b0] sm:$0xff]  ;;  %v2127_v26 = vld [vmem:[#allocation10 + $0x2a8] sm:$0xff] }
 0x2e7   : > { %1971 = vmatprep.subr.mxu1 %v1926_v29  ;;  %2048 = vmatprep.subr.mxu0 %v1891_v30  ;;  %v2243_v28 = vld [vmem:[#allocation10 + $0x3a8] sm:$0xff]  ;;  %v2126_v29 = vld [vmem:[#allocation10 + $0x2a0] sm:$0xff] }
 0x2e8   : > { %1972 = vmatpush1.msra.mxu1 %v1925_v31  ;;  %2049 = vmatpush1.msra.mxu0 %v1890_v33  ;;  %v2242_v30 = vld [vmem:[#allocation10 + $0x3a0] sm:$0xff]  ;;  %v2125_v31 = vld [vmem:[#allocation10 + $0x298] sm:$0xff] }
 0x2e9   : > { %1973 = vmatprep.subr.mxu1 %v1924_v34  ;;  %2050 = vmatprep.subr.mxu0 %v1889_v20  ;;  %v2241_v33 = vld [vmem:[#allocation10 + $0x398] sm:$0xff]  ;;  %v2124_v34 = vld [vmem:[#allocation10 + $0x290] sm:$0xff] }
 0x2ea   : > { %1974 = vmatpush1.msra.mxu1 %v1923_v35  ;;  %2051 = vmatpush1.msra.mxu0 %v1888_v36  ;;  %v2240_v20 = vld [vmem:[#allocation10 + $0x390] sm:$0xff]  ;;  %v2123_v35 = vld [vmem:[#allocation10 + $0x288] sm:$0xff] }
 0x2eb   : > { %1975 = vmatprep.subr.mxu1 %v1922_v32  ;;  %2052 = vmatprep.subr.mxu0 %v1887_v37  ;;  %v2239_v36 = vld [vmem:[#allocation10 + $0x388] sm:$0xff]  ;;  %v2122_v32 = vld [vmem:[#allocation10 + $0x280] sm:$0xff] }
 0x2ec   : > { %1976 = vmatpush1.msra.mxu1 %v1921_v27  ;;  %2053 = vmatpush1.msra.mxu0 %v1886_v13  ;;  %v2238_v37 = vld [vmem:[#allocation10 + $0x380] sm:$0xff]  ;;  %v2121_v27 = vld [vmem:[#allocation10 + $0x278] sm:$0xff] }
 0x2ed   : > { %1977 = vmatprep.subr.mxu1 %v1920_v39  ;;  %2054 = vmatprep.subr.mxu0 %v1885_v40  ;;  %v2237_v13 = vld [vmem:[#allocation10 + $0x378] sm:$0xff]  ;;  %v2120_v39 = vld [vmem:[#allocation10 + $0x270] sm:$0xff] }
 0x2ee   : > { %1978 = vmatpush1.msra.mxu1 %v1919_v38  ;;  %2055 = vmatpush1.msra.mxu0 %v1884_v42  ;;  %v2236_v40 = vld [vmem:[#allocation10 + $0x370] sm:$0xff]  ;;  %v2119_v38 = vld [vmem:[#allocation10 + $0x268] sm:$0xff] }
 0x2ef   : > { %1979 = vmatprep.subr.mxu1 %v1918_v43  ;;  %2056 = vmatprep.subr.mxu0 %v1883_v44  ;;  %v2235_v42 = vld [vmem:[#allocation10 + $0x368] sm:$0xff]  ;;  %v2118_v43 = vld [vmem:[#allocation10 + $0x260] sm:$0xff] }
 0x2f0   : > { %1980 = vmatpush1.msra.mxu1 %v1917_v45  ;;  %2057 = vmatpush1.msra.mxu0 %v1882_v46  ;;  %v2234_v44 = vld [vmem:[#allocation10 + $0x360] sm:$0xff]  ;;  %v2117_v45 = vld [vmem:[#allocation10 + $0x258] sm:$0xff] }
 0x2f1   : > { %2138 = vmatprep.subr.mxu1 %v2137_v48  ;;  %2254 = vmatprep.subr.mxu0 %v2253_v50  ;;  %v2233_v46 = vld [vmem:[#allocation10 + $0x358] sm:$0xff]  ;;  %v2116_v48 = vld [vmem:[#allocation10 + $0x250] sm:$0xff] }
 0x2f2   : > { %v2232_v50 = vld [vmem:[#allocation10 + $0x350] sm:$0xff] }
 0x38e   : > { %v4828_v51 = vpop.f32.mrf.mxu1  ;;  %v4866_v52 = vpop.f32.mrf.mxu0 }
 0x390   : > { %v4829_v53 = vpop.f32.mrf.mxu1  ;;  %v4867_v54 = vpop.f32.mrf.mxu0 }
 0x391   : > { %v4830_v55 = vadd.f32 %v4829_v53, %v4828_v51  ;;  %v4868_v56 = vadd.f32 %v4867_v54, %v4866_v52  ;;  %v2115_v51 = vld [vmem:[#allocation10 + $0x248] sm:$0xff]  ;;  %v2114_v53 = vld [vmem:[#allocation10 + $0x240] sm:$0xff] }
 0x392   : > { %v4831_v57 = vpop.f32.mrf.mxu1  ;;  %v4869_v58 = vpop.f32.mrf.mxu0  ;;  %v2231_v52 = vld [vmem:[#allocation10 + $0x348] sm:$0xff]  ;;  %v2230_v54 = vld [vmem:[#allocation10 + $0x340] sm:$0xff] }
 0x393   : > { %v7143_v0 = vmax.f32 %v4830_v55, %v4868_v56  ;;  %v2113_v55 = vld [vmem:[#allocation10 + $0x238] sm:$0xff] }
 0x394   : > { %v4832_v59 = vpop.f32.mrf.mxu1  ;;  %v4870_v60 = vpop.f32.mrf.mxu0  ;;  %v2229_v56 = vld [vmem:[#allocation10 + $0x338] sm:$0xff] }
 0x395   : > { %1878 = vst [vmem:[#allocation3 + $0x2] sm:$0xff] %v7143_v0  ;;  %v4833_v61 = vadd.f32 %v4832_v59, %v4831_v57  ;;  %v4871_v63 = vadd.f32 %v4870_v60, %v4869_v58  ;;  %v2112_v57 = vld [vmem:[#allocation10 + $0x230] sm:$0xff]  ;;  %v2111_v59 = vld [vmem:[#allocation10 + $0x228] sm:$0xff] }
 0x396   : > { %v2228_v58 = vld [vmem:[#allocation10 + $0x330] sm:$0xff]  ;;  %v2227_v60 = vld [vmem:[#allocation10 + $0x328] sm:$0xff] }
 0x397   : > { %v7146_v1 = vmax.f32 %v4833_v61, %v4871_v63  ;;  %v2110_v61 = vld [vmem:[#allocation10 + $0x220] sm:$0xff] }
 0x398   : > { %v2226_v63 = vld [vmem:[#allocation10 + $0x320] sm:$0xff] }
 0x399   : > { %1879 = vst [vmem:[#allocation3 + $0xa] sm:$0xff] %v7146_v1 }
 0x39c   : > { %v1914_v6 = vld [vmem:[#allocation3 + $0x1] sm:$0xff] }
 0x39d   : > { %v1880_v7 = vld [vmem:[#allocation3] sm:$0xff]  ;;  %2014 = vmatmul.mubr.f32.vlgmr.msra.gmra.mxu1 %v1914_v6 }
 0x39e   : > { %2091 = vmatmul.mubr.f32.vlgmr.msra.gmra.mxu0 %v1880_v7  ;;  %2139 = vmatpush1.msra.mxu1 %v2136_v2  ;;  %v2109_v2 = vld [vmem:[#allocation10 + $0x218] sm:$0xff]  ;;  %v2224_v6 = vld [vmem:[#allocation10 + $0x310] sm:$0xff]  ;;  %v2107_v7 = vld [vmem:[#allocation10 + $0x208] sm:$0xff] }
 0x39f   : > { %2255 = vmatpush1.msra.mxu0 %v2252_v3  ;;  %2140 = vmatprep.subr.mxu1 %v2135_v4  ;;  %v2225_v3 = vld [vmem:[#allocation10 + $0x318] sm:$0xff]  ;;  %v2108_v4 = vld [vmem:[#allocation10 + $0x210] sm:$0xff] }
 0x3a0   : > { %2256 = vmatprep.subr.mxu0 %v2251_v8  ;;  %2141 = vmatpush1.msra.mxu1 %v2134_v9  ;;  %v1915_v16 = vld [vmem:[#allocation3 + $0x9] sm:$0xff]  ;;  %v2223_v8 = vld [vmem:[#allocation10 + $0x308] sm:$0xff] }
 0x3a1   : > { %2257 = vmatpush1.msra.mxu0 %v2250_v12  ;;  %v1881_v10 = vld [vmem:[#allocation3 + $0x8] sm:$0xff]  ;;  %2019 = vmatprep.mubr.f32.mxu1 %v6995_v41 }
 0x3a2   : > { %2096 = vmatprep.mubr.f32.mxu0 %v6995_v41  ;;  %2142 = vmatprep.subr.mxu1 %v2133_v11  ;;  %v2106_v9 = vld [vmem:[#allocation10 + $0x200] sm:$0xff]  ;;  %v2369_v11 = vld [vmem:[#allocation10 + $0x4f8] sm:$0xff] }
 0x3a3   : > { %2258 = vmatprep.subr.mxu0 %v2249_v14  ;;  %2020 = vmatmul.mubr.f32.gmra.mxu1 %v1915_v16  ;;  %v2222_v12 = vld [vmem:[#allocation10 + $0x300] sm:$0xff]  ;;  %v2368_v16 = vld [vmem:[#allocation10 + $0x4f0] sm:$0xff] }
 0x3a4   : > { %2097 = vmatmul.mubr.f32.gmra.mxu0 %v1881_v10  ;;  %2143 = vmatpush1.msra.mxu1 %v2132_v15  ;;  %v2219_v14 = vld [vmem:[#allocation3 + $0x3] sm:$0xff]  ;;  %v2367_v10 = vld [vmem:[#allocation10 + $0x4e8] sm:$0xff] }
 0x3a5   : > { %2259 = vmatpush1.msra.mxu0 %v2248_v17  ;;  %2144 = vmatprep.subr.mxu1 %v2131_v18  ;;  %v2366_v15 = vld [vmem:[#allocation10 + $0x4e0] sm:$0xff]  ;;  %v2365_v17 = vld [vmem:[#allocation10 + $0x4d8] sm:$0xff] }
 0x3a6   : > { %2260 = vmatprep.subr.mxu0 %v2247_v19  ;;  %2145 = vmatpush1.msra.mxu1 %v2130_v21  ;;  %v2220_v18 = vld [vmem:[#allocation3 + $0xb] sm:$0xff]  ;;  %v2364_v19 = vld [vmem:[#allocation10 + $0x4d0] sm:$0xff] }
 0x3a7   : > { %2261 = vmatpush1.msra.mxu0 %v2246_v22  ;;  %2146 = vmatprep.subr.mxu1 %v2129_v49  ;;  %v2363_v21 = vld [vmem:[#allocation10 + $0x4c8] sm:$0xff]  ;;  %v2361_v22 = vld [vmem:[#allocation10 + $0x4b8] sm:$0xff]  ;;  %v2360_v49 = vld [vmem:[#allocation10 + $0x4b0] sm:$0xff] }
 0x3a8   : > { %2262 = vmatprep.subr.mxu0 %v2245_v23  ;;  %2147 = vmatpush1.msra.mxu1 %v2128_v24  ;;  %v2359_v23 = vld [vmem:[#allocation10 + $0x4a8] sm:$0xff]  ;;  %v2358_v24 = vld [vmem:[#allocation10 + $0x4a0] sm:$0xff] }
 0x3a9   : > { %2263 = vmatpush1.msra.mxu0 %v2244_v25  ;;  %2148 = vmatprep.subr.mxu1 %v2127_v26  ;;  %v2357_v25 = vld [vmem:[#allocation10 + $0x498] sm:$0xff]  ;;  %v2356_v26 = vld [vmem:[#allocation10 + $0x490] sm:$0xff] }
 0x3aa   : > { %2264 = vmatprep.subr.mxu0 %v2243_v28  ;;  %2149 = vmatpush1.msra.mxu1 %v2126_v29  ;;  %v2354_v28 = vld [vmem:[#allocation10 + $0x480] sm:$0xff]  ;;  %v2353_v29 = vld [vmem:[#allocation10 + $0x478] sm:$0xff] }
 0x3ab   : > { %2265 = vmatpush1.msra.mxu0 %v2242_v30  ;;  %2150 = vmatprep.subr.mxu1 %v2125_v31  ;;  %v2352_v30 = vld [vmem:[#allocation10 + $0x470] sm:$0xff]  ;;  %v2351_v31 = vld [vmem:[#allocation10 + $0x468] sm:$0xff] }
 0x3ac   : > { %2266 = vmatprep.subr.mxu0 %v2241_v33  ;;  %2151 = vmatpush1.msra.mxu1 %v2124_v34  ;;  %v2350_v33 = vld [vmem:[#allocation10 + $0x460] sm:$0xff]  ;;  %v2349_v34 = vld [vmem:[#allocation10 + $0x458] sm:$0xff] }
 0x3ad   : > { %2267 = vmatpush1.msra.mxu0 %v2240_v20  ;;  %2152 = vmatprep.subr.mxu1 %v2123_v35  ;;  %v2348_v20 = vld [vmem:[#allocation10 + $0x450] sm:$0xff]  ;;  %v2347_v35 = vld [vmem:[#allocation10 + $0x448] sm:$0xff] }
 0x3ae   : > { %2268 = vmatprep.subr.mxu0 %v2239_v36  ;;  %2153 = vmatpush1.msra.mxu1 %v2122_v32  ;;  %v2346_v36 = vld [vmem:[#allocation10 + $0x440] sm:$0xff]  ;;  %v2345_v32 = vld [vmem:[#allocation10 + $0x438] sm:$0xff] }
 0x3af   : > { %2269 = vmatpush1.msra.mxu0 %v2238_v37  ;;  %2154 = vmatprep.subr.mxu1 %v2121_v27  ;;  %v2344_v37 = vld [vmem:[#allocation10 + $0x430] sm:$0xff]  ;;  %v2343_v27 = vld [vmem:[#allocation10 + $0x428] sm:$0xff] }
 0x3b0   : > { %2270 = vmatprep.subr.mxu0 %v2237_v13  ;;  %2155 = vmatpush1.msra.mxu1 %v2120_v39  ;;  %v2342_v13 = vld [vmem:[#allocation10 + $0x420] sm:$0xff]  ;;  %v2341_v39 = vld [vmem:[#allocation10 + $0x418] sm:$0xff] }
 0x3b1   : > { %2271 = vmatpush1.msra.mxu0 %v2236_v40  ;;  %2156 = vmatprep.subr.mxu1 %v2119_v38  ;;  %v2340_v40 = vld [vmem:[#allocation10 + $0x410] sm:$0xff]  ;;  %v2339_v38 = vld [vmem:[#allocation10 + $0x408] sm:$0xff] }
 0x3b2   : > { %2272 = vmatprep.subr.mxu0 %v2235_v42  ;;  %2157 = vmatpush1.msra.mxu1 %v2118_v43  ;;  %v2338_v42 = vld [vmem:[#allocation10 + $0x400] sm:$0xff] }
 0x3b3   : > { %2273 = vmatpush1.msra.mxu0 %v2234_v44  ;;  %2158 = vmatprep.subr.mxu1 %v2117_v45  ;;  %v2335_v43 = vld [vmem:[#allocation3 + $0x4] sm:$0xff]  ;;  %v2336_v44 = vld [vmem:[#allocation3 + $0xc] sm:$0xff] }
 0x3b4   : > { %2274 = vmatprep.subr.mxu0 %v2233_v46  ;;  %2159 = vmatpush1.msra.mxu1 %v2116_v48  ;;  %v2759_v45 = vld [vmem:[#allocation13 + $0x1f8] sm:$0xff]  ;;  %v2758_v48 = vld [vmem:[#allocation13 + $0x1f0] sm:$0xff] }
 0x3b5   : > { %2275 = vmatpush1.msra.mxu0 %v2232_v50  ;;  %2160 = vmatprep.subr.mxu1 %v2115_v51  ;;  %v2743_v46 = vld [vmem:[#allocation13 + $0x178] sm:$0xff]  ;;  %v2742_v50 = vld [vmem:[#allocation13 + $0x170] sm:$0xff]  ;;  %v2757_v51 = vld [vmem:[#allocation13 + $0x1e8] sm:$0xff] }
 0x3b6   : > { %2276 = vmatprep.subr.mxu0 %v2231_v52  ;;  %2161 = vmatpush1.msra.mxu1 %v2114_v53  ;;  %v2741_v52 = vld [vmem:[#allocation13 + $0x168] sm:$0xff]  ;;  %v2756_v53 = vld [vmem:[#allocation13 + $0x1e0] sm:$0xff] }
 0x3b7   : > { %2277 = vmatpush1.msra.mxu0 %v2230_v54  ;;  %2162 = vmatprep.subr.mxu1 %v2113_v55  ;;  %v2740_v54 = vld [vmem:[#allocation13 + $0x160] sm:$0xff]  ;;  %v2755_v55 = vld [vmem:[#allocation13 + $0x1d8] sm:$0xff] }
 0x3b8   : > { %2278 = vmatprep.subr.mxu0 %v2229_v56  ;;  %2163 = vmatpush1.msra.mxu1 %v2112_v57  ;;  %v2754_v56 = vld [vmem:[#allocation13 + $0x1d0] sm:$0xff] }
 0x3b9   : > { %2279 = vmatpush1.msra.mxu0 %v2228_v58  ;;  %2164 = vmatprep.subr.mxu1 %v2111_v59  ;;  %v2738_v57 = vld [vmem:[#allocation13 + $0x150] sm:$0xff]  ;;  %v2753_v58 = vld [vmem:[#allocation13 + $0x1c8] sm:$0xff] }
 0x3ba   : > { %2280 = vmatprep.subr.mxu0 %v2227_v60  ;;  %2165 = vmatpush1.msra.mxu1 %v2110_v61  ;;  %v2737_v59 = vld [vmem:[#allocation13 + $0x148] sm:$0xff]  ;;  %v2752_v60 = vld [vmem:[#allocation13 + $0x1c0] sm:$0xff] }
 0x3bb   : > { %2281 = vmatpush1.msra.mxu0 %v2226_v63  ;;  %2166 = vmatprep.subr.mxu1 %v2109_v2  ;;  %v2736_v61 = vld [vmem:[#allocation13 + $0x140] sm:$0xff]  ;;  %v2751_v63 = vld [vmem:[#allocation13 + $0x1b8] sm:$0xff] }
 0x3bc   : > { %2282 = vmatprep.subr.mxu0 %v2225_v3  ;;  %2167 = vmatpush1.msra.mxu1 %v2108_v4  ;;  %v2735_v2 = vld [vmem:[#allocation13 + $0x138] sm:$0xff]  ;;  %v2750_v3 = vld [vmem:[#allocation13 + $0x1b0] sm:$0xff] }
 0x3bd   : > { %2283 = vmatpush1.msra.mxu0 %v2224_v6  ;;  %2168 = vmatprep.subr.mxu1 %v2107_v7  ;;  %v2734_v4 = vld [vmem:[#allocation13 + $0x130] sm:$0xff]  ;;  %v2749_v6 = vld [vmem:[#allocation13 + $0x1a8] sm:$0xff] }
 0x3be   : > { %2284 = vmatprep.subr.mxu0 %v2223_v8  ;;  %2169 = vmatpush1.msra.mxu1 %v2106_v9  ;;  %v2733_v7 = vld [vmem:[#allocation13 + $0x128] sm:$0xff] }
 0x3bf   : > { %2202 = vmatprep.mubr.f32.mxu1 %v6995_v41  ;;  %2285 = vmatpush1.msra.mxu0 %v2222_v12 }
 0x3c0   : > { %2318 = vmatprep.mubr.f32.mxu0 %v6995_v41  ;;  %2203 = vmatmul.mubr.f32.vlgmr.msra.gmra.mxu1 %v7143_v0  ;;  %v2362_v0 = vld [vmem:[#allocation10 + $0x4c0] sm:$0xff] }
 0x3c1   : > { %2319 = vmatmul.mubr.f32.vlgmr.msra.gmra.mxu0 %v2219_v14  ;;  %2370 = vmatprep.subr.mxu1 %v2369_v11 }
 0x3c2   : > { %2208 = vmatprep.mubr.f32.mxu1 %v6995_v41  ;;  %2371 = vmatpush1.msra.mxu1 %v2368_v16 }
 0x3c3   : > { %2324 = vmatprep.mubr.f32.mxu0 %v6995_v41  ;;  %2372 = vmatprep.subr.mxu1 %v2367_v10 }
 0x3c4   : > { %2373 = vmatpush1.msra.mxu1 %v2366_v15 }
 0x3c5   : > { %2325 = vmatmul.mubr.f32.gmra.mxu0 %v2220_v18  ;;  %2209 = vmatmul.mubr.f32.gmra.mxu1 %v7146_v1  ;;  %v2355_v1 = vld [vmem:[#allocation10 + $0x488] sm:$0xff] }
 0x3c6   : > { %2374 = vmatprep.subr.mxu1 %v2365_v17  ;;  %2434 = vmatprep.mubr.f32.mxu1 %v6995_v41 }
 0x3c7   : > { %2375 = vmatpush1.msra.mxu1 %v2364_v19  ;;  %2540 = vmatprep.mubr.f32.mxu0 %v6995_v41 }
 0x3c8   : > { %2376 = vmatprep.subr.mxu1 %v2363_v21 }
 0x3c9   : > { %2377 = vmatpush1.msra.mxu1 %v2362_v0 }
 0x3ca   : > { %2378 = vmatprep.subr.mxu1 %v2361_v22 }
 0x3cb   : > { %2379 = vmatpush1.msra.mxu1 %v2360_v49 }
 0x3cc   : > { %2380 = vmatprep.subr.mxu1 %v2359_v23 }
 0x3cd   : > { %2381 = vmatpush1.msra.mxu1 %v2358_v24 }
 0x3ce   : > { %2382 = vmatprep.subr.mxu1 %v2357_v25 }
 0x3cf   : > { %2383 = vmatpush1.msra.mxu1 %v2356_v26 }
 0x3d0   : > { %2384 = vmatprep.subr.mxu1 %v2355_v1 }
 0x3d1   : > { %2385 = vmatpush1.msra.mxu1 %v2354_v28 }
 0x3d2   : > { %2386 = vmatprep.subr.mxu1 %v2353_v29 }
 0x3d3   : > { %2387 = vmatpush1.msra.mxu1 %v2352_v30 }
 0x3d4   : > { %2388 = vmatprep.subr.mxu1 %v2351_v31 }
 0x3d5   : > { %2389 = vmatpush1.msra.mxu1 %v2350_v33 }
 0x3d6   : > { %2390 = vmatprep.subr.mxu1 %v2349_v34 }
 0x3d7   : > { %2391 = vmatpush1.msra.mxu1 %v2348_v20 }
 0x3d8   : > { %2392 = vmatprep.subr.mxu1 %v2347_v35  ;;  %v2451_v35 = vld [vmem:[#allocation11] sm:$0x3] }
 0x3d9   : > { %2393 = vmatpush1.msra.mxu1 %v2346_v36 }
 0x3da   : > { %2394 = vmatprep.subr.mxu1 %v2345_v32 }
 0x3db   : > { %2395 = vmatpush1.msra.mxu1 %v2344_v37 }
 0x3dc   : > { %2396 = vmatprep.subr.mxu1 %v2343_v27 }
 0x3dd   : > { %2397 = vmatpush1.msra.mxu1 %v2342_v13 }
 0x3de   : > { %2398 = vmatprep.subr.mxu1 %v2341_v39  ;;  %v2460_v39 = vrot.slane %v2451_v35, %v1462_v5  ;;  %v2471_v5 = vld [vmem:[%s7701_s7] sm:$0xff] }
 0x3df   : > { %2399 = vmatpush1.msra.mxu1 %v2340_v40 }
 0x3e0   : > { %2400 = vmatprep.subr.mxu1 %v2339_v38 }
 0x3e1   : > { %2401 = vmatpush1.msra.mxu1 %v2338_v42  ;;  %v2456_v42 = vrot.slane %v2451_v35, %v1458_v62  ;;  %v4736_v62 = vld [vmem:[%s7701_s7 + $0x8] sm:$0xff]  ;;  %v2728_v35 = vld [vmem:[#allocation13 + $0x100] sm:$0xff] }
 0x3e2   : > { %2435 = vmatmul.mubr.f32.vlgmr.msra.gmra.mxu1 %v2335_v43  ;;  %4907 = vmatprep.subr.mxu1 %v2759_v45 }
 0x3e3   : > { %2440 = vmatprep.mubr.f32.mxu1 %v6995_v41  ;;  %4908 = vmatpush3.msra.mxu1 %v2743_v46  ;;  %v2739_v41 = vld [vmem:[#allocation13 + $0x158] sm:$0xff] }
 0x3e4   : > { %4909 = vmatprep.subr.mxu1 %v2758_v48 }
 0x3e5   : > { %4910 = vmatpush3.msra.mxu1 %v2742_v50 }
 0x3e6   : > { %2441 = vmatmul.mubr.f32.gmra.mxu1 %v2336_v44  ;;  %4911 = vmatprep.subr.mxu1 %v2757_v51 }
 0x3e7   : > { %4912 = vmatpush3.msra.mxu1 %v2741_v52 }
 0x3e8   : > { %4913 = vmatprep.subr.mxu1 %v2756_v53 }
 0x3e9   : > { %4914 = vmatpush3.msra.mxu1 %v2740_v54 }
 0x3ea   : > { %4915 = vmatprep.subr.mxu1 %v2755_v55  ;;  %v2656_v55 = vld [vmem:[#allocation13 + $0xf8] sm:$0xff] }
 0x3eb   : > { %4916 = vmatpush3.msra.mxu1 %v2739_v41  ;;  %v2640_v41 = vld [vmem:[#allocation13 + $0x78] sm:$0xff] }
 0x3ec   : > { %4917 = vmatprep.subr.mxu1 %v2754_v56  ;;  %v2655_v56 = vld [vmem:[#allocation13 + $0xf0] sm:$0xff] }
 0x3ed   : > { %4918 = vmatpush3.msra.mxu1 %v2738_v57  ;;  %v2639_v57 = vld [vmem:[#allocation13 + $0x70] sm:$0xff] }
 0x3ee   : > { %4919 = vmatprep.subr.mxu1 %v2753_v58  ;;  %v2654_v58 = vld [vmem:[#allocation13 + $0xe8] sm:$0xff] }
 0x3ef   : > { %4920 = vmatpush3.msra.mxu1 %v2737_v59  ;;  %v2638_v59 = vld [vmem:[#allocation13 + $0x68] sm:$0xff] }
 0x3f0   : > { %4921 = vmatprep.subr.mxu1 %v2752_v60  ;;  %v2653_v60 = vld [vmem:[#allocation13 + $0xe0] sm:$0xff] }
 0x3f1   : > { %4922 = vmatpush3.msra.mxu1 %v2736_v61  ;;  %v2637_v61 = vld [vmem:[#allocation13 + $0x60] sm:$0xff] }
 0x3f2   : > { %4923 = vmatprep.subr.mxu1 %v2751_v63  ;;  %v2652_v63 = vld [vmem:[#allocation13 + $0xd8] sm:$0xff] }
 0x3f3   : > { %4924 = vmatpush3.msra.mxu1 %v2735_v2  ;;  %v2636_v2 = vld [vmem:[#allocation13 + $0x58] sm:$0xff] }
 0x3f4   : > { %4925 = vmatprep.subr.mxu1 %v2750_v3  ;;  %v2651_v3 = vld [vmem:[#allocation13 + $0xd0] sm:$0xff] }
 0x3f5   : > { %4926 = vmatpush3.msra.mxu1 %v2734_v4  ;;  %v2635_v4 = vld [vmem:[#allocation13 + $0x50] sm:$0xff] }
 0x3f6   : > { %4927 = vmatprep.subr.mxu1 %v2749_v6  ;;  %v2650_v6 = vld [vmem:[#allocation13 + $0xc8] sm:$0xff] }
 0x3f7   : > { %4928 = vmatpush3.msra.mxu1 %v2733_v7  ;;  %v2634_v7 = vld [vmem:[#allocation13 + $0x48] sm:$0xff] }
 0x45d   : > { %v2015_v8 = vpop.f32.mrf.mxu1 }
 0x45e   : > { %v2092_v12 = vpop.f32.mrf.mxu0 }
 0x45f   : > { %v2017_v9 = vpop.f32.mrf.mxu1  ;;  %v2093_v23 = vadd.f32 %v2092_v12, %v2015_v8  ;;  %v2649_v8 = vld [vmem:[#allocation13 + $0xc0] sm:$0xff]  ;;  %v2648_v12 = vld [vmem:[#allocation13 + $0xb8] sm:$0xff] }
 0x460   : > { %v2094_v14 = vpop.f32.mrf.mxu0 }
 0x461   : > { %v2095_v22 = vadd.f32 %v2094_v14, %v2017_v9  ;;  %v2633_v9 = vld [vmem:[#allocation13 + $0x40] sm:$0xff]  ;;  %v2647_v14 = vld [vmem:[#allocation13 + $0xb0] sm:$0xff] }
 0x463   : > { %v2021_v11 = vpop.f32.mrf.mxu1 }
 0x464   : > { %v2098_v10 = vpop.f32.mrf.mxu0 }
 0x465   : > { %v2023_v16 = vpop.f32.mrf.mxu1  ;;  %v2099_v49 = vadd.f32 %v2098_v10, %v2021_v11  ;;  %v2632_v11 = vld [vmem:[#allocation13 + $0x38] sm:$0xff]  ;;  %v2646_v10 = vld [vmem:[#allocation13 + $0xa8] sm:$0xff] }
 0x466   : > { %v2100_v17 = vpop.f32.mrf.mxu0 }
 0x467   : > { %v2101_v25 = vadd.f32 %v2100_v17, %v2023_v16  ;;  %v2631_v16 = vld [vmem:[#allocation13 + $0x30] sm:$0xff]  ;;  %v2645_v17 = vld [vmem:[#allocation13 + $0xa0] sm:$0xff] }
 0x480   : > { %v2204_v15 = vpop.f32.mrf.mxu1 }
 0x481   : > { %v2320_v19 = vpop.f32.mrf.mxu0  ;;  %v2215_v28 = vadd.f32 %v2204_v15, %v2093_v23  ;;  %v2630_v15 = vld [vmem:[#allocation13 + $0x28] sm:$0xff]  ;;  %v2731_v23 = vld [vmem:[#allocation13 + $0x118] sm:$0xff] }
 0x482   : > { %v2206_v18 = vpop.f32.mrf.mxu1 }
 0x483   : > { %v2322_v0 = vpop.f32.mrf.mxu0  ;;  %v2216_v26 = vadd.f32 %v2206_v18, %v2095_v22  ;;  %v2331_v36 = vadd.f32 %v2320_v19, %v2215_v28  ;;  %v2748_v18 = vld [vmem:[#allocation13 + $0x1a0] sm:$0xff]  ;;  %v2747_v22 = vld [vmem:[#allocation13 + $0x198] sm:$0xff]  ;;  %v2642_v28 = vld [vmem:[#allocation13 + $0x88] sm:$0xff] }
 0x484   : > { %4929 = vmatprep.subr.mxu1 %v2748_v18  ;;  %v2629_v19 = vld [vmem:[#allocation13 + $0x20] sm:$0xff] }
 0x485   : > { %v2210_v21 = vpop.f32.mrf.mxu1  ;;  %v2326_v29 = vpop.f32.mrf.mxu0  ;;  %v2332_v34 = vadd.f32 %v2322_v0, %v2216_v26  ;;  %v2644_v0 = vld [vmem:[#allocation13 + $0x98] sm:$0xff]  ;;  %v2627_v26 = vld [vmem:[#allocation13 + $0x10] sm:$0xff] }
 0x486   : > { %v2217_v1 = vadd.f32 %v2210_v21, %v2099_v49  ;;  %v2732_v21 = vld [vmem:[#allocation13 + $0x120] sm:$0xff]  ;;  %v2628_v49 = vld [vmem:[#allocation13 + $0x18] sm:$0xff] }
 0x487   : > { %v2212_v24 = vpop.f32.mrf.mxu1  ;;  %v2328_v32 = vpop.f32.mrf.mxu0  ;;  %4930 = vmatpush3.msra.mxu1 %v2732_v21  ;;  %v3115_v21 = vld [vmem:[#allocation14 + $0x1f8] sm:$0xff] }
 0x488   : > { %v2218_v31 = vadd.f32 %v2212_v24, %v2101_v25  ;;  %v2333_v20 = vadd.f32 %v2326_v29, %v2217_v1  ;;  %4931 = vmatprep.subr.mxu1 %v2747_v22  ;;  %v2643_v24 = vld [vmem:[#allocation13 + $0x90] sm:$0xff]  ;;  %v2745_v29 = vld [vmem:[#allocation13 + $0x188] sm:$0xff] }
 0x489   : > { %4932 = vmatpush3.msra.mxu1 %v2731_v23  ;;  %v2746_v25 = vld [vmem:[#allocation13 + $0x190] sm:$0xff] }
 0x48a   : > { %v2334_v27 = vadd.f32 %v2328_v32, %v2218_v31  ;;  %4933 = vmatprep.subr.mxu1 %v2746_v25  ;;  %v2730_v1 = vld [vmem:[#allocation13 + $0x110] sm:$0xff]  ;;  %v2729_v31 = vld [vmem:[#allocation13 + $0x108] sm:$0xff] }
 0x48b   : > { %4934 = vmatpush3.msra.mxu1 %v2730_v1  ;;  %v3114_v23 = vld [vmem:[#allocation14 + $0x1f0] sm:$0xff]  ;;  %v3113_v25 = vld [vmem:[#allocation14 + $0x1e8] sm:$0xff]  ;;  %v3112_v1 = vld [vmem:[#allocation14 + $0x1e0] sm:$0xff] }
 0x48c   : > { %4935 = vmatprep.subr.mxu1 %v2745_v29  ;;  %v3111_v29 = vld [vmem:[#allocation14 + $0x1d8] sm:$0xff] }
 0x48d   : > { %4936 = vmatpush3.msra.mxu1 %v2729_v31  ;;  %v3110_v31 = vld [vmem:[#allocation14 + $0x1d0] sm:$0xff] }
 0x4a2   : > { %v2436_v30 = vpop.f32.mrf.mxu1 }
 0x4a3   : > { %v2447_v38 = vadd.f32 %v2436_v30, %v2331_v36  ;;  %v2626_v30 = vld [vmem:[#allocation13 + $0x8] sm:$0xff] }
 0x4a4   : > { %v2438_v33 = vpop.f32.mrf.mxu1 }
 0x4a5   : > { %v2448_v13 = vadd.f32 %v2438_v33, %v2332_v34  ;;  %v2463_v50 = vadd.f32 %v2456_v42, %v2447_v38  ;;  %v2641_v33 = vld [vmem:[#allocation13 + $0x80] sm:$0xff]  ;;  %v2850_v38 = vld [vmem:[#allocation14 + $0x78] sm:$0xff] }
 0x4a6   : > { %v2442_v37 = vpop.f32.mrf.mxu1  ;;  %v2744_v34 = vld [vmem:[#allocation13 + $0x180] sm:$0xff] }
 0x4a7   : > { %v2449_v40 = vadd.f32 %v2442_v37, %v2333_v20  ;;  %v2464_v46 = vadd.f32 %v2460_v39, %v2448_v13  ;;  %v2467_v54 = vmax.f32 %v2463_v50, 0.0  ;;  %v2625_v20 = vld [vmem:[#allocation13] sm:$0xff]  ;;  %4937 = vmatprep.subr.mxu1 %v2744_v34  ;;  %v2864_v50 = vld [vmem:[#allocation14 + $0xd8] sm:$0xff]  ;;  %v3109_v34 = vld [vmem:[#allocation14 + $0x1c8] sm:$0xff] }
 0x4a8   : > { %v2444_v43 = vpop.f32.mrf.mxu1  ;;  %4938 = vmatpush3.msra.mxu1 %v2728_v35  ;;  %v3108_v35 = vld [vmem:[#allocation14 + $0x1c0] sm:$0xff] }
 0x4a9   : > { %v2450_v44 = vadd.f32 %v2444_v43, %v2334_v27  ;;  %v2465_v45 = vadd.f32 %v2456_v42, %v2449_v40  ;;  %v2468_v53 = vmax.f32 %v2464_v46, 0.0  ;;  %5189 = vmatprep.subr.mxu1 %v7167_v47  ;;  %v2868_v40 = vld [vmem:[#allocation14 + $0xf8] sm:$0xff]  ;;  %v2867_v42 = vld [vmem:[#allocation14 + $0xf0] sm:$0xff]  ;;  %v2865_v46 = vld [vmem:[#allocation14 + $0xe0] sm:$0xff] }
 0x4aa   : > { %v2849_v43 = vld [vmem:[#allocation14 + $0x70] sm:$0xff] }
 0x4ab   : > { %v2466_v48 = vadd.f32 %v2460_v39, %v2450_v44  ;;  %v2469_v52 = vmax.f32 %v2465_v45, 0.0  ;;  %v2866_v44 = vld [vmem:[#allocation14 + $0xe8] sm:$0xff] }
 0x4ac   : > { %v2848_v45 = vld [vmem:[#allocation14 + $0x68] sm:$0xff] }
 0x4ad   : > { %v2470_v51 = vmax.f32 %v2466_v48, 0.0  ;;  %v2847_v48 = vld [vmem:[#allocation14 + $0x60] sm:$0xff] }
 0x4af   : > { %2504 = vmatprep.subr.mxu0 %v2470_v51 }
 0x4b0   : > { %2505 = vmatpush1.msra.mxu0 %v2469_v52 }
 0x4b1   : > { %2506 = vmatprep.subr.mxu0 %v2468_v53 }
 0x4b2   : > { %2507 = vmatpush1.msra.mxu0 %v2467_v54 }
 0x4b3   : > { %4735 = vmatmul.mubr.msk.f32.vlgmr.msra.gmra.mxu0 %vm2472_vm1, %v2471_v5  ;;  %2580 = vmatprep.subr.mxu0 %v2470_v51  ;;  %v2846_v51 = vld [vmem:[#allocation14 + $0x58] sm:$0xff]  ;;  %v2844_v5 = vld [vmem:[#allocation14 + $0x48] sm:$0xff] }
 0x4b4   : > { %2581 = vmatpush1.msra.mxu0 %v2469_v52  ;;  %2616 = vmatprep.mubr.f32.mxu0 %v7167_v47  ;;  %v2863_v52 = vld [vmem:[#allocation14 + $0xd0] sm:$0xff] }
 0x4b5   : > { %2582 = vmatprep.subr.mxu0 %v2468_v53  ;;  %v2845_v53 = vld [vmem:[#allocation14 + $0x50] sm:$0xff] }
 0x4b6   : > { %2583 = vmatpush1.msra.mxu0 %v2467_v54  ;;  %v2862_v54 = vld [vmem:[#allocation14 + $0xc8] sm:$0xff] }
 0x4b7   : > { %4737 = vmatmul.mubr.msk.f32.vlgmr.msra.gmra.mxu0 %vm2472_vm1, %v4736_v62  ;;  %4872 = vmatprep.subr.mxu0 %v2656_v55  ;;  %v2861_v62 = vld [vmem:[#allocation14 + $0xc0] sm:$0xff] }
 0x4b8   : > { %4873 = vmatpush3.msra.mxu0 %v2640_v41  ;;  %v2843_v55 = vld [vmem:[#allocation14 + $0x40] sm:$0xff]  ;;  %v2860_v41 = vld [vmem:[#allocation14 + $0xb8] sm:$0xff] }
 0x4b9   : > { %4874 = vmatprep.subr.mxu0 %v2655_v56  ;;  %v2842_v56 = vld [vmem:[#allocation14 + $0x38] sm:$0xff] }
 0x4ba   : > { %4875 = vmatpush3.msra.mxu0 %v2639_v57  ;;  %v2859_v57 = vld [vmem:[#allocation14 + $0xb0] sm:$0xff] }
 0x4bb   : > { %4876 = vmatprep.subr.mxu0 %v2654_v58  ;;  %v2841_v58 = vld [vmem:[#allocation14 + $0x30] sm:$0xff] }
 0x4bc   : > { %4877 = vmatpush3.msra.mxu0 %v2638_v59  ;;  %v2858_v59 = vld [vmem:[#allocation14 + $0xa8] sm:$0xff] }
 0x4bd   : > { %4878 = vmatprep.subr.mxu0 %v2653_v60  ;;  %v2840_v60 = vld [vmem:[#allocation14 + $0x28] sm:$0xff] }
 0x4be   : > { %4879 = vmatpush3.msra.mxu0 %v2637_v61  ;;  %v2857_v61 = vld [vmem:[#allocation14 + $0xa0] sm:$0xff] }
 0x4bf   : > { %4880 = vmatprep.subr.mxu0 %v2652_v63  ;;  %v2839_v63 = vld [vmem:[#allocation14 + $0x20] sm:$0xff] }
 0x4c0   : > { %4881 = vmatpush3.msra.mxu0 %v2636_v2  ;;  %v2856_v2 = vld [vmem:[#allocation14 + $0x98] sm:$0xff] }
 0x4c1   : > { %4882 = vmatprep.subr.mxu0 %v2651_v3  ;;  %v2838_v3 = vld [vmem:[#allocation14 + $0x18] sm:$0xff] }
 0x4c2   : > { %4883 = vmatpush3.msra.mxu0 %v2635_v4  ;;  %v2855_v4 = vld [vmem:[#allocation14 + $0x90] sm:$0xff] }
 0x4c3   : > { %4884 = vmatprep.subr.mxu0 %v2650_v6  ;;  %v2837_v6 = vld [vmem:[#allocation14 + $0x10] sm:$0xff] }
 0x4c4   : > { %4885 = vmatpush3.msra.mxu0 %v2634_v7  ;;  %v2854_v7 = vld [vmem:[#allocation14 + $0x88] sm:$0xff] }
 0x4c5   : > { %4886 = vmatprep.subr.mxu0 %v2649_v8  ;;  %v2836_v8 = vld [vmem:[#allocation14 + $0x8] sm:$0xff] }
 0x4c6   : > { %4887 = vmatpush3.msra.mxu0 %v2633_v9  ;;  %v2853_v9 = vld [vmem:[#allocation14 + $0x80] sm:$0xff] }
 0x4c7   : > { %4888 = vmatprep.subr.mxu0 %v2648_v12  ;;  %v2835_v12 = vld [vmem:[#allocation14] sm:$0xff] }
 0x4c8   : > { %4889 = vmatpush3.msra.mxu0 %v2632_v11 }
 0x4c9   : > { %4890 = vmatprep.subr.mxu0 %v2647_v14 }
 0x4ca   : > { %4891 = vmatpush3.msra.mxu0 %v2631_v16 }
 0x4cb   : > { %4892 = vmatprep.subr.mxu0 %v2646_v10 }
 0x4cc   : > { %4893 = vmatpush3.msra.mxu0 %v2630_v15 }
 0x4cd   : > { %4894 = vmatprep.subr.mxu0 %v2645_v17 }
 0x4ce   : > { %4895 = vmatpush3.msra.mxu0 %v2629_v19  ;;  %v3026_v19 = vld [vmem:[#allocation14 + $0x178] sm:$0xff] }
 0x4cf   : > { %4896 = vmatprep.subr.mxu0 %v2644_v0 }
 0x4d0   : > { %4897 = vmatpush3.msra.mxu0 %v2628_v49  ;;  %v3025_v49 = vld [vmem:[#allocation14 + $0x170] sm:$0xff] }
 0x4d1   : > { %4898 = vmatprep.subr.mxu0 %v2643_v24  ;;  %v3024_v24 = vld [vmem:[#allocation14 + $0x168] sm:$0xff] }
 0x4d2   : > { %4899 = vmatpush3.msra.mxu0 %v2627_v26  ;;  %v3023_v26 = vld [vmem:[#allocation14 + $0x160] sm:$0xff] }
 0x4d3   : > { %4900 = vmatprep.subr.mxu0 %v2642_v28  ;;  %v3022_v28 = vld [vmem:[#allocation14 + $0x158] sm:$0xff] }
 0x4d4   : > { %4901 = vmatpush3.msra.mxu0 %v2626_v30  ;;  %v3021_v30 = vld [vmem:[#allocation14 + $0x150] sm:$0xff] }
 0x4d5   : > { %4902 = vmatprep.subr.mxu0 %v2641_v33  ;;  %v3020_v33 = vld [vmem:[#allocation14 + $0x148] sm:$0xff] }
 0x4d6   : > { %4903 = vmatpush3.msra.mxu0 %v2625_v20  ;;  %v3019_v20 = vld [vmem:[#allocation14 + $0x140] sm:$0xff] }
 0x4d7   : > { %5154 = vmatprep.subr.mxu0 %v7167_v47 }
 0x573   : > { %v2542_v36 = vpop.f32.mrf.mxu0 }
 0x575   : > { %v2544_v32 = vpop.f32.mrf.mxu0 }
 0x577   : > { %v2618_v37 = vpop.f32.mrf.mxu0 }
 0x578   : > { %v2623_v39 = vmax.f32 %v2542_v36, %v2618_v37  ;;  %v3018_v36 = vld [vmem:[#allocation14 + $0x138] sm:$0xff]  ;;  %v3017_v37 = vld [vmem:[#allocation14 + $0x130] sm:$0xff] }
 0x579   : > { %v2620_v27 = vpop.f32.mrf.mxu0 }
 0x57a   : > { %v2624_v13 = vmax.f32 %v2544_v32, %v2620_v27  ;;  %v3107_v32 = vld [vmem:[#allocation14 + $0x1b8] sm:$0xff]  ;;  %v3106_v27 = vld [vmem:[#allocation14 + $0x1b0] sm:$0xff] }
 0x57c   : > { %2721 = vmatprep.mubr.f32.mxu0 %v2624_v13  ;;  %2824 = vmatprep.mubr.f32.mxu1 %v2624_v13  ;;  %v3016_v13 = vld [vmem:[#allocation14 + $0x128] sm:$0xff] }
 0x57d   : > { %2722 = vmatmul.mubr.f32.vlgmr.msra.gmra.mxu0 %v2623_v39  ;;  %2825 = vmatmul.mubr.f32.vlgmr.msra.gmra.mxu1 %v2623_v39  ;;  %v3105_v39 = vld [vmem:[#allocation14 + $0x1a8] sm:$0xff] }
 0x57e   : > { %5155 = vmatpush3.msra.mxu0 %v2868_v40  ;;  %5190 = vmatpush3.msra.mxu1 %v2850_v38  ;;  %v3015_v40 = vld [vmem:[#allocation14 + $0x120] sm:$0xff] }
 0x57f   : > { %5156 = vmatprep.subr.mxu0 %v7167_v47  ;;  %5191 = vmatprep.subr.mxu1 %v7167_v47  ;;  %v3104_v38 = vld [vmem:[#allocation14 + $0x1a0] sm:$0xff] }
 0x580   : > { %5157 = vmatpush3.msra.mxu0 %v2867_v42  ;;  %5192 = vmatpush3.msra.mxu1 %v2849_v43  ;;  %v3014_v42 = vld [vmem:[#allocation14 + $0x118] sm:$0xff] }
 0x581   : > { %5158 = vmatprep.subr.mxu0 %v7167_v47  ;;  %5193 = vmatprep.subr.mxu1 %v7167_v47  ;;  %v3103_v43 = vld [vmem:[#allocation14 + $0x198] sm:$0xff] }
 0x582   : > { %5159 = vmatpush3.msra.mxu0 %v2866_v44  ;;  %5194 = vmatpush3.msra.mxu1 %v2848_v45  ;;  %v3013_v44 = vld [vmem:[#allocation14 + $0x110] sm:$0xff] }
 0x583   : > { %5160 = vmatprep.subr.mxu0 %v7167_v47  ;;  %5195 = vmatprep.subr.mxu1 %v7167_v47  ;;  %v3102_v45 = vld [vmem:[#allocation14 + $0x190] sm:$0xff] }
 0x584   : > { %5161 = vmatpush3.msra.mxu0 %v2865_v46  ;;  %5196 = vmatpush3.msra.mxu1 %v2847_v48  ;;  %v3012_v46 = vld [vmem:[#allocation14 + $0x108] sm:$0xff] }
 0x585   : > { %5162 = vmatprep.subr.mxu0 %v7167_v47  ;;  %5197 = vmatprep.subr.mxu1 %v7167_v47  ;;  %v3101_v48 = vld [vmem:[#allocation14 + $0x188] sm:$0xff] }
 0x586   : > { %5163 = vmatpush3.msra.mxu0 %v2864_v50  ;;  %5198 = vmatpush3.msra.mxu1 %v2846_v51  ;;  %v3011_v50 = vld [vmem:[#allocation14 + $0x100] sm:$0xff] }
 0x587   : > { %5164 = vmatprep.subr.mxu0 %v7167_v47  ;;  %5199 = vmatprep.subr.mxu1 %v7167_v47  ;;  %v3100_v51 = vld [vmem:[#allocation14 + $0x180] sm:$0xff] }
 0x588   : > { %5165 = vmatpush3.msra.mxu0 %v2863_v52  ;;  %5200 = vmatpush3.msra.mxu1 %v2845_v53  ;;  %v3204_v53 = vld [vmem:[#allocation14 + $0x278] sm:$0xff] }
 0x589   : > { %5166 = vmatprep.subr.mxu0 %v7167_v47  ;;  %5201 = vmatprep.subr.mxu1 %v7167_v47 }
 0x58a   : > { %5167 = vmatpush3.msra.mxu0 %v2862_v54  ;;  %5202 = vmatpush3.msra.mxu1 %v2844_v5  ;;  %v3293_v54 = vld [vmem:[#allocation14 + $0x2f8] sm:$0xff]  ;;  %v3203_v5 = vld [vmem:[#allocation14 + $0x270] sm:$0xff] }
 0x58b   : > { %5168 = vmatprep.subr.mxu0 %v7167_v47  ;;  %5203 = vmatprep.subr.mxu1 %v7167_v47 }
 0x58c   : > { %5169 = vmatpush3.msra.mxu0 %v2861_v62  ;;  %5204 = vmatpush3.msra.mxu1 %v2843_v55  ;;  %v3292_v62 = vld [vmem:[#allocation14 + $0x2f0] sm:$0xff]  ;;  %v3202_v55 = vld [vmem:[#allocation14 + $0x268] sm:$0xff] }
 0x58d   : > { %5170 = vmatprep.subr.mxu0 %v7167_v47  ;;  %5205 = vmatprep.subr.mxu1 %v7167_v47 }
 0x58e   : > { %5171 = vmatpush3.msra.mxu0 %v2860_v41  ;;  %5206 = vmatpush3.msra.mxu1 %v2842_v56  ;;  %v3291_v41 = vld [vmem:[#allocation14 + $0x2e8] sm:$0xff]  ;;  %v3201_v56 = vld [vmem:[#allocation14 + $0x260] sm:$0xff] }
 0x58f   : > { %5172 = vmatprep.subr.mxu0 %v7167_v47  ;;  %5207 = vmatprep.subr.mxu1 %v7167_v47 }
 0x590   : > { %5173 = vmatpush3.msra.mxu0 %v2859_v57  ;;  %5208 = vmatpush3.msra.mxu1 %v2841_v58  ;;  %v3290_v57 = vld [vmem:[#allocation14 + $0x2e0] sm:$0xff]  ;;  %v3200_v58 = vld [vmem:[#allocation14 + $0x258] sm:$0xff] }
 0x591   : > { %5174 = vmatprep.subr.mxu0 %v7167_v47  ;;  %5209 = vmatprep.subr.mxu1 %v7167_v47 }
 0x592   : > { %5175 = vmatpush3.msra.mxu0 %v2858_v59  ;;  %5210 = vmatpush3.msra.mxu1 %v2840_v60  ;;  %v3289_v59 = vld [vmem:[#allocation14 + $0x2d8] sm:$0xff]  ;;  %v3199_v60 = vld [vmem:[#allocation14 + $0x250] sm:$0xff] }
 0x593   : > { %5176 = vmatprep.subr.mxu0 %v7167_v47  ;;  %5211 = vmatprep.subr.mxu1 %v7167_v47 }
 0x594   : > { %5177 = vmatpush3.msra.mxu0 %v2857_v61  ;;  %5212 = vmatpush3.msra.mxu1 %v2839_v63  ;;  %v3288_v61 = vld [vmem:[#allocation14 + $0x2d0] sm:$0xff]  ;;  %v3198_v63 = vld [vmem:[#allocation14 + $0x248] sm:$0xff] }
 0x595   : > { %5178 = vmatprep.subr.mxu0 %v7167_v47  ;;  %5213 = vmatprep.subr.mxu1 %v7167_v47 }
 0x596   : > { %5179 = vmatpush3.msra.mxu0 %v2856_v2  ;;  %5214 = vmatpush3.msra.mxu1 %v2838_v3  ;;  %v3287_v2 = vld [vmem:[#allocation14 + $0x2c8] sm:$0xff]  ;;  %v3197_v3 = vld [vmem:[#allocation14 + $0x240] sm:$0xff] }
 0x597   : > { %5180 = vmatprep.subr.mxu0 %v7167_v47  ;;  %5215 = vmatprep.subr.mxu1 %v7167_v47 }
 0x598   : > { %5181 = vmatpush3.msra.mxu0 %v2855_v4  ;;  %5216 = vmatpush3.msra.mxu1 %v2837_v6  ;;  %v3286_v4 = vld [vmem:[#allocation14 + $0x2c0] sm:$0xff]  ;;  %v3196_v6 = vld [vmem:[#allocation14 + $0x238] sm:$0xff] }
 0x599   : > { %5182 = vmatprep.subr.mxu0 %v7167_v47  ;;  %5217 = vmatprep.subr.mxu1 %v7167_v47 }
 0x59a   : > { %5183 = vmatpush3.msra.mxu0 %v2854_v7  ;;  %5218 = vmatpush3.msra.mxu1 %v2836_v8  ;;  %v3285_v7 = vld [vmem:[#allocation14 + $0x2b8] sm:$0xff]  ;;  %v3195_v8 = vld [vmem:[#allocation14 + $0x230] sm:$0xff] }
 0x59b   : > { %5184 = vmatprep.subr.mxu0 %v7167_v47  ;;  %5219 = vmatprep.subr.mxu1 %v7167_v47 }
 0x59c   : > { %5185 = vmatpush3.msra.mxu0 %v2853_v9  ;;  %5220 = vmatpush3.msra.mxu1 %v2835_v12  ;;  %v3284_v9 = vld [vmem:[#allocation14 + $0x2b0] sm:$0xff]  ;;  %v3194_v12 = vld [vmem:[#allocation14 + $0x228] sm:$0xff] }
 0x59d   : > { %5186 = vmatprep.mubr.msk.f32.mxu0 %vm6105_vm2, %v7167_v47  ;;  %5221 = vmatprep.mubr.msk.f32.mxu1 %vm6105_vm2, %v7167_v47 }
 0x59e   : > { %5224 = vmatprep.subr.mxu0 %v7167_v47  ;;  %5259 = vmatprep.subr.mxu1 %v7167_v47 }
 0x63d   : > { %v4904_v11 = vpop.f32.mrf.mxu0  ;;  %v4939_v14 = vpop.f32.mrf.mxu1 }
 0x63f   : > { %v4905_v16 = vpop.f32.mrf.mxu0  ;;  %v4940_v10 = vpop.f32.mrf.mxu1 }
 0x640   : > { %v4906_v15 = vadd.f32 %v4905_v16, %v4904_v11  ;;  %v4941_v17 = vadd.f32 %v4940_v10, %v4939_v14  ;;  %v3283_v11 = vld [vmem:[#allocation14 + $0x2a8] sm:$0xff]  ;;  %v3193_v14 = vld [vmem:[#allocation14 + $0x220] sm:$0xff]  ;;  %v3192_v10 = vld [vmem:[#allocation14 + $0x218] sm:$0xff] }
 0x641   : > { %v3282_v16 = vld [vmem:[#allocation14 + $0x2a0] sm:$0xff] }
 0x642   : > { %v7211_v18 = vmax.f32 %v4906_v15, %v4941_v17  ;;  %v3281_v15 = vld [vmem:[#allocation14 + $0x298] sm:$0xff]  ;;  %v3191_v17 = vld [vmem:[#allocation14 + $0x210] sm:$0xff] }
 0x644   : > { %2833 = vst [vmem:[#allocation4 + $0x3] sm:$0xff] %v7211_v18 }
 0x64b   : > { %v2851_v0 = vld [vmem:[#allocation4 + $0x1] sm:$0xff] }
 0x64c   : > { %v2834_v22 = vld [vmem:[#allocation4] sm:$0xff]  ;;  %5187 = vmatmul.mubr.f32.vlgmr.msra.gmra.mxu0 %v2851_v0  ;;  %v3189_v0 = vld [vmem:[#allocation14 + $0x200] sm:$0xff] }
 0x64d   : > { %5222 = vmatmul.mubr.f32.vlgmr.msra.gmra.mxu1 %v2834_v22  ;;  %5225 = vmatpush3.msra.mxu0 %v3026_v19  ;;  %v3009_v52 = vld [vmem:[#allocation4 + $0x2] sm:$0xff]  ;;  %v3278_v22 = vld [vmem:[#allocation14 + $0x280] sm:$0xff] }
 0x64e   : > { %5260 = vmatpush3.msra.mxu1 %v3115_v21  ;;  %5226 = vmatprep.subr.mxu0 %v7167_v47  ;;  %v3190_v19 = vld [vmem:[#allocation14 + $0x208] sm:$0xff] }
 0x64f   : > { %5261 = vmatprep.subr.mxu1 %v7167_v47  ;;  %5227 = vmatpush3.msra.mxu0 %v3025_v49  ;;  %v3279_v21 = vld [vmem:[#allocation14 + $0x288] sm:$0xff]  ;;  %v3187_v49 = vld [vmem:[#allocation4 + $0x4] sm:$0xff] }
 0x650   : > { %5262 = vmatpush3.msra.mxu1 %v3114_v23  ;;  %5228 = vmatprep.subr.mxu0 %v7167_v47  ;;  %v3276_v23 = vld [vmem:[#allocation4 + $0x5] sm:$0xff] }
 0x651   : > { %5263 = vmatprep.subr.mxu1 %v7167_v47  ;;  %5229 = vmatpush3.msra.mxu0 %v3024_v24  ;;  %v3382_v24 = vld [vmem:[#allocation14 + $0x378] sm:$0xff] }
 0x652   : > { %5264 = vmatpush3.msra.mxu1 %v3113_v25  ;;  %5230 = vmatprep.subr.mxu0 %v7167_v47  ;;  %v3381_v25 = vld [vmem:[#allocation14 + $0x370] sm:$0xff] }
 0x653   : > { %5265 = vmatprep.subr.mxu1 %v7167_v47  ;;  %5231 = vmatpush3.msra.mxu0 %v3023_v26  ;;  %v3380_v26 = vld [vmem:[#allocation14 + $0x368] sm:$0xff] }
 0x654   : > { %5266 = vmatpush3.msra.mxu1 %v3112_v1  ;;  %5232 = vmatprep.subr.mxu0 %v7167_v47  ;;  %v3379_v1 = vld [vmem:[#allocation14 + $0x360] sm:$0xff] }
 0x655   : > { %5267 = vmatprep.subr.mxu1 %v7167_v47  ;;  %5233 = vmatpush3.msra.mxu0 %v3022_v28  ;;  %v3378_v28 = vld [vmem:[#allocation14 + $0x358] sm:$0xff] }
 0x656   : > { %5268 = vmatpush3.msra.mxu1 %v3111_v29  ;;  %5234 = vmatprep.subr.mxu0 %v7167_v47  ;;  %v3377_v29 = vld [vmem:[#allocation14 + $0x350] sm:$0xff] }
 0x657   : > { %5269 = vmatprep.subr.mxu1 %v7167_v47  ;;  %5235 = vmatpush3.msra.mxu0 %v3021_v30  ;;  %v3376_v30 = vld [vmem:[#allocation14 + $0x348] sm:$0xff] }
 0x658   : > { %5270 = vmatpush3.msra.mxu1 %v3110_v31  ;;  %5236 = vmatprep.subr.mxu0 %v7167_v47  ;;  %v3375_v31 = vld [vmem:[#allocation14 + $0x340] sm:$0xff] }
 0x659   : > { %5271 = vmatprep.subr.mxu1 %v7167_v47  ;;  %5237 = vmatpush3.msra.mxu0 %v3020_v33  ;;  %v3374_v33 = vld [vmem:[#allocation14 + $0x338] sm:$0xff] }
 0x65a   : > { %5272 = vmatpush3.msra.mxu1 %v3109_v34  ;;  %5238 = vmatprep.subr.mxu0 %v7167_v47  ;;  %v3373_v34 = vld [vmem:[#allocation14 + $0x330] sm:$0xff] }
 0x65b   : > { %5273 = vmatprep.subr.mxu1 %v7167_v47  ;;  %5239 = vmatpush3.msra.mxu0 %v3019_v20  ;;  %v3372_v20 = vld [vmem:[#allocation14 + $0x328] sm:$0xff] }
 0x65c   : > { %5274 = vmatpush3.msra.mxu1 %v3108_v35  ;;  %5240 = vmatprep.subr.mxu0 %v7167_v47  ;;  %v3371_v35 = vld [vmem:[#allocation14 + $0x320] sm:$0xff] }
 0x65d   : > { %5275 = vmatprep.subr.mxu1 %v7167_v47  ;;  %5241 = vmatpush3.msra.mxu0 %v3018_v36  ;;  %v3370_v36 = vld [vmem:[#allocation14 + $0x318] sm:$0xff] }
 0x65e   : > { %5276 = vmatpush3.msra.mxu1 %v3107_v32  ;;  %5242 = vmatprep.subr.mxu0 %v7167_v47  ;;  %v3369_v32 = vld [vmem:[#allocation14 + $0x310] sm:$0xff] }
 0x65f   : > { %5277 = vmatprep.subr.mxu1 %v7167_v47  ;;  %5243 = vmatpush3.msra.mxu0 %v3017_v37  ;;  %v3368_v37 = vld [vmem:[#allocation14 + $0x308] sm:$0xff] }
 0x660   : > { %5278 = vmatpush3.msra.mxu1 %v3106_v27  ;;  %5244 = vmatprep.subr.mxu0 %v7167_v47  ;;  %v3367_v27 = vld [vmem:[#allocation14 + $0x300] sm:$0xff] }
 0x661   : > { %5279 = vmatprep.subr.mxu1 %v7167_v47  ;;  %5245 = vmatpush3.msra.mxu0 %v3016_v13  ;;  %v3365_v13 = vld [vmem:[#allocation4 + $0x6] sm:$0xff] }
 0x662   : > { %5280 = vmatpush3.msra.mxu1 %v3105_v39  ;;  %5246 = vmatprep.subr.mxu0 %v7167_v47  ;;  %v3629_v39 = vld [vmem:[%s7706_s12 + $0x78] sm:$0xff] }
 0x663   : > { %5281 = vmatprep.subr.mxu1 %v7167_v47  ;;  %5247 = vmatpush3.msra.mxu0 %v3015_v40  ;;  %v3628_v40 = vld [vmem:[%s7706_s12 + $0x70] sm:$0xff] }
 0x664   : > { %5282 = vmatpush3.msra.mxu1 %v3104_v38  ;;  %5248 = vmatprep.subr.mxu0 %v7167_v47  ;;  %v3627_v38 = vld [vmem:[%s7706_s12 + $0x68] sm:$0xff] }
 0x665   : > { %5283 = vmatprep.subr.mxu1 %v7167_v47  ;;  %5249 = vmatpush3.msra.mxu0 %v3014_v42  ;;  %v3626_v42 = vld [vmem:[%s7706_s12 + $0x60] sm:$0xff] }
 0x666   : > { %5284 = vmatpush3.msra.mxu1 %v3103_v43  ;;  %5250 = vmatprep.subr.mxu0 %v7167_v47  ;;  %v3625_v43 = vld [vmem:[%s7706_s12 + $0x58] sm:$0xff] }
 0x667   : > { %5285 = vmatprep.subr.mxu1 %v7167_v47  ;;  %5251 = vmatpush3.msra.mxu0 %v3013_v44  ;;  %v3624_v44 = vld [vmem:[%s7706_s12 + $0x50] sm:$0xff] }
 0x668   : > { %5286 = vmatpush3.msra.mxu1 %v3102_v45  ;;  %5252 = vmatprep.subr.mxu0 %v7167_v47  ;;  %v3623_v45 = vld [vmem:[%s7706_s12 + $0x48] sm:$0xff] }
 0x669   : > { %5287 = vmatprep.subr.mxu1 %v7167_v47  ;;  %5253 = vmatpush3.msra.mxu0 %v3012_v46  ;;  %v3622_v46 = vld [vmem:[%s7706_s12 + $0x40] sm:$0xff] }
 0x66a   : > { %5288 = vmatpush3.msra.mxu1 %v3101_v48  ;;  %5254 = vmatprep.subr.mxu0 %v7167_v47 }
 0x66b   : > { %5289 = vmatprep.subr.mxu1 %v7167_v47  ;;  %5255 = vmatpush3.msra.mxu0 %v3011_v50 }
 0x66c   : > { %5256 = vmatprep.mubr.msk.f32.mxu0 %vm6105_vm2, %v7167_v47  ;;  %5290 = vmatpush3.msra.mxu1 %v3100_v51  ;;  %v3621_v51 = vld [vmem:[%s7706_s12 + $0x38] sm:$0xff] }
 0x66d   : > { %5291 = vmatprep.mubr.msk.f32.mxu1 %vm6105_vm2, %v7167_v47  ;;  %5257 = vmatmul.mubr.f32.vlgmr.msra.gmra.mxu0 %v3009_v52 }
 0x66e   : > { %5292 = vmatmul.mubr.f32.vlgmr.msra.gmra.mxu1 %v7211_v18  ;;  %5294 = vmatprep.subr.mxu0 %v7167_v47  ;;  %v3280_v18 = vld [vmem:[#allocation14 + $0x290] sm:$0xff] }
 0x66f   : > { %5329 = vmatprep.subr.mxu1 %v7167_v47  ;;  %5295 = vmatpush3.msra.mxu0 %v3204_v53 }
 0x670   : > { %5330 = vmatpush3.msra.mxu1 %v3293_v54  ;;  %5296 = vmatprep.subr.mxu0 %v7167_v47 }
 0x671   : > { %5331 = vmatprep.subr.mxu1 %v7167_v47  ;;  %5297 = vmatpush3.msra.mxu0 %v3203_v5  ;;  %v3620_v5 = vld [vmem:[%s7706_s12 + $0x30] sm:$0xff] }
 0x672   : > { %5332 = vmatpush3.msra.mxu1 %v3292_v62  ;;  %5298 = vmatprep.subr.mxu0 %v7167_v47  ;;  %v3619_v62 = vld [vmem:[%s7706_s12 + $0x28] sm:$0xff] }
 0x673   : > { %5333 = vmatprep.subr.mxu1 %v7167_v47  ;;  %5299 = vmatpush3.msra.mxu0 %v3202_v55  ;;  %v3618_v55 = vld [vmem:[%s7706_s12 + $0x20] sm:$0xff] }
 0x674   : > { %5334 = vmatpush3.msra.mxu1 %v3291_v41  ;;  %5300 = vmatprep.subr.mxu0 %v7167_v47 }
 0x675   : > { %5335 = vmatprep.subr.mxu1 %v7167_v47  ;;  %5301 = vmatpush3.msra.mxu0 %v3201_v56 }
 0x676   : > { %5336 = vmatpush3.msra.mxu1 %v3290_v57  ;;  %5302 = vmatprep.subr.mxu0 %v7167_v47 }
 0x677   : > { %5337 = vmatprep.subr.mxu1 %v7167_v47  ;;  %5303 = vmatpush3.msra.mxu0 %v3200_v58 }
 0x678   : > { %5338 = vmatpush3.msra.mxu1 %v3289_v59  ;;  %5304 = vmatprep.subr.mxu0 %v7167_v47 }
 0x679   : > { %5339 = vmatprep.subr.mxu1 %v7167_v47  ;;  %5305 = vmatpush3.msra.mxu0 %v3199_v60 }
 0x67a   : > { %5340 = vmatpush3.msra.mxu1 %v3288_v61  ;;  %5306 = vmatprep.subr.mxu0 %v7167_v47 }
 0x67b   : > { %5341 = vmatprep.subr.mxu1 %v7167_v47  ;;  %5307 = vmatpush3.msra.mxu0 %v3198_v63 }
 0x67c   : > { %5342 = vmatpush3.msra.mxu1 %v3287_v2  ;;  %5308 = vmatprep.subr.mxu0 %v7167_v47 }
 0x67d   : > { %5343 = vmatprep.subr.mxu1 %v7167_v47  ;;  %5309 = vmatpush3.msra.mxu0 %v3197_v3 }
 0x67e   : > { %5344 = vmatpush3.msra.mxu1 %v3286_v4  ;;  %5310 = vmatprep.subr.mxu0 %v7167_v47 }
 0x67f   : > { %5345 = vmatprep.subr.mxu1 %v7167_v47  ;;  %5311 = vmatpush3.msra.mxu0 %v3196_v6 }
 0x680   : > { %5346 = vmatpush3.msra.mxu1 %v3285_v7  ;;  %5312 = vmatprep.subr.mxu0 %v7167_v47 }
 0x681   : > { %5347 = vmatprep.subr.mxu1 %v7167_v47  ;;  %5313 = vmatpush3.msra.mxu0 %v3195_v8  ;;  %v4738_v8 = vld [vmem:[%s7704_s10] ss:$0 sm:$0xff] }
 0x682   : > { %5348 = vmatpush3.msra.mxu1 %v3284_v9  ;;  %5314 = vmatprep.subr.mxu0 %v7167_v47 }
 0x683   : > { %5349 = vmatprep.subr.mxu1 %v7167_v47  ;;  %5315 = vmatpush3.msra.mxu0 %v3194_v12 }
 0x684   : > { %5350 = vmatpush3.msra.mxu1 %v3283_v11  ;;  %5316 = vmatprep.subr.mxu0 %v7167_v47 }
 0x685   : > { %5351 = vmatprep.subr.mxu1 %v7167_v47  ;;  %5317 = vmatpush3.msra.mxu0 %v3193_v14 }
 0x686   : > { %5352 = vmatpush3.msra.mxu1 %v3282_v16  ;;  %5318 = vmatprep.subr.mxu0 %v7167_v47  ;;  %v3463_v16 = vld [vmem:[%s7705_s11] sm:$0xf] }
 0x687   : > { %5353 = vmatprep.subr.mxu1 %v7167_v47  ;;  %5319 = vmatpush3.msra.mxu0 %v3192_v10  ;;  %v4740_v10 = vld [vmem:[%s7705_s11 + $0x4] sm:$0xf] }
 0x688   : > { %5354 = vmatpush3.msra.mxu1 %v3281_v15  ;;  %5320 = vmatprep.subr.mxu0 %v7167_v47  ;;  %v4757_v15 = vld [vmem:[%s7706_s12 + $0xf8] sm:$0xff] }
 0x689   : > { %5355 = vmatprep.subr.mxu1 %v7167_v47  ;;  %5321 = vmatpush3.msra.mxu0 %v3191_v17  ;;  %v4756_v17 = vld [vmem:[%s7706_s12 + $0xf0] sm:$0xff] }
 0x68a   : > { %5356 = vmatpush3.msra.mxu1 %v3280_v18  ;;  %5322 = vmatprep.subr.mxu0 %v7167_v47  ;;  %v4755_v18 = vld [vmem:[%s7706_s12 + $0xe8] sm:$0xff] }
 0x68b   : > { %5357 = vmatprep.subr.mxu1 %v7167_v47  ;;  %5323 = vmatpush3.msra.mxu0 %v3190_v19  ;;  %v4754_v19 = vld [vmem:[%s7706_s12 + $0xe0] sm:$0xff] }
 0x68c   : > { %5358 = vmatpush3.msra.mxu1 %v3279_v21  ;;  %5324 = vmatprep.subr.mxu0 %v7167_v47  ;;  %v4753_v21 = vld [vmem:[%s7706_s12 + $0xd8] sm:$0xff] }
 0x68d   : > { %5359 = vmatprep.subr.mxu1 %v7167_v47  ;;  %5325 = vmatpush3.msra.mxu0 %v3189_v0  ;;  %v4752_v0 = vld [vmem:[%s7706_s12 + $0xd0] sm:$0xff] }
 0x68e   : > { %5326 = vmatprep.mubr.msk.f32.mxu0 %vm6105_vm2, %v7167_v47  ;;  %5360 = vmatpush3.msra.mxu1 %v3278_v22  ;;  %v4751_v22 = vld [vmem:[%s7706_s12 + $0xc8] sm:$0xff] }
 0x68f   : > { %5361 = vmatprep.mubr.msk.f32.mxu1 %vm6105_vm2, %v7167_v47  ;;  %5327 = vmatmul.mubr.f32.vlgmr.msra.gmra.mxu0 %v3187_v49  ;;  %v4750_v49 = vld [vmem:[%s7706_s12 + $0xc0] sm:$0xff] }
 0x690   : > { %5362 = vmatmul.mubr.f32.vlgmr.msra.gmra.mxu1 %v3276_v23  ;;  %5364 = vmatprep.subr.mxu0 %v7167_v47  ;;  %v4749_v23 = vld [vmem:[%s7706_s12 + $0xb8] sm:$0xff] }
 0x691   : > { %5396 = vmatprep.mubr.msk.f32.mxu0 %vm6105_vm2, %v7167_v47  ;;  %5365 = vmatpush3.msra.mxu0 %v3382_v24  ;;  %v4748_v24 = vld [vmem:[%s7706_s12 + $0xb0] sm:$0xff] }
 0x692   : > { %5409 = vmatprep.subr.mxu1 %v7167_v47  ;;  %5366 = vmatprep.subr.mxu0 %v7167_v47 }
 0x693   : > { %5441 = vmatprep.mubr.msk.f32.mxu1 %vm6105_vm2, %v7167_v47  ;;  %5367 = vmatpush3.msra.mxu0 %v3381_v25  ;;  %v4747_v25 = vld [vmem:[%s7706_s12 + $0xa8] sm:$0xff] }
 0x694   : > { %5368 = vmatprep.subr.mxu0 %v7167_v47  ;;  %5410 = vmatpush3.msra.mxu1 %v3629_v39 }
 0x695   : > { %5369 = vmatpush3.msra.mxu0 %v3380_v26  ;;  %5411 = vmatprep.subr.mxu1 %v7167_v47  ;;  %v4746_v26 = vld [vmem:[%s7706_s12 + $0xa0] sm:$0xff] }
 0x696   : > { %5370 = vmatprep.subr.mxu0 %v7167_v47  ;;  %5412 = vmatpush3.msra.mxu1 %v3628_v40  ;;  %v3794_v40 = vld [vmem:[%s7707_s13 + $0x30] sm:$0xff] }
 0x697   : > { %5371 = vmatpush3.msra.mxu0 %v3379_v1  ;;  %5413 = vmatprep.subr.mxu1 %v7167_v47  ;;  %v3617_v1 = vld [vmem:[%s7706_s12 + $0x18] sm:$0xff] }
 0x698   : > { %5372 = vmatprep.subr.mxu0 %v7167_v47  ;;  %5414 = vmatpush3.msra.mxu1 %v3627_v38  ;;  %v4764_v38 = vld [vmem:[%s7707_s13 + $0x70] sm:$0xff] }
 0x699   : > { %5373 = vmatpush3.msra.mxu0 %v3378_v28  ;;  %5415 = vmatprep.subr.mxu1 %v7167_v47  ;;  %v4745_v28 = vld [vmem:[%s7706_s12 + $0x98] sm:$0xff] }
 0x69a   : > { %5374 = vmatprep.subr.mxu0 %v7167_v47  ;;  %5416 = vmatpush3.msra.mxu1 %v3626_v42  ;;  %v3793_v42 = vld [vmem:[%s7707_s13 + $0x28] sm:$0xff] }
 0x69b   : > { %5375 = vmatpush3.msra.mxu0 %v3377_v29  ;;  %5417 = vmatprep.subr.mxu1 %v7167_v47  ;;  %v3616_v29 = vld [vmem:[%s7706_s12 + $0x10] sm:$0xff] }
 0x69c   : > { %5376 = vmatprep.subr.mxu0 %v7167_v47  ;;  %5418 = vmatpush3.msra.mxu1 %v3625_v43  ;;  %v4763_v43 = vld [vmem:[%s7707_s13 + $0x68] sm:$0xff] }
 0x69d   : > { %5377 = vmatpush3.msra.mxu0 %v3376_v30  ;;  %5419 = vmatprep.subr.mxu1 %v7167_v47  ;;  %v4744_v30 = vld [vmem:[%s7706_s12 + $0x90] sm:$0xff] }
 0x69e   : > { %5378 = vmatprep.subr.mxu0 %v7167_v47  ;;  %5420 = vmatpush3.msra.mxu1 %v3624_v44  ;;  %v3792_v44 = vld [vmem:[%s7707_s13 + $0x20] sm:$0xff] }
 0x69f   : > { %5379 = vmatpush3.msra.mxu0 %v3375_v31  ;;  %5421 = vmatprep.subr.mxu1 %v7167_v47  ;;  %v3615_v31 = vld [vmem:[%s7706_s12 + $0x8] sm:$0xff] }
 0x6a0   : > { %5380 = vmatprep.subr.mxu0 %v7167_v47  ;;  %5422 = vmatpush3.msra.mxu1 %v3623_v45  ;;  %v4762_v45 = vld [vmem:[%s7707_s13 + $0x60] sm:$0xff] }
 0x6a1   : > { %5381 = vmatpush3.msra.mxu0 %v3374_v33  ;;  %5423 = vmatprep.subr.mxu1 %v7167_v47  ;;  %v4743_v33 = vld [vmem:[%s7706_s12 + $0x88] sm:$0xff] }
 0x6a2   : > { %5382 = vmatprep.subr.mxu0 %v7167_v47  ;;  %5424 = vmatpush3.msra.mxu1 %v3622_v46  ;;  %v3791_v46 = vld [vmem:[%s7707_s13 + $0x18] sm:$0xff] }
 0x6a3   : > { %5383 = vmatpush3.msra.mxu0 %v3373_v34  ;;  %5425 = vmatprep.subr.mxu1 %v7167_v47  ;;  %v3614_v34 = vld [vmem:[%s7706_s12] sm:$0xff] }
 0x6a4   : > { %5384 = vmatprep.subr.mxu0 %v7167_v47  ;;  %5426 = vmatpush3.msra.mxu1 %v3621_v51  ;;  %v4760_v51 = vld [vmem:[%s7707_s13 + $0x50] sm:$0xff] }
 0x6a5   : > { %5385 = vmatpush3.msra.mxu0 %v3372_v20  ;;  %5427 = vmatprep.subr.mxu1 %v7167_v47  ;;  %v4742_v20 = vld [vmem:[%s7706_s12 + $0x80] sm:$0xff] }
 0x6a6   : > { %5386 = vmatprep.subr.mxu0 %v7167_v47  ;;  %5428 = vmatpush3.msra.mxu1 %v3620_v5  ;;  %v4758_v5 = vld [vmem:[%s7707_s13 + $0x40] sm:$0xff] }
 0x6a7   : > { %5387 = vmatpush3.msra.mxu0 %v3371_v35  ;;  %5429 = vmatprep.subr.mxu1 %v7167_v47 }
 0x6a8   : > { %5388 = vmatprep.subr.mxu0 %v7167_v47  ;;  %5430 = vmatpush3.msra.mxu1 %v3619_v62 }
 0x6a9   : > { %5389 = vmatpush3.msra.mxu0 %v3370_v36  ;;  %5431 = vmatprep.subr.mxu1 %v7167_v47 }
 0x6aa   : > { %5390 = vmatprep.subr.mxu0 %v7167_v47  ;;  %5432 = vmatpush3.msra.mxu1 %v3618_v55 }
 0x6ab   : > { %5391 = vmatpush3.msra.mxu0 %v3369_v32  ;;  %5433 = vmatprep.subr.mxu1 %v7167_v47 }
 0x6ac   : > { %5392 = vmatprep.subr.mxu0 %v7167_v47  ;;  %5434 = vmatpush3.msra.mxu1 %v3617_v1 }
 0x6ad   : > { %5393 = vmatpush3.msra.mxu0 %v3368_v37  ;;  %5435 = vmatprep.subr.mxu1 %v7167_v47 }
 0x6ae   : > { %5394 = vmatprep.subr.mxu0 %v7167_v47  ;;  %5436 = vmatpush3.msra.mxu1 %v3616_v29 }
 0x6af   : > { %5395 = vmatpush3.msra.mxu0 %v3367_v27  ;;  %5437 = vmatprep.subr.mxu1 %v7167_v47  ;;  %v3795_v27 = vld [vmem:[%s7707_s13 + $0x38] sm:$0xff] }
 0x6b0   : > { %5397 = vmatmul.mubr.f32.vlgmr.msra.gmra.mxu0 %v3365_v13  ;;  %5399 = vmatprep.subr.mxu0 %v7167_v47  ;;  %v4765_v13 = vld [vmem:[%s7707_s13 + $0x78] sm:$0xff] }
 0x6b1   : > { %5401 = vmatprep.mubr.msk.f32.mxu0 %vm6105_vm2, %v7167_v47  ;;  %5438 = vmatpush3.msra.mxu1 %v3615_v31 }
 0x6b2   : > { %5439 = vmatprep.subr.mxu1 %v7167_v47 }
 0x6b3   : > { %5440 = vmatpush3.msra.mxu1 %v3614_v34  ;;  %v4118_v34 = vld [vmem:[#allocation16] sm:$0x1] }
 0x6b4   : > { %5479 = vmatprep.subr.mxu1 %v7167_v47 }
 0x70c   : > { %v2935_v48 = vpop.f32.mrf.mxu0 }
 0x70d   : > { %v3005_v50 = vpop.f32.mrf.mxu1 }
 0x70e   : > { %v3006_v52 = vadd.f32 %v3005_v50, %v2935_v48  ;;  %v5188_v53 = vpop.f32.mrf.mxu0  ;;  %v4761_v48 = vld [vmem:[%s7707_s13 + $0x58] sm:$0xff]  ;;  %v3790_v50 = vld [vmem:[%s7707_s13 + $0x10] sm:$0xff] }
 0x70f   : > { %v5223_v54 = vpop.f32.mrf.mxu1  ;;  %v4759_v53 = vld [vmem:[%s7707_s13 + $0x48] sm:$0xff] }
 0x710   : > { %v3788_v54 = vld [vmem:[%s7707_s13] sm:$0xff] }
 0x72d   : > { %v3093_v41 = vpop.f32.mrf.mxu0 }
 0x72e   : > { %v3182_v56 = vpop.f32.mrf.mxu1  ;;  %v3097_v2 = vadd.f32 %v3093_v41, %v3006_v52  ;;  %v3789_v52 = vld [vmem:[%s7707_s13 + $0x8] sm:$0xff] }
 0x72f   : > { %v5258_v57 = vpop.f32.mrf.mxu0 }
 0x730   : > { %v5293_v58 = vpop.f32.mrf.mxu1  ;;  %v3186_v3 = vadd.f32 %v3182_v56, %v3097_v2  ;;  %v4784_v56 = vld [vmem:[%s7707_s13 + $0xf8] sm:$0xff]  ;;  %v4782_v2 = vld [vmem:[%s7707_s13 + $0xe8] sm:$0xff] }
 0x74f   : > { %v3271_v59 = vpop.f32.mrf.mxu0 }
 0x750   : > { %v3360_v60 = vpop.f32.mrf.mxu1  ;;  %v3275_v4 = vadd.f32 %v3271_v59, %v3186_v3  ;;  %v4773_v3 = vld [vmem:[%s7707_s13 + $0xa8] sm:$0xff] }
 0x751   : > { %v5328_v61 = vpop.f32.mrf.mxu0 }
 0x752   : > { %v5363_v63 = vpop.f32.mrf.mxu1  ;;  %v3364_v6 = vadd.f32 %v3360_v60, %v3275_v4  ;;  %v4775_v60 = vld [vmem:[%s7707_s13 + $0xb8] sm:$0xff]  ;;  %v4783_v61 = vld [vmem:[%s7707_s13 + $0xf0] sm:$0xff]  ;;  %v4781_v4 = vld [vmem:[%s7707_s13 + $0xe0] sm:$0xff] }
 0x753   : > { %v4774_v63 = vld [vmem:[%s7707_s13 + $0xb0] sm:$0xff] }
 0x770   : > { %v3449_v7 = vpop.f32.mrf.mxu0 }
 0x771   : > { %v3453_v9 = vadd.f32 %v3449_v7, %v3364_v6  ;;  %v4772_v6 = vld [vmem:[%s7707_s13 + $0xa0] sm:$0xff]  ;;  %v4780_v7 = vld [vmem:[%s7707_s13 + $0xd8] sm:$0xff] }
 0x772   : > { %v5398_v12 = vpop.f32.mrf.mxu0 }
 0x773   : > { %v3461_v11 = vadd.f32 %v4738_v8, %v3453_v9  ;;  %v4771_v8 = vld [vmem:[%s7707_s13 + $0x98] sm:$0xff]  ;;  %v4779_v9 = vld [vmem:[%s7707_s13 + $0xd0] sm:$0xff] }
 0x774   : > { %v4770_v12 = vld [vmem:[%s7707_s13 + $0x90] sm:$0xff] }
 0x775   : > { %v3462_v14 = vmax.f32 %v3461_v11, 0.0  ;;  %v4778_v11 = vld [vmem:[%s7707_s13 + $0xc8] sm:$0xff] }
 0x777   : > { %5400 = vmatpush3.msra.mxu0 %v3462_v14 }
 0x778   : > { %5402 = vmatmul.mubr.msk.f32.vlgmr.msra.gmra.mxu0 %vm3464_vm3, %v3463_v16  ;;  %5404 = vmatprep.subr.mxu0 %v7167_v47  ;;  %v4777_v16 = vld [vmem:[%s7707_s13 + $0xc0] sm:$0xff] }
 0x779   : > { %5405 = vmatpush3.msra.mxu0 %v3462_v14  ;;  %5406 = vmatprep.mubr.msk.f32.mxu0 %vm6105_vm2, %v7167_v47  ;;  %v4769_v14 = vld [vmem:[%s7707_s13 + $0x88] sm:$0xff] }
 0x77a   : > { %5444 = vmatprep.subr.mxu0 %v7167_v47 }
 0x77c   : > { %5407 = vmatmul.mubr.msk.f32.vlgmr.msra.gmra.mxu0 %vm3464_vm3, %v4740_v10 }
 0x77d   : > { %5445 = vmatpush3.msra.mxu0 %v4757_v15  ;;  %5476 = vmatprep.mubr.msk.f32.mxu0 %vm6105_vm2, %v7167_v47  ;;  %v4768_v15 = vld [vmem:[%s7707_s13 + $0x80] sm:$0xff] }
 0x77e   : > { %5446 = vmatprep.subr.mxu0 %v7167_v47 }
 0x77f   : > { %5447 = vmatpush3.msra.mxu0 %v4756_v17 }
 0x780   : > { %5448 = vmatprep.subr.mxu0 %v7167_v47 }
 0x781   : > { %5449 = vmatpush3.msra.mxu0 %v4755_v18  ;;  %v4127_v18 = vld [vmem:[%s7709_s15 + $0x30] sm:$0x7] }
 0x782   : > { %5450 = vmatprep.subr.mxu0 %v7167_v47 }
 0x783   : > { %5451 = vmatpush3.msra.mxu0 %v4754_v19  ;;  %v4126_v19 = vld [vmem:[%s7709_s15 + $0x28] sm:$0xff] }
 0x784   : > { %5452 = vmatprep.subr.mxu0 %v7167_v47 }
 0x785   : > { %5453 = vmatpush3.msra.mxu0 %v4753_v21  ;;  %v4125_v21 = vld [vmem:[%s7709_s15 + $0x20] sm:$0xff] }
 0x786   : > { %5454 = vmatprep.subr.mxu0 %v7167_v47 }
 0x787   : > { %5455 = vmatpush3.msra.mxu0 %v4752_v0  ;;  %v4124_v0 = vld [vmem:[%s7709_s15 + $0x18] sm:$0xff] }
 0x788   : > { %5456 = vmatprep.subr.mxu0 %v7167_v47 }
 0x789   : > { %5457 = vmatpush3.msra.mxu0 %v4751_v22  ;;  %v4123_v22 = vld [vmem:[%s7709_s15 + $0x10] sm:$0xff] }
 0x78a   : > { %5458 = vmatprep.subr.mxu0 %v7167_v47 }
 0x78b   : > { %5459 = vmatpush3.msra.mxu0 %v4750_v49  ;;  %v4122_v49 = vld [vmem:[%s7709_s15 + $0x8] sm:$0xff] }
 0x78c   : > { %5460 = vmatprep.subr.mxu0 %v7167_v47 }
 0x78d   : > { %5461 = vmatpush3.msra.mxu0 %v4749_v23  ;;  %v4121_v23 = vld [vmem:[%s7709_s15] sm:$0xff] }
 0x78e   : > { %5462 = vmatprep.subr.mxu0 %v7167_v47 }
 0x78f   : > { %5463 = vmatpush3.msra.mxu0 %v4748_v24 }
 0x790   : > { %5464 = vmatprep.subr.mxu0 %v7167_v47 }
 0x791   : > { %5465 = vmatpush3.msra.mxu0 %v4747_v25 }
 0x792   : > { %5466 = vmatprep.subr.mxu0 %v7167_v47 }
 0x793   : > { %5467 = vmatpush3.msra.mxu0 %v4746_v26 }
 0x794   : > { %5468 = vmatprep.subr.mxu0 %v7167_v47 }
 0x795   : > { %5469 = vmatpush3.msra.mxu0 %v4745_v28 }
 0x796   : > { %5470 = vmatprep.subr.mxu0 %v7167_v47 }
 0x797   : > { %5471 = vmatpush3.msra.mxu0 %v4744_v30 }
 0x798   : > { %5472 = vmatprep.subr.mxu0 %v7167_v47 }
 0x799   : > { %5473 = vmatpush3.msra.mxu0 %v4743_v33 }
 0x79a   : > { %5474 = vmatprep.subr.mxu0 %v7167_v47 }
 0x79b   : > { %5475 = vmatpush3.msra.mxu0 %v4742_v20 }
 0x79c   : > { %5498 = vmatprep.subr.mxu0 %v7167_v47 }
 0x838   : > { %v3534_v35 = vpop.f32.mrf.mxu0 }
 0x83a   : > { %v5403_v36 = vpop.f32.mrf.mxu0 }
 0x83c   : > { %v3609_v32 = vpop.f32.mrf.mxu0 }
 0x83d   : > { %v3613_v37 = vmax.f32 %v3534_v35, %v3609_v32 }
 0x83e   : > { %v5408_v39 = vpop.f32.mrf.mxu0 }
 0x83f   : > { %5442 = vmatmul.mubr.f32.vlgmr.msra.gmra.mxu1 %v3613_v37  ;;  %5477 = vmatmul.mubr.f32.vlgmr.msra.gmra.mxu0 %v3613_v37  ;;  %v4208_v37 = vld [vmem:[%s7711_s17] sm:$0x1f]  ;;  %v4294_v39 = vld [vmem:[%s7713_s19 + $0x28] sm:$0xff] }
 0x840   : > { %5499 = vmatpush3.msra.mxu0 %v3795_v27  ;;  %5480 = vmatpush3.msra.mxu1 %v4765_v13  ;;  %v4296_v27 = vld [vmem:[%s7713_s19 + $0x38] sm:$0xf]  ;;  %v4295_v13 = vld [vmem:[%s7713_s19 + $0x30] sm:$0xff] }
 0x841   : > { %5500 = vmatprep.subr.mxu0 %v7167_v47  ;;  %5481 = vmatprep.subr.mxu1 %v7167_v47 }
 0x842   : > { %5501 = vmatpush3.msra.mxu0 %v3794_v40  ;;  %5482 = vmatpush3.msra.mxu1 %v4764_v38  ;;  %v4293_v40 = vld [vmem:[%s7713_s19 + $0x20] sm:$0xff]  ;;  %v4292_v38 = vld [vmem:[%s7713_s19 + $0x18] sm:$0xff] }
 0x843   : > { %5502 = vmatprep.subr.mxu0 %v7167_v47  ;;  %5483 = vmatprep.subr.mxu1 %v7167_v47 }
 0x844   : > { %5503 = vmatpush3.msra.mxu0 %v3793_v42  ;;  %5484 = vmatpush3.msra.mxu1 %v4763_v43  ;;  %v4128_v42 = vld [vmem:[#allocation17] sm:$0x1] }
 0x845   : > { %5504 = vmatprep.subr.mxu0 %v7167_v47  ;;  %5485 = vmatprep.subr.mxu1 %v7167_v47 }
 0x846   : > { %5505 = vmatpush3.msra.mxu0 %v3792_v44  ;;  %5486 = vmatpush3.msra.mxu1 %v4762_v45 }
 0x847   : > { %5506 = vmatprep.subr.mxu0 %v7167_v47  ;;  %5487 = vmatprep.subr.mxu1 %v7167_v47 }
 0x848   : > { %5507 = vmatpush3.msra.mxu0 %v3791_v46  ;;  %5488 = vmatpush3.msra.mxu1 %v4761_v48  ;;  %v4291_v48 = vld [vmem:[%s7713_s19 + $0x10] sm:$0xff] }
 0x849   : > { %5508 = vmatprep.subr.mxu0 %v7167_v47  ;;  %5489 = vmatprep.subr.mxu1 %v7167_v47 }
 0x84a   : > { %5509 = vmatpush3.msra.mxu0 %v3790_v50  ;;  %5490 = vmatpush3.msra.mxu1 %v4760_v51  ;;  %v4290_v50 = vld [vmem:[%s7713_s19 + $0x8] sm:$0xff]  ;;  %v4289_v51 = vld [vmem:[%s7713_s19] sm:$0xff] }
 0x84b   : > { %5510 = vmatprep.subr.mxu0 %v7167_v47  ;;  %5491 = vmatprep.subr.mxu1 %v7167_v47 }
 0x84c   : > { %5511 = vmatpush3.msra.mxu0 %v3789_v52  ;;  %5514 = vmatprep.mubr.msk.f32.mxu0 %vm6105_vm2, %v7167_v47  ;;  %v4209_v52 = vld [vmem:[#allocation19] sm:$0x1] }
 0x84d   : > { %5512 = vmatprep.subr.mxu0 %v7167_v47  ;;  %5495 = vmatprep.mubr.msk.f32.mxu1 %vm6105_vm2, %v7167_v47 }
 0x84e   : > { %5492 = vmatpush3.msra.mxu1 %v4759_v53  ;;  %5513 = vmatpush3.msra.mxu0 %v3788_v54 }
 0x84f   : > { %5493 = vmatprep.subr.mxu1 %v7167_v47  ;;  %5536 = vmatprep.subr.mxu0 %v7167_v47 }
 0x850   : > { %5494 = vmatpush3.msra.mxu1 %v4758_v5 }
 0x851   : > { %5517 = vmatprep.subr.mxu1 %v7167_v47 }
 0x8ff   : > { %v3696_v62 = vpop.f32.mrf.mxu1  ;;  %v3783_v55 = vpop.f32.mrf.mxu0 }
 0x900   : > { %v3787_v41 = vmax.f32 %v3696_v62, %v3783_v55  ;;  %v4297_v55 = vld [vmem:[#allocation20] sm:$0x1] }
 0x901   : > { %v5443_v57 = vpop.f32.mrf.mxu1  ;;  %v5478_v58 = vpop.f32.mrf.mxu0 }
 0x902   : > { %v3806_v59 = vrot.slane %v3787_v41, 1  ;;  %5515 = vmatmul.mubr.msk.f32.vlgmr.msra.gmra.mxu0 %vm3807_vm4, %v3787_v41  ;;  %v4044_v10 = vrot.slane %v3787_v41, 3  ;;  %v3961_v17 = vrot.slane %v3787_v41, 2 }
 0x903   : > { %5537 = vmatpush3.msra.mxu0 %v4784_v56  ;;  %5552 = vmatprep.mubr.msk.f32.mxu0 %vm6105_vm2, %v7167_v47 }
 0x904   : > { %5538 = vmatprep.subr.mxu0 %v7167_v47  ;;  %5496 = vmatmul.mubr.msk.f32.vlgmr.msra.gmra.mxu1 %vm3807_vm4, %v3806_v59 }
 0x905   : > { %5518 = vmatpush3.msra.mxu1 %v4775_v60  ;;  %5539 = vmatpush3.msra.mxu0 %v4783_v61 }
 0x906   : > { %5519 = vmatprep.subr.mxu1 %v7167_v47  ;;  %5540 = vmatprep.subr.mxu0 %v7167_v47 }
 0x907   : > { %5520 = vmatpush3.msra.mxu1 %v4774_v63  ;;  %5541 = vmatpush3.msra.mxu0 %v4782_v2 }
 0x908   : > { %5521 = vmatprep.subr.mxu1 %v7167_v47  ;;  %5542 = vmatprep.subr.mxu0 %v7167_v47 }
 0x909   : > { %5522 = vmatpush3.msra.mxu1 %v4773_v3  ;;  %5543 = vmatpush3.msra.mxu0 %v4781_v4 }
 0x90a   : > { %5523 = vmatprep.subr.mxu1 %v7167_v47  ;;  %5544 = vmatprep.subr.mxu0 %v7167_v47 }
 0x90b   : > { %5524 = vmatpush3.msra.mxu1 %v4772_v6  ;;  %5545 = vmatpush3.msra.mxu0 %v4780_v7 }
 0x90c   : > { %5525 = vmatprep.subr.mxu1 %v7167_v47  ;;  %5546 = vmatprep.subr.mxu0 %v7167_v47 }
 0x90d   : > { %5526 = vmatpush3.msra.mxu1 %v4771_v8  ;;  %5547 = vmatpush3.msra.mxu0 %v4779_v9 }
 0x90e   : > { %5527 = vmatprep.subr.mxu1 %v7167_v47  ;;  %5548 = vmatprep.subr.mxu0 %v7167_v47 }
 0x90f   : > { %5528 = vmatpush3.msra.mxu1 %v4770_v12  ;;  %5549 = vmatpush3.msra.mxu0 %v4778_v11 }
 0x910   : > { %5529 = vmatprep.subr.mxu1 %v7167_v47  ;;  %5550 = vmatprep.subr.mxu0 %v7167_v47 }
 0x911   : > { %5530 = vmatpush3.msra.mxu1 %v4769_v14  ;;  %5551 = vmatpush3.msra.mxu0 %v4777_v16 }
 0x912   : > { %5531 = vmatprep.subr.mxu1 %v7167_v47  ;;  %5553 = vmatmul.mubr.msk.f32.vlgmr.msra.gmra.mxu0 %vm3807_vm4, %v4044_v10 }
 0x913   : > { %5532 = vmatpush3.msra.mxu1 %v4768_v15  ;;  %5533 = vmatprep.mubr.msk.f32.mxu1 %vm6105_vm2, %v7167_v47 }
 0x914   : > { %5534 = vmatmul.mubr.msk.f32.vlgmr.msra.gmra.mxu1 %vm3807_vm4, %v3961_v17  ;;  %5555 = vmatprep.subr.mxu1 %v7167_v47 }
 0x915   : > { %5569 = vmatprep.mubr.msk.f32.mxu1 %vm6105_vm2, %v7167_v47  ;;  %5572 = vmatprep.subr.mxu0 %v7167_v47 }
 0x916   : > { %5574 = vmatprep.mubr.msk.f32.mxu0 %vm6105_vm2, %v7167_v47  ;;  %5556 = vmatpush3.msk.msra.mxu1 %vm4133_vm5, %v4127_v18 }
 0x917   : > { %5557 = vmatprep.subr.mxu1 %v7167_v47  ;;  %5573 = vmatpush3.msk.msra.mxu0 %vm4214_vm7, %v4208_v37 }
 0x918   : > { %5558 = vmatpush3.msra.mxu1 %v4126_v19 }
 0x919   : > { %5559 = vmatprep.subr.mxu1 %v7167_v47 }
 0x91a   : > { %5560 = vmatpush3.msra.mxu1 %v4125_v21 }
 0x91b   : > { %5561 = vmatprep.subr.mxu1 %v7167_v47 }
 0x91c   : > { %5562 = vmatpush3.msra.mxu1 %v4124_v0 }
 0x91d   : > { %5563 = vmatprep.subr.mxu1 %v7167_v47 }
 0x91e   : > { %5564 = vmatpush3.msra.mxu1 %v4123_v22 }
 0x91f   : > { %5565 = vmatprep.subr.mxu1 %v7167_v47 }
 0x920   : > { %5566 = vmatpush3.msra.mxu1 %v4122_v49 }
 0x921   : > { %5567 = vmatprep.subr.mxu1 %v7167_v47 }
 0x922   : > { %5568 = vmatpush3.msra.mxu1 %v4121_v23 }
 0x923   : > { %5577 = vmatprep.subr.mxu1 %v7167_v47 }
 0x9c2   : > { %v3948_v24 = vpop.f32.mrf.mxu0 }
 0x9c4   : > { %v3876_v25 = vpop.f32.mrf.mxu1  ;;  %v5516_v26 = vpop.f32.mrf.mxu0 }
 0x9c5   : > { %v3949_v29 = vadd.f32 %v3948_v24, %v3876_v25 }
 0x9c6   : > { %v5497_v1 = vpop.f32.mrf.mxu1 }
 0x9d2   : > { %v4113_v28 = vpop.f32.mrf.mxu0 }
 0x9d4   : > { %v4030_v30 = vpop.f32.mrf.mxu1  ;;  %v5554_v31 = vpop.f32.mrf.mxu0 }
 0x9d5   : > { %v4034_v33 = vadd.f32 %v4030_v30, %v3949_v29 }
 0x9d6   : > { %v5535_v20 = vpop.f32.mrf.mxu1 }
 0x9d7   : > { %v4117_v35 = vadd.f32 %v4113_v28, %v4034_v33 }
 0x9d9   : > { %v4119_v36 = vadd.f32 %v4118_v34, %v4117_v35 }
 0x9db   : > { %v4120_v32 = vmax.f32 %v4119_v36, 0.0 }
 0x9dd   : > { %5570 = vmatmul.mubr.msk.f32.vlgmr.msra.gmra.mxu1 %vm4129_vm6, %v4120_v32 }
 0x9de   : > { %5593 = vmatprep.mubr.msk.f32.mxu1 %vm6105_vm2, %v7167_v47  ;;  %5578 = vmatpush3.msk.msra.mxu1 %vm4302_vm8, %v4296_v27 }
 0x9df   : > { %5579 = vmatprep.subr.mxu1 %v7167_v47 }
 0x9e0   : > { %5580 = vmatpush3.msra.mxu1 %v4295_v13 }
 0x9e1   : > { %5581 = vmatprep.subr.mxu1 %v7167_v47 }
 0x9e2   : > { %5582 = vmatpush3.msra.mxu1 %v4294_v39 }
 0x9e3   : > { %5583 = vmatprep.subr.mxu1 %v7167_v47 }
 0x9e4   : > { %5584 = vmatpush3.msra.mxu1 %v4293_v40 }
 0x9e5   : > { %5585 = vmatprep.subr.mxu1 %v7167_v47 }
 0x9e6   : > { %5586 = vmatpush3.msra.mxu1 %v4292_v38 }
 0x9e7   : > { %5587 = vmatprep.subr.mxu1 %v7167_v47 }
 0x9e8   : > { %5588 = vmatpush3.msra.mxu1 %v4291_v48 }
 0x9e9   : > { %5589 = vmatprep.subr.mxu1 %v7167_v47 }
 0x9ea   : > { %5590 = vmatpush3.msra.mxu1 %v4290_v50 }
 0x9eb   : > { %5591 = vmatprep.subr.mxu1 %v7167_v47 }
 0x9ec   : > { %5592 = vmatpush3.msra.mxu1 %v4289_v51 }
 0xa9d   : > { %v4203_v43 = vpop.f32.mrf.mxu1 }
 0xa9e   : > { %v4204_v44 = vadd.f32 %v4203_v43, %v4128_v42 }
 0xa9f   : > { %v5571_v45 = vpop.f32.mrf.mxu1 }
 0xaa0   : > { %v4207_v46 = vmax.f32 %v4204_v44, 0.0 }
 0xaa2   : > { %5575 = vmatmul.mubr.msk.f32.vlgmr.msra.gmra.mxu0 %vm4210_vm9, %v4207_v46 }
 0xb62   : > { %v4284_v53 = vpop.f32.mrf.mxu0 }
 0xb63   : > { %v4285_v54 = vadd.f32 %v4284_v53, %v4209_v52 }
 0xb64   : > { %v5576_v5 = vpop.f32.mrf.mxu0 }
 0xb65   : > { %v4288_v62 = vmax.f32 %v4285_v54, 0.0 }
 0xb67   : > { %5594 = vmatmul.mubr.msk.f32.vlgmr.msra.gmra.mxu1 %vm4298_vm10, %v4288_v62 }
 0xc27   : > { %v4372_v41 = vpop.f32.mrf.mxu1 }
 0xc28   : > { %v4373_v47 = vadd.f32 %v4372_v41, %v4297_v55 }
 0xc29   : > { %v5595_v56 = vpop.f32.mrf.mxu1 }
 0xc2a   : > { %v4376_v57 = vmax.f32 %v4373_v47, 0.0 }
 0xc2c   : > { %4378 = vst.msk [vmem:[%s782_s2] sm:$0x1] %vm4377_vm11, %v4376_v57 }
 0xc2d   : > { %6017 = shalt.err (!%p6014_p2)
}
 0xc2e   : > { %s6018_s4 = scalar_lea.hbm %s4390_s26, 16  ;;  %s6022_s2 = scalar_lea.hbm %s7776_s21, 32 }
 0xc2f   : > { %p6019_p4 = scmp.ne.s32.totalorder %s4390_s26, %s6018_s4  ;;  %p6023_p11 = scmp.lt.s32.totalorder %s4390_s26, %s7776_s21 }
 0xc30   : > { %p6024_p0 = scmp.lt.s32.totalorder %s6022_s2, %s6018_s4 }
 0xc31   : > { %p6020_p7 = pnand %p6019_p4, %p7777_p6 }
 0xc32   : > { %p6025_p9 = por %p6024_p0, %p6023_p11 }
 0xc33   : > { %p6021_p8 = pneg %p6020_p7 }
 0xc35   : > { %p6026_p5 = pnand %p6025_p9, %p6021_p8 }
 0xc37   : > { %6029 = shalt.err (!%p6026_p5)
}
 0xc38   : > { %5636 = dma.vmem_to_hbm [thread:$0]  (%p7777_p6), %s4393_s23, 16, %s4390_s26, %s4380_s22  }
 0xc39 PF: > { %s7778_s30 = sld [smem:[#allocation32_spill]] }
 0xc3a   : > { %s7779_s27 = sld [smem:[#allocation30_spill]] }
 0xc3b   : > { %s7780_s3 = sld [smem:[#allocation36_spill]] }
 0xc3f   : > { %p5693_p13 = scmp.ge.s32.totalorder %s7778_s30, 2 }
 0xc40   : > { %s4404_s0 = sand.u32 1, %s7779_s27  }
 0xc41   : > { %p7781_p10 = scmp.ne.s32.totalorder %s7780_s3, 0  ;;  %s4405_s5 = scalar_lea.sflag [#allocation7], %s4404_s0 }
 0xc43   : > { %p5670_p1 = pnand %p5693_p13, %p7781_p10 }
 0xc45   : > { %p5671_p3 = pneg %p5670_p1 }
 0xc47   : > { %6071 = dma.done.wait (%p5671_p3), %s4405_s5, 16  }
 0xc48   : > { %6073 = vsyncadd (%p5671_p3), %s4405_s5, 4294967280  ;;  %s7782_s27 = sld [smem:[#allocation33_spill]]  ;;  %s7785_s2 = smov %s6080_s25 }
 0xc49   : > { %s7783_s4 = sld [smem:[#allocation31_spill]] }
 0xc4a   : > { %s7784_s26 = sld [smem:[#allocation34_spill]] }
 0xc4e   : > { %p37_p12 = scmp.ge.s32.totalorder %s7782_s27, 4  }
 0xc4f   : > { %s7786_s25 = smov %s7783_s4 }
 0xc50   :  { %39 = sbr.rel (!%p37_p12) target bundleno = 18 (0x12), region = 203 }
 0xc55   :  { %4409 = vsyncpa [#allocation6], 1 }
 0xc56   :  { %4411 = vsyncpa [#allocation6 + $0x1], 1 }
 0xc57   :  { %4412 = vsyncpa [#allocation9], 1 }
 0xc58   :  { %4413 = vsyncpa [#allocation12], 1 }
 0xc59   :  { %4414 = vsyncpa [#allocation15], 1 }
 0xc5a   :  { %4415 = vsyncpa [#allocation18], 1 }
 0xc5b   :  { %4416 = vsyncpa [#allocation21], 1 }
 0xc5c   :  { %4417 = vsyncpa [#allocation7], 1 }
 0xc5d   :  { %4419 = vsyncpa [#allocation7 + $0x1], 1 }

</bundles_post_ra>
